<compile_context>
chip_gen: v5e
topology: v5e:2x2
jax: 0.10.0
libtpu: 0.0.40
codegen_flags: <defaults>
</compile_context>

<pallas_src>
import functools

import jax
import jax.numpy as jnp
from jax import lax
from jax.experimental import pallas as pl
from jax.experimental.pallas import tpu as pltpu


def _round_up(v, m):
    return (v + m - 1) // m * m


def _fused_multi_conv2d_kernel(x_ref, mask_ref, *rest, num_layers, cin_pads,
                               cout_pads, wp, lane_w, dot_dtype):
    """Fully fused MultiConv2d forward for one batch-tile of images.

    x_ref     : (Cin0_pad, lane_w)   padded, flattened, batch-folded input
    mask_ref  : (1, lane_w)          1.0 on valid HxW interior, 0.0 on border/tail
    rest      : w_0, b_0, ..., w_{L-1}, b_{L-1}, o_ref, im2col_scratch[, act_scratch]
                w_l : (Cout_pad_l, 9*Cin_pad_l)  fused tap-major weights
                b_l : (Cout_pad_l, 1)            bias (f32)
                o_ref : (Cout_pad_last, lane_w)
                im2col_scratch : VMEM (9*max(Cin_pad), lane_w) dot_dtype
                act_scratch    : VMEM (max hidden Cout_pad, lane_w) f32
    """
    nwb = 2 * num_layers
    w_refs = rest[0:nwb:2]
    b_refs = rest[1:nwb:2]
    o_ref = rest[nwb]
    im2col_ref = rest[nwb + 1]
    act_ref = rest[nwb + 2] if num_layers > 1 else None

    mask = mask_ref[...] if num_layers > 1 else None   # (1, lane_w) f32, hoisted

    for l in range(num_layers):
        cin_p, cout_p = cin_pads[l], cout_pads[l]

        def load_src():
            src = x_ref[...] if l == 0 else act_ref[:cin_p, :]
            return src.astype(dot_dtype)

        # --- im2col: 9 lane-rolled copies of the layer input stacked along the
        # contraction (sublane) axis.  Each roll result is streamed straight into
        # VMEM so at most one rolled copy is live at a time.
        for ky in range(3):
            for kx in range(3):
                t = ky * 3 + kx
                d = (ky - 1) * wp + (kx - 1)      # flat neighbor offset in padded image
                shift = (-d) % lane_w             # np.roll convention on the lane axis
                src = load_src()
                xs = src if shift == 0 else pltpu.roll(src, shift, axis=1)
                im2col_ref[pl.ds(t * cin_p, cin_p), :] = xs

        # --- ONE fused MXU matmul per layer: K = 9*Cin_pad fills the systolic array.
        acc = jnp.dot(w_refs[l][...], im2col_ref[:9 * cin_p, :],
                      preferred_element_type=jnp.float32)
        acc = acc + b_refs[l][...]                         # (Cout_p, 1) f32 bias

        if l < num_layers - 1:
            acc = jnp.maximum(acc, 0.0) * mask   # ReLU + re-establish zero padding (f32 VPU)
            act_ref[:cout_p, :] = acc            # next layer's input, stays in VMEM
        else:
            o_ref[...] = acc.astype(o_ref.dtype)  # lane-dense store


def multi_conv2d(x, weights, biases, *, batch_tile=None, dot_dtype=jnp.float32):
    """Fused MultiConv2d forward.

    x        : (N, C_in, H, W)                  (PyTorch NCHW layout)
    weights  : list of (C_out_l, C_in_l, 3, 3)  (PyTorch Conv2d weight layout)
    biases   : list of (C_out_l,)
    dot_dtype: dtype fed to the MXU. jnp.float32 (default, matches f32 reference)
               or jnp.bfloat16 (2x MXU rate on v6e/v7x; accumulation stays f32).
    returns  : (N, C_out_last, H, W)
    """
    n, c0, h, w = x.shape
    num_layers = len(weights)
    hp, wp = h + 2, w + 2
    s = hp * wp
    s_pad = _round_up(s, 128)                    # lane-dense flattened spatial extent

    dot_dtype = jnp.dtype(dot_dtype)
    sub = 8 * max(1, 4 // dot_dtype.itemsize)    # sublane tile: 8 rows (f32), 16 (bf16)

    cins = [wl.shape[1] for wl in weights]
    couts = [wl.shape[0] for wl in weights]
    cin_pads = [_round_up(c, sub) for c in cins]
    cout_pads = [_round_up(c, sub) for c in couts]
    c0_pad = cin_pads[0]

    # --- Batch folding: bt images are concatenated on the lane axis per grid step,
    # so each layer is ONE (Cout_p, 9*Cin_p) x (9*Cin_p, bt*s_pad) matmul.
    if batch_tile is None:
        batch_tile = max(1, min(n, pl.cdiv(1024, s_pad)))   # aim for >=~1024-lane N
    bt = batch_tile
    n_pad = _round_up(n, bt)
    n_tiles = n_pad // bt
    lane_w = bt * s_pad

    # --- Input prep: zero-pad channels to c0_pad, spatial border of 1 (padding=1),
    # flatten spatial onto lanes, pad lanes to s_pad, fold batch under channels.
    x_p = jnp.pad(x, ((0, n_pad - n), (0, c0_pad - c0), (1, 1), (1, 1)))
    x_p = jnp.pad(x_p.reshape(n_pad, c0_pad, s), ((0, 0), (0, 0), (0, s_pad - s)))
    x_p = jnp.transpose(x_p, (1, 0, 2)).reshape(c0_pad, n_pad * s_pad)

    # Interior mask (1 on the HxW interior of each image slab, 0 on conv border and
    # lane tail).  Re-applied to every intermediate so pltpu.roll wrap-around /
    # cross-image leakage never reaches a valid interior position.
    pq = jnp.arange(s_pad)
    p_idx, q_idx = pq // wp, pq % wp
    m = ((p_idx >= 1) & (p_idx <= h) & (q_idx >= 1) & (q_idx <= w)).astype(jnp.float32)
    mask = jnp.tile(m, (bt,)).reshape(1, lane_w)

    in_specs = [
        pl.BlockSpec((c0_pad, lane_w), lambda i: (0, i)),   # per-step input slab
        pl.BlockSpec((1, lane_w), lambda i: (0, 0)),        # border mask (resident)
    ]
    call_args = [x_p, mask]

    # Weights -> (Cout_pad, 9*Cin_pad), K tap-major / channel-minor (matches the
    # in-kernel im2col scratch); biases -> (Cout_pad, 1) f32.  Cin/Cout zero-padded
    # to the sublane tile so all kernel stores / weight tiles are (8,128)-aligned.
    for wl, bl, ci_p, co_p in zip(weights, biases, cin_pads, cout_pads):
        co, ci = wl.shape[0], wl.shape[1]
        w_pad = jnp.pad(wl, ((0, co_p - co), (0, ci_p - ci), (0, 0), (0, 0)))
        w_f = jnp.transpose(w_pad, (0, 2, 3, 1)).reshape(co_p, 9 * ci_p).astype(dot_dtype)
        b_f = jnp.pad(bl, (0, co_p - co)).reshape(co_p, 1).astype(jnp.float32)
        call_args += [w_f, b_f]
        in_specs += [pl.BlockSpec(w_f.shape, lambda i: (0, 0)),
                     pl.BlockSpec(b_f.shape, lambda i: (0, 0))]

    cin_pad_max = max(cin_pads)
    scratch_shapes = [pltpu.VMEM((9 * cin_pad_max, lane_w), dot_dtype)]     # im2col
    scratch_bytes = 9 * cin_pad_max * lane_w * dot_dtype.itemsize
    if num_layers > 1:
        c_hid = max(cout_pads[:-1])
        scratch_shapes.append(pltpu.VMEM((c_hid, lane_w), jnp.float32))     # activations
        scratch_bytes += c_hid * lane_w * 4

    # Advisory cost estimate + explicit VMEM budget (v5e default scoped limit: 16 MiB).
    flops = 2 * n * h * w * sum(9 * ci * co for ci, co in zip(cins, couts))
    param_bytes = sum(int(a.size) * a.dtype.itemsize for a in call_args[2:])
    bytes_accessed = int(x.size) * x.dtype.itemsize + param_bytes \
        + n_pad * s_pad * cout_pads[-1] * x.dtype.itemsize
    io_bytes = 2 * (c0_pad + cout_pads[-1] + 1) * lane_w * x.dtype.itemsize
    vmem_limit = int(min(64 << 20,
                         max(32 << 20, 2 * (scratch_bytes + io_bytes + 2 * param_bytes))))

    kern = functools.partial(_fused_multi_conv2d_kernel,
                             num_layers=num_layers,
                             cin_pads=tuple(cin_pads),
                             cout_pads=tuple(cout_pads),
                             wp=wp, lane_w=lane_w, dot_dtype=dot_dtype)

    out = pl.pallas_call(
        kern,
        out_shape=jax.ShapeDtypeStruct((cout_pads[-1], n_pad * s_pad), x.dtype),
        grid=(n_tiles,),
        in_specs=in_specs,
        out_specs=pl.BlockSpec((cout_pads[-1], lane_w), lambda i: (0, i)),
        scratch_shapes=scratch_shapes,
        compiler_params=pltpu.CompilerParams(
            dimension_semantics=("parallel",),
            vmem_limit_bytes=vmem_limit),
        cost_estimate=pl.CostEstimate(flops=flops, transcendentals=0,
                                      bytes_accessed=bytes_accessed),
    )(*call_args)

    # Un-fold / un-pad: drop padded channels & batch & lane tail, drop the 1-pixel
    # conv border, and restore NCHW.  (Padded border/tail lanes of `out` hold
    # garbage from circular rolls by design — never consume them directly.)
    out = out.reshape(cout_pads[-1], n_pad, s_pad)[:couts[-1], :n, :s]
    out = out.reshape(couts[-1], n, hp, wp)[:, :, 1:hp - 1, 1:wp - 1]
    return jnp.transpose(out, (1, 0, 2, 3))


def ref_multi_conv2d(x, weights, biases):
    """Pure-JAX reference (lax conv == PyTorch Conv2d cross-correlation, padding=1)."""
    out = x
    for i, (wl, bl) in enumerate(zip(weights, biases)):
        out = lax.conv_general_dilated(
            out, wl, window_strides=(1, 1), padding=((1, 1), (1, 1)),
            dimension_numbers=("NCHW", "OIHW", "NCHW"))
        out = out + bl[None, :, None, None]
        if i < len(weights) - 1:
            out = jnp.maximum(out, 0.0)
    return out


def init_params(key, input_dim, hidden_dim, output_dim, num_layers):
    hdims = [hidden_dim] * (num_layers - 1)
    in_dims = [input_dim] + hdims
    out_dims = hdims + [output_dim]
    weights, biases = [], []
    for cin, cout in zip(in_dims, out_dims):
        key, kw, kb = jax.random.split(key, 3)
        bound = 1.0 / jnp.sqrt(cin * 9.0)  # PyTorch-style fan_in uniform bound
        weights.append(jax.random.uniform(kw, (cout, cin, 3, 3), jnp.float32, -bound, bound))
        biases.append(jax.random.uniform(kb, (cout,), jnp.float32, -bound, bound))
    return weights, biases


if __name__ == "__main__":
    key = jax.random.PRNGKey(0)

    batch, input_dim, hidden_dim, output_dim, num_layers = 2, 4, 32, 8, 3
    height = width = 16

    key, kx = jax.random.split(key)
    x = jax.random.normal(kx, (batch, input_dim, height, width), jnp.float32)
    weights, biases = init_params(key, input_dim, hidden_dim, output_dim, num_layers)

    out = jax.block_until_ready(multi_conv2d(x, weights, biases))
    ref = jax.block_until_ready(ref_multi_conv2d(x, weights, biases))

    assert out.shape == (batch, output_dim, height, width), out.shape
    assert jnp.allclose(out, ref, atol=1e-4, rtol=1e-4), float(jnp.max(jnp.abs(out - ref)))

    print("KERNEL_OK")
</pallas_src>

<mosaic_0001>
module attributes {stable_mosaic.version = 11 : i64} {
  func.func @_fused_multi_conv2d_kernel(%arg0: i32, %arg1: memref<8x768xf32, #tpu.memory_space<vmem>>, %arg2: memref<1x768xf32, #tpu.memory_space<vmem>>, %arg3: memref<32x72xf32, #tpu.memory_space<vmem>>, %arg4: memref<32x1xf32, #tpu.memory_space<vmem>>, %arg5: memref<32x288xf32, #tpu.memory_space<vmem>>, %arg6: memref<32x1xf32, #tpu.memory_space<vmem>>, %arg7: memref<8x288xf32, #tpu.memory_space<vmem>>, %arg8: memref<8x1xf32, #tpu.memory_space<vmem>>, %arg9: memref<8x768xf32, #tpu.memory_space<vmem>>, %arg10: memref<288x768xf32, #tpu.memory_space<vmem>>, %arg11: memref<32x768xf32, #tpu.memory_space<vmem>>) attributes {dimension_semantics = [#tpu.dimension_semantics<parallel>], iteration_bounds = array<i64: 1>, scalar_prefetch = 0 : i64, scratch_operands = 2 : i64, tpu.core_type = #tpu.core_type<tc>, window_params = [{transform_indices = @transform_0, window_bounds = array<i64: 8, 768>}, {pipeline_mode = #tpu.pipeline_mode<synchronous>, transform_indices = @transform_1, window_bounds = array<i64: 1, 768>}, {pipeline_mode = #tpu.pipeline_mode<synchronous>, transform_indices = @transform_2, window_bounds = array<i64: 32, 72>}, {pipeline_mode = #tpu.pipeline_mode<synchronous>, transform_indices = @transform_3, window_bounds = array<i64: 32, 1>}, {pipeline_mode = #tpu.pipeline_mode<synchronous>, transform_indices = @transform_4, window_bounds = array<i64: 32, 288>}, {pipeline_mode = #tpu.pipeline_mode<synchronous>, transform_indices = @transform_5, window_bounds = array<i64: 32, 1>}, {pipeline_mode = #tpu.pipeline_mode<synchronous>, transform_indices = @transform_6, window_bounds = array<i64: 8, 288>}, {pipeline_mode = #tpu.pipeline_mode<synchronous>, transform_indices = @transform_7, window_bounds = array<i64: 8, 1>}, {transform_indices = @transform_8, window_bounds = array<i64: 8, 768>}]} {
    %c0 = arith.constant 0 : index
    %c0_0 = arith.constant 0 : index
    %0 = vector.load %arg2[%c0, %c0_0] : memref<1x768xf32, #tpu.memory_space<vmem>>, vector<1x768xf32>
    %c0_1 = arith.constant 0 : index
    %c0_2 = arith.constant 0 : index
    %1 = vector.load %arg1[%c0_1, %c0_2] : memref<8x768xf32, #tpu.memory_space<vmem>>, vector<8x768xf32>
    %c19_i32 = arith.constant 19 : i32
    %2 = tpu.dynamic_rotate %1 by %c19_i32 dim 1 : vector<8x768xf32>, i32 -> vector<8x768xf32>
    %c0_3 = arith.constant 0 : index
    %c0_4 = arith.constant 0 : index
    %3 = vector.load %arg10[%c0_3, %c0_4] : memref<288x768xf32, #tpu.memory_space<vmem>>, vector<8x768xf32>
    tpu.vector_store %arg10[%c0_3, %c0_4], %2 {strides = array<i32>} : memref<288x768xf32, #tpu.memory_space<vmem>>, vector<8x768xf32>,
    %c0_5 = arith.constant 0 : index
    %c0_6 = arith.constant 0 : index
    %4 = vector.load %arg1[%c0_5, %c0_6] : memref<8x768xf32, #tpu.memory_space<vmem>>, vector<8x768xf32>
    %c18_i32 = arith.constant 18 : i32
    %5 = tpu.dynamic_rotate %4 by %c18_i32 dim 1 : vector<8x768xf32>, i32 -> vector<8x768xf32>
    %c8 = arith.constant 8 : index
    %c0_7 = arith.constant 0 : index
    %6 = vector.load %arg10[%c8, %c0_7] : memref<288x768xf32, #tpu.memory_space<vmem>>, vector<8x768xf32>
    tpu.vector_store %arg10[%c8, %c0_7], %5 {strides = array<i32>} : memref<288x768xf32, #tpu.memory_space<vmem>>, vector<8x768xf32>,
    %c0_8 = arith.constant 0 : index
    %c0_9 = arith.constant 0 : index
    %7 = vector.load %arg1[%c0_8, %c0_9] : memref<8x768xf32, #tpu.memory_space<vmem>>, vector<8x768xf32>
    %c17_i32 = arith.constant 17 : i32
    %8 = tpu.dynamic_rotate %7 by %c17_i32 dim 1 : vector<8x768xf32>, i32 -> vector<8x768xf32>
    %c16 = arith.constant 16 : index
    %c0_10 = arith.constant 0 : index
    %9 = vector.load %arg10[%c16, %c0_10] : memref<288x768xf32, #tpu.memory_space<vmem>>, vector<8x768xf32>
    tpu.vector_store %arg10[%c16, %c0_10], %8 {strides = array<i32>} : memref<288x768xf32, #tpu.memory_space<vmem>>, vector<8x768xf32>,
    %c0_11 = arith.constant 0 : index
    %c0_12 = arith.constant 0 : index
    %10 = vector.load %arg1[%c0_11, %c0_12] : memref<8x768xf32, #tpu.memory_space<vmem>>, vector<8x768xf32>
    %c1_i32 = arith.constant 1 : i32
    %11 = tpu.dynamic_rotate %10 by %c1_i32 dim 1 : vector<8x768xf32>, i32 -> vector<8x768xf32>
    %c24 = arith.constant 24 : index
    %c0_13 = arith.constant 0 : index
    %12 = vector.load %arg10[%c24, %c0_13] : memref<288x768xf32, #tpu.memory_space<vmem>>, vector<8x768xf32>
    tpu.vector_store %arg10[%c24, %c0_13], %11 {strides = array<i32>} : memref<288x768xf32, #tpu.memory_space<vmem>>, vector<8x768xf32>,
    %c0_14 = arith.constant 0 : index
    %c0_15 = arith.constant 0 : index
    %13 = vector.load %arg1[%c0_14, %c0_15] : memref<8x768xf32, #tpu.memory_space<vmem>>, vector<8x768xf32>
    %c32 = arith.constant 32 : index
    %c0_16 = arith.constant 0 : index
    %14 = vector.load %arg10[%c32, %c0_16] : memref<288x768xf32, #tpu.memory_space<vmem>>, vector<8x768xf32>
    tpu.vector_store %arg10[%c32, %c0_16], %13 {strides = array<i32>} : memref<288x768xf32, #tpu.memory_space<vmem>>, vector<8x768xf32>,
    %c0_17 = arith.constant 0 : index
    %c0_18 = arith.constant 0 : index
    %15 = vector.load %arg1[%c0_17, %c0_18] : memref<8x768xf32, #tpu.memory_space<vmem>>, vector<8x768xf32>
    %c767_i32 = arith.constant 767 : i32
    %16 = tpu.dynamic_rotate %15 by %c767_i32 dim 1 : vector<8x768xf32>, i32 -> vector<8x768xf32>
    %c40 = arith.constant 40 : index
    %c0_19 = arith.constant 0 : index
    %17 = vector.load %arg10[%c40, %c0_19] : memref<288x768xf32, #tpu.memory_space<vmem>>, vector<8x768xf32>
    tpu.vector_store %arg10[%c40, %c0_19], %16 {strides = array<i32>} : memref<288x768xf32, #tpu.memory_space<vmem>>, vector<8x768xf32>,
    %c0_20 = arith.constant 0 : index
    %c0_21 = arith.constant 0 : index
    %18 = vector.load %arg1[%c0_20, %c0_21] : memref<8x768xf32, #tpu.memory_space<vmem>>, vector<8x768xf32>
    %c751_i32 = arith.constant 751 : i32
    %19 = tpu.dynamic_rotate %18 by %c751_i32 dim 1 : vector<8x768xf32>, i32 -> vector<8x768xf32>
    %c48 = arith.constant 48 : index
    %c0_22 = arith.constant 0 : index
    %20 = vector.load %arg10[%c48, %c0_22] : memref<288x768xf32, #tpu.memory_space<vmem>>, vector<8x768xf32>
    tpu.vector_store %arg10[%c48, %c0_22], %19 {strides = array<i32>} : memref<288x768xf32, #tpu.memory_space<vmem>>, vector<8x768xf32>,
    %c0_23 = arith.constant 0 : index
    %c0_24 = arith.constant 0 : index
    %21 = vector.load %arg1[%c0_23, %c0_24] : memref<8x768xf32, #tpu.memory_space<vmem>>, vector<8x768xf32>
    %c750_i32 = arith.constant 750 : i32
    %22 = tpu.dynamic_rotate %21 by %c750_i32 dim 1 : vector<8x768xf32>, i32 -> vector<8x768xf32>
    %c56 = arith.constant 56 : index
    %c0_25 = arith.constant 0 : index
    %23 = vector.load %arg10[%c56, %c0_25] : memref<288x768xf32, #tpu.memory_space<vmem>>, vector<8x768xf32>
    tpu.vector_store %arg10[%c56, %c0_25], %22 {strides = array<i32>} : memref<288x768xf32, #tpu.memory_space<vmem>>, vector<8x768xf32>,
    %c0_26 = arith.constant 0 : index
    %c0_27 = arith.constant 0 : index
    %24 = vector.load %arg1[%c0_26, %c0_27] : memref<8x768xf32, #tpu.memory_space<vmem>>, vector<8x768xf32>
    %c749_i32 = arith.constant 749 : i32
    %25 = tpu.dynamic_rotate %24 by %c749_i32 dim 1 : vector<8x768xf32>, i32 -> vector<8x768xf32>
    %c64 = arith.constant 64 : index
    %c0_28 = arith.constant 0 : index
    %26 = vector.load %arg10[%c64, %c0_28] : memref<288x768xf32, #tpu.memory_space<vmem>>, vector<8x768xf32>
    tpu.vector_store %arg10[%c64, %c0_28], %25 {strides = array<i32>} : memref<288x768xf32, #tpu.memory_space<vmem>>, vector<8x768xf32>,
    %c0_29 = arith.constant 0 : index
    %c0_30 = arith.constant 0 : index
    %27 = vector.load %arg3[%c0_29, %c0_30] : memref<32x72xf32, #tpu.memory_space<vmem>>, vector<32x72xf32>
    %c0_31 = arith.constant 0 : index
    %c0_32 = arith.constant 0 : index
    %28 = vector.load %arg10[%c0_31, %c0_32] : memref<288x768xf32, #tpu.memory_space<vmem>>, vector<72x768xf32>
    %cst = arith.constant dense<0.000000e+00> : vector<32x768xf32>
    %29 = tpu.matmul %27, %28, %cst {dimension_numbers = #tpu.dot_dimension_numbers<[1], [0], [0], [1], [0, 0, 1, 1], [], []>} : vector<32x72xf32>, vector<72x768xf32>, vector<32x768xf32> -> vector<32x768xf32>
    %c0_33 = arith.constant 0 : index
    %c0_34 = arith.constant 0 : index
    %30 = vector.load %arg4[%c0_33, %c0_34] : memref<32x1xf32, #tpu.memory_space<vmem>>, vector<32x1xf32>
    %31 = vector.broadcast %30 : vector<32x1xf32> to vector<32x768xf32>
    %32 = arith.addf %29, %31 : vector<32x768xf32>
    %cst_35 = arith.constant 0.000000e+00 : f32
    %33 = vector.broadcast %cst_35 : f32 to vector<32x768xf32>
    %34 = arith.maximumf %32, %33 : vector<32x768xf32>
    %35 = vector.broadcast %0 : vector<1x768xf32> to vector<32x768xf32>
    %36 = arith.mulf %34, %35 : vector<32x768xf32>
    %c0_36 = arith.constant 0 : index
    %c0_37 = arith.constant 0 : index
    %37 = vector.load %arg11[%c0_36, %c0_37] : memref<32x768xf32, #tpu.memory_space<vmem>>, vector<32x768xf32>
    tpu.vector_store %arg11[%c0_36, %c0_37], %36 {strides = array<i32>} : memref<32x768xf32, #tpu.memory_space<vmem>>, vector<32x768xf32>,
    %c0_38 = arith.constant 0 : index
    %c0_39 = arith.constant 0 : index
    %38 = vector.load %arg11[%c0_38, %c0_39] : memref<32x768xf32, #tpu.memory_space<vmem>>, vector<32x768xf32>
    %c19_i32_40 = arith.constant 19 : i32
    %39 = tpu.dynamic_rotate %38 by %c19_i32_40 dim 1 : vector<32x768xf32>, i32 -> vector<32x768xf32>
    %c0_41 = arith.constant 0 : index
    %c0_42 = arith.constant 0 : index
    %40 = vector.load %arg10[%c0_41, %c0_42] : memref<288x768xf32, #tpu.memory_space<vmem>>, vector<32x768xf32>
    tpu.vector_store %arg10[%c0_41, %c0_42], %39 {strides = array<i32>} : memref<288x768xf32, #tpu.memory_space<vmem>>, vector<32x768xf32>,
    %c0_43 = arith.constant 0 : index
    %c0_44 = arith.constant 0 : index
    %41 = vector.load %arg11[%c0_43, %c0_44] : memref<32x768xf32, #tpu.memory_space<vmem>>, vector<32x768xf32>
    %c18_i32_45 = arith.constant 18 : i32
    %42 = tpu.dynamic_rotate %41 by %c18_i32_45 dim 1 : vector<32x768xf32>, i32 -> vector<32x768xf32>
    %c32_46 = arith.constant 32 : index
    %c0_47 = arith.constant 0 : index
    %43 = vector.load %arg10[%c32_46, %c0_47] : memref<288x768xf32, #tpu.memory_space<vmem>>, vector<32x768xf32>
    tpu.vector_store %arg10[%c32_46, %c0_47], %42 {strides = array<i32>} : memref<288x768xf32, #tpu.memory_space<vmem>>, vector<32x768xf32>,
    %c0_48 = arith.constant 0 : index
    %c0_49 = arith.constant 0 : index
    %44 = vector.load %arg11[%c0_48, %c0_49] : memref<32x768xf32, #tpu.memory_space<vmem>>, vector<32x768xf32>
    %c17_i32_50 = arith.constant 17 : i32
    %45 = tpu.dynamic_rotate %44 by %c17_i32_50 dim 1 : vector<32x768xf32>, i32 -> vector<32x768xf32>
    %c64_51 = arith.constant 64 : index
    %c0_52 = arith.constant 0 : index
    %46 = vector.load %arg10[%c64_51, %c0_52] : memref<288x768xf32, #tpu.memory_space<vmem>>, vector<32x768xf32>
    tpu.vector_store %arg10[%c64_51, %c0_52], %45 {strides = array<i32>} : memref<288x768xf32, #tpu.memory_space<vmem>>, vector<32x768xf32>,
    %c0_53 = arith.constant 0 : index
    %c0_54 = arith.constant 0 : index
    %47 = vector.load %arg11[%c0_53, %c0_54] : memref<32x768xf32, #tpu.memory_space<vmem>>, vector<32x768xf32>
    %c1_i32_55 = arith.constant 1 : i32
    %48 = tpu.dynamic_rotate %47 by %c1_i32_55 dim 1 : vector<32x768xf32>, i32 -> vector<32x768xf32>
    %c96 = arith.constant 96 : index
    %c0_56 = arith.constant 0 : index
    %49 = vector.load %arg10[%c96, %c0_56] : memref<288x768xf32, #tpu.memory_space<vmem>>, vector<32x768xf32>
    tpu.vector_store %arg10[%c96, %c0_56], %48 {strides = array<i32>} : memref<288x768xf32, #tpu.memory_space<vmem>>, vector<32x768xf32>,
    %c0_57 = arith.constant 0 : index
    %c0_58 = arith.constant 0 : index
    %50 = vector.load %arg11[%c0_57, %c0_58] : memref<32x768xf32, #tpu.memory_space<vmem>>, vector<32x768xf32>
    %c128 = arith.constant 128 : index
    %c0_59 = arith.constant 0 : index
    %51 = vector.load %arg10[%c128, %c0_59] : memref<288x768xf32, #tpu.memory_space<vmem>>, vector<32x768xf32>
    tpu.vector_store %arg10[%c128, %c0_59], %50 {strides = array<i32>} : memref<288x768xf32, #tpu.memory_space<vmem>>, vector<32x768xf32>,
    %c0_60 = arith.constant 0 : index
    %c0_61 = arith.constant 0 : index
    %52 = vector.load %arg11[%c0_60, %c0_61] : memref<32x768xf32, #tpu.memory_space<vmem>>, vector<32x768xf32>
    %c767_i32_62 = arith.constant 767 : i32
    %53 = tpu.dynamic_rotate %52 by %c767_i32_62 dim 1 : vector<32x768xf32>, i32 -> vector<32x768xf32>
    %c160 = arith.constant 160 : index
    %c0_63 = arith.constant 0 : index
    %54 = vector.load %arg10[%c160, %c0_63] : memref<288x768xf32, #tpu.memory_space<vmem>>, vector<32x768xf32>
    tpu.vector_store %arg10[%c160, %c0_63], %53 {strides = array<i32>} : memref<288x768xf32, #tpu.memory_space<vmem>>, vector<32x768xf32>,
    %c0_64 = arith.constant 0 : index
    %c0_65 = arith.constant 0 : index
    %55 = vector.load %arg11[%c0_64, %c0_65] : memref<32x768xf32, #tpu.memory_space<vmem>>, vector<32x768xf32>
    %c751_i32_66 = arith.constant 751 : i32
    %56 = tpu.dynamic_rotate %55 by %c751_i32_66 dim 1 : vector<32x768xf32>, i32 -> vector<32x768xf32>
    %c192 = arith.constant 192 : index
    %c0_67 = arith.constant 0 : index
    %57 = vector.load %arg10[%c192, %c0_67] : memref<288x768xf32, #tpu.memory_space<vmem>>, vector<32x768xf32>
    tpu.vector_store %arg10[%c192, %c0_67], %56 {strides = array<i32>} : memref<288x768xf32, #tpu.memory_space<vmem>>, vector<32x768xf32>,
    %c0_68 = arith.constant 0 : index
    %c0_69 = arith.constant 0 : index
    %58 = vector.load %arg11[%c0_68, %c0_69] : memref<32x768xf32, #tpu.memory_space<vmem>>, vector<32x768xf32>
    %c750_i32_70 = arith.constant 750 : i32
    %59 = tpu.dynamic_rotate %58 by %c750_i32_70 dim 1 : vector<32x768xf32>, i32 -> vector<32x768xf32>
    %c224 = arith.constant 224 : index
    %c0_71 = arith.constant 0 : index
    %60 = vector.load %arg10[%c224, %c0_71] : memref<288x768xf32, #tpu.memory_space<vmem>>, vector<32x768xf32>
    tpu.vector_store %arg10[%c224, %c0_71], %59 {strides = array<i32>} : memref<288x768xf32, #tpu.memory_space<vmem>>, vector<32x768xf32>,
    %c0_72 = arith.constant 0 : index
    %c0_73 = arith.constant 0 : index
    %61 = vector.load %arg11[%c0_72, %c0_73] : memref<32x768xf32, #tpu.memory_space<vmem>>, vector<32x768xf32>
    %c749_i32_74 = arith.constant 749 : i32
    %62 = tpu.dynamic_rotate %61 by %c749_i32_74 dim 1 : vector<32x768xf32>, i32 -> vector<32x768xf32>
    %c256 = arith.constant 256 : index
    %c0_75 = arith.constant 0 : index
    %63 = vector.load %arg10[%c256, %c0_75] : memref<288x768xf32, #tpu.memory_space<vmem>>, vector<32x768xf32>
    tpu.vector_store %arg10[%c256, %c0_75], %62 {strides = array<i32>} : memref<288x768xf32, #tpu.memory_space<vmem>>, vector<32x768xf32>,
    %c0_76 = arith.constant 0 : index
    %c0_77 = arith.constant 0 : index
    %64 = vector.load %arg5[%c0_76, %c0_77] : memref<32x288xf32, #tpu.memory_space<vmem>>, vector<32x288xf32>
    %c0_78 = arith.constant 0 : index
    %c0_79 = arith.constant 0 : index
    %65 = vector.load %arg10[%c0_78, %c0_79] : memref<288x768xf32, #tpu.memory_space<vmem>>, vector<288x768xf32>
    %cst_80 = arith.constant dense<0.000000e+00> : vector<32x768xf32>
    %66 = tpu.matmul %64, %65, %cst_80 {dimension_numbers = #tpu.dot_dimension_numbers<[1], [0], [0], [1], [0, 0, 1, 1], [], []>} : vector<32x288xf32>, vector<288x768xf32>, vector<32x768xf32> -> vector<32x768xf32>
    %c0_81 = arith.constant 0 : index
    %c0_82 = arith.constant 0 : index
    %67 = vector.load %arg6[%c0_81, %c0_82] : memref<32x1xf32, #tpu.memory_space<vmem>>, vector<32x1xf32>
    %68 = vector.broadcast %67 : vector<32x1xf32> to vector<32x768xf32>
    %69 = arith.addf %66, %68 : vector<32x768xf32>
    %cst_83 = arith.constant 0.000000e+00 : f32
    %70 = vector.broadcast %cst_83 : f32 to vector<32x768xf32>
    %71 = arith.maximumf %69, %70 : vector<32x768xf32>
    %72 = vector.broadcast %0 : vector<1x768xf32> to vector<32x768xf32>
    %73 = arith.mulf %71, %72 : vector<32x768xf32>
    %c0_84 = arith.constant 0 : index
    %c0_85 = arith.constant 0 : index
    %74 = vector.load %arg11[%c0_84, %c0_85] : memref<32x768xf32, #tpu.memory_space<vmem>>, vector<32x768xf32>
    tpu.vector_store %arg11[%c0_84, %c0_85], %73 {strides = array<i32>} : memref<32x768xf32, #tpu.memory_space<vmem>>, vector<32x768xf32>,
    %c0_86 = arith.constant 0 : index
    %c0_87 = arith.constant 0 : index
    %75 = vector.load %arg11[%c0_86, %c0_87] : memref<32x768xf32, #tpu.memory_space<vmem>>, vector<32x768xf32>
    %c19_i32_88 = arith.constant 19 : i32
    %76 = tpu.dynamic_rotate %75 by %c19_i32_88 dim 1 : vector<32x768xf32>, i32 -> vector<32x768xf32>
    %c0_89 = arith.constant 0 : index
    %c0_90 = arith.constant 0 : index
    %77 = vector.load %arg10[%c0_89, %c0_90] : memref<288x768xf32, #tpu.memory_space<vmem>>, vector<32x768xf32>
    tpu.vector_store %arg10[%c0_89, %c0_90], %76 {strides = array<i32>} : memref<288x768xf32, #tpu.memory_space<vmem>>, vector<32x768xf32>,
    %c0_91 = arith.constant 0 : index
    %c0_92 = arith.constant 0 : index
    %78 = vector.load %arg11[%c0_91, %c0_92] : memref<32x768xf32, #tpu.memory_space<vmem>>, vector<32x768xf32>
    %c18_i32_93 = arith.constant 18 : i32
    %79 = tpu.dynamic_rotate %78 by %c18_i32_93 dim 1 : vector<32x768xf32>, i32 -> vector<32x768xf32>
    %c32_94 = arith.constant 32 : index
    %c0_95 = arith.constant 0 : index
    %80 = vector.load %arg10[%c32_94, %c0_95] : memref<288x768xf32, #tpu.memory_space<vmem>>, vector<32x768xf32>
    tpu.vector_store %arg10[%c32_94, %c0_95], %79 {strides = array<i32>} : memref<288x768xf32, #tpu.memory_space<vmem>>, vector<32x768xf32>,
    %c0_96 = arith.constant 0 : index
    %c0_97 = arith.constant 0 : index
    %81 = vector.load %arg11[%c0_96, %c0_97] : memref<32x768xf32, #tpu.memory_space<vmem>>, vector<32x768xf32>
    %c17_i32_98 = arith.constant 17 : i32
    %82 = tpu.dynamic_rotate %81 by %c17_i32_98 dim 1 : vector<32x768xf32>, i32 -> vector<32x768xf32>
    %c64_99 = arith.constant 64 : index
    %c0_100 = arith.constant 0 : index
    %83 = vector.load %arg10[%c64_99, %c0_100] : memref<288x768xf32, #tpu.memory_space<vmem>>, vector<32x768xf32>
    tpu.vector_store %arg10[%c64_99, %c0_100], %82 {strides = array<i32>} : memref<288x768xf32, #tpu.memory_space<vmem>>, vector<32x768xf32>,
    %c0_101 = arith.constant 0 : index
    %c0_102 = arith.constant 0 : index
    %84 = vector.load %arg11[%c0_101, %c0_102] : memref<32x768xf32, #tpu.memory_space<vmem>>, vector<32x768xf32>
    %c1_i32_103 = arith.constant 1 : i32
    %85 = tpu.dynamic_rotate %84 by %c1_i32_103 dim 1 : vector<32x768xf32>, i32 -> vector<32x768xf32>
    %c96_104 = arith.constant 96 : index
    %c0_105 = arith.constant 0 : index
    %86 = vector.load %arg10[%c96_104, %c0_105] : memref<288x768xf32, #tpu.memory_space<vmem>>, vector<32x768xf32>
    tpu.vector_store %arg10[%c96_104, %c0_105], %85 {strides = array<i32>} : memref<288x768xf32, #tpu.memory_space<vmem>>, vector<32x768xf32>,
    %c0_106 = arith.constant 0 : index
    %c0_107 = arith.constant 0 : index
    %87 = vector.load %arg11[%c0_106, %c0_107] : memref<32x768xf32, #tpu.memory_space<vmem>>, vector<32x768xf32>
    %c128_108 = arith.constant 128 : index
    %c0_109 = arith.constant 0 : index
    %88 = vector.load %arg10[%c128_108, %c0_109] : memref<288x768xf32, #tpu.memory_space<vmem>>, vector<32x768xf32>
    tpu.vector_store %arg10[%c128_108, %c0_109], %87 {strides = array<i32>} : memref<288x768xf32, #tpu.memory_space<vmem>>, vector<32x768xf32>,
    %c0_110 = arith.constant 0 : index
    %c0_111 = arith.constant 0 : index
    %89 = vector.load %arg11[%c0_110, %c0_111] : memref<32x768xf32, #tpu.memory_space<vmem>>, vector<32x768xf32>
    %c767_i32_112 = arith.constant 767 : i32
    %90 = tpu.dynamic_rotate %89 by %c767_i32_112 dim 1 : vector<32x768xf32>, i32 -> vector<32x768xf32>
    %c160_113 = arith.constant 160 : index
    %c0_114 = arith.constant 0 : index
    %91 = vector.load %arg10[%c160_113, %c0_114] : memref<288x768xf32, #tpu.memory_space<vmem>>, vector<32x768xf32>
    tpu.vector_store %arg10[%c160_113, %c0_114], %90 {strides = array<i32>} : memref<288x768xf32, #tpu.memory_space<vmem>>, vector<32x768xf32>,
    %c0_115 = arith.constant 0 : index
    %c0_116 = arith.constant 0 : index
    %92 = vector.load %arg11[%c0_115, %c0_116] : memref<32x768xf32, #tpu.memory_space<vmem>>, vector<32x768xf32>
    %c751_i32_117 = arith.constant 751 : i32
    %93 = tpu.dynamic_rotate %92 by %c751_i32_117 dim 1 : vector<32x768xf32>, i32 -> vector<32x768xf32>
    %c192_118 = arith.constant 192 : index
    %c0_119 = arith.constant 0 : index
    %94 = vector.load %arg10[%c192_118, %c0_119] : memref<288x768xf32, #tpu.memory_space<vmem>>, vector<32x768xf32>
    tpu.vector_store %arg10[%c192_118, %c0_119], %93 {strides = array<i32>} : memref<288x768xf32, #tpu.memory_space<vmem>>, vector<32x768xf32>,
    %c0_120 = arith.constant 0 : index
    %c0_121 = arith.constant 0 : index
    %95 = vector.load %arg11[%c0_120, %c0_121] : memref<32x768xf32, #tpu.memory_space<vmem>>, vector<32x768xf32>
    %c750_i32_122 = arith.constant 750 : i32
    %96 = tpu.dynamic_rotate %95 by %c750_i32_122 dim 1 : vector<32x768xf32>, i32 -> vector<32x768xf32>
    %c224_123 = arith.constant 224 : index
    %c0_124 = arith.constant 0 : index
    %97 = vector.load %arg10[%c224_123, %c0_124] : memref<288x768xf32, #tpu.memory_space<vmem>>, vector<32x768xf32>
    tpu.vector_store %arg10[%c224_123, %c0_124], %96 {strides = array<i32>} : memref<288x768xf32, #tpu.memory_space<vmem>>, vector<32x768xf32>,
    %c0_125 = arith.constant 0 : index
    %c0_126 = arith.constant 0 : index
    %98 = vector.load %arg11[%c0_125, %c0_126] : memref<32x768xf32, #tpu.memory_space<vmem>>, vector<32x768xf32>
    %c749_i32_127 = arith.constant 749 : i32
    %99 = tpu.dynamic_rotate %98 by %c749_i32_127 dim 1 : vector<32x768xf32>, i32 -> vector<32x768xf32>
    %c256_128 = arith.constant 256 : index
    %c0_129 = arith.constant 0 : index
    %100 = vector.load %arg10[%c256_128, %c0_129] : memref<288x768xf32, #tpu.memory_space<vmem>>, vector<32x768xf32>
    tpu.vector_store %arg10[%c256_128, %c0_129], %99 {strides = array<i32>} : memref<288x768xf32, #tpu.memory_space<vmem>>, vector<32x768xf32>,
    %c0_130 = arith.constant 0 : index
    %c0_131 = arith.constant 0 : index
    %101 = vector.load %arg7[%c0_130, %c0_131] : memref<8x288xf32, #tpu.memory_space<vmem>>, vector<8x288xf32>
    %c0_132 = arith.constant 0 : index
    %c0_133 = arith.constant 0 : index
    %102 = vector.load %arg10[%c0_132, %c0_133] : memref<288x768xf32, #tpu.memory_space<vmem>>, vector<288x768xf32>
    %cst_134 = arith.constant dense<0.000000e+00> : vector<8x768xf32>
    %103 = tpu.matmul %101, %102, %cst_134 {dimension_numbers = #tpu.dot_dimension_numbers<[1], [0], [0], [1], [0, 0, 1, 1], [], []>} : vector<8x288xf32>, vector<288x768xf32>, vector<8x768xf32> -> vector<8x768xf32>
    %c0_135 = arith.constant 0 : index
    %c0_136 = arith.constant 0 : index
    %104 = vector.load %arg8[%c0_135, %c0_136] : memref<8x1xf32, #tpu.memory_space<vmem>>, vector<8x1xf32>
    %105 = vector.broadcast %104 : vector<8x1xf32> to vector<8x768xf32>
    %106 = arith.addf %103, %105 : vector<8x768xf32>
    %c0_137 = arith.constant 0 : index
    %c0_138 = arith.constant 0 : index
    %107 = vector.load %arg9[%c0_137, %c0_138] : memref<8x768xf32, #tpu.memory_space<vmem>>, vector<8x768xf32>
    tpu.vector_store %arg9[%c0_137, %c0_138], %106 {strides = array<i32>} : memref<8x768xf32, #tpu.memory_space<vmem>>, vector<8x768xf32>,
    return
  }
  func.func @transform_0(%arg0: i32) -> (i32, i32) {
    %c0_i32 = arith.constant 0 : i32
    %c0_i32_0 = arith.constant 0 : i32
    return %c0_i32, %arg0 : i32, i32
  }
  func.func @transform_1(%arg0: i32) -> (i32, i32) {
    %c0_i32 = arith.constant 0 : i32
    %c0_i32_0 = arith.constant 0 : i32
    %c0_i32_1 = arith.constant 0 : i32
    return %c0_i32, %c0_i32_0 : i32, i32
  }
  func.func @transform_2(%arg0: i32) -> (i32, i32) {
    %c0_i32 = arith.constant 0 : i32
    %c0_i32_0 = arith.constant 0 : i32
    %c0_i32_1 = arith.constant 0 : i32
    return %c0_i32, %c0_i32_0 : i32, i32
  }
  func.func @transform_3(%arg0: i32) -> (i32, i32) {
    %c0_i32 = arith.constant 0 : i32
    %c0_i32_0 = arith.constant 0 : i32
    %c0_i32_1 = arith.constant 0 : i32
    return %c0_i32, %c0_i32_0 : i32, i32
  }
  func.func @transform_4(%arg0: i32) -> (i32, i32) {
    %c0_i32 = arith.constant 0 : i32
    %c0_i32_0 = arith.constant 0 : i32
    %c0_i32_1 = arith.constant 0 : i32
    return %c0_i32, %c0_i32_0 : i32, i32
  }
  func.func @transform_5(%arg0: i32) -> (i32, i32) {
    %c0_i32 = arith.constant 0 : i32
    %c0_i32_0 = arith.constant 0 : i32
    %c0_i32_1 = arith.constant 0 : i32
    return %c0_i32, %c0_i32_0 : i32, i32
  }
  func.func @transform_6(%arg0: i32) -> (i32, i32) {
    %c0_i32 = arith.constant 0 : i32
    %c0_i32_0 = arith.constant 0 : i32
    %c0_i32_1 = arith.constant 0 : i32
    return %c0_i32, %c0_i32_0 : i32, i32
  }
  func.func @transform_7(%arg0: i32) -> (i32, i32) {
    %c0_i32 = arith.constant 0 : i32
    %c0_i32_0 = arith.constant 0 : i32
    %c0_i32_1 = arith.constant 0 : i32
    return %c0_i32, %c0_i32_0 : i32, i32
  }
  func.func @transform_8(%arg0: i32) -> (i32, i32) {
    %c0_i32 = arith.constant 0 : i32
    %c0_i32_0 = arith.constant 0 : i32
    return %c0_i32, %arg0 : i32, i32
  }
}

</mosaic_0001>

<bundles_post_ra>
// kernel: tpu_custom_call.1
= control target key start
LH: loop header
LB: loop body
LE: loop exit
PB: predicated region body
PF: predicated region fallthrough
CT: control target
= control target key end

     0   :  { %13 = vsyncpa [#allocation5], 0  ;;  %s9674_s0 = inlined_call_operand.vmem [shape: f32[8,768], index: 0, kind: input, shape index: {}]   ;;  %s9675_s1 = inlined_call_operand.hbm [shape: f32[1,768], index: 1, kind: input, shape index: {}]   ;;  %s9676_s2 = inlined_call_operand.hbm [shape: f32[32,72], index: 2, kind: input, shape index: {}]   ;;  %s9677_s3 = inlined_call_operand.vmem [shape: f32[32,1], index: 3, kind: input, shape index: {}]   ;;  %s9678_s4 = inlined_call_operand.hbm [shape: f32[32,288], index: 4, kind: input, shape index: {}]   ;;  %s9679_s5 = inlined_call_operand.vmem [shape: f32[32,1], index: 5, kind: input, shape index: {}]   ;;  %s9680_s6 = inlined_call_operand.vmem [shape: f32[8,288], index: 6, kind: input, shape index: {}]   ;;  %s9681_s7 = inlined_call_operand.vmem [shape: f32[8,1], index: 7, kind: input, shape index: {}]   ;;  %s9682_s8 = inlined_call_operand.hbm [shape: f32[8,768], index: 8, kind: output, shape index: {}]  }
   0x1   :  { %14 = vsyncpa [#allocation8], 0  ;;  %s33_s29 = sshll.u32 %s9676_s2, 4  ;;  %s34_s29 = int_to_ptr.hbm [resolvable:$true] %s33_s29 }
   0x2   :  { %15 = vsyncpa [#allocation6], 0  ;;  %s5439_s30 = smov [#allocation7]   ;;  %s23_s12 = sshll.u32 %s9675_s1, 4  ;;  %s24_s12 = int_to_ptr.hbm [resolvable:$true] %s23_s12 }
   0x3   :  { %s35_s9 = sshll.u32 %s5439_s30, 4  ;;  %s5440_s13 = smov 128   ;;  %s36_s9 = int_to_ptr.vmem [resolvable:$true] %s35_s9 }
   0x4   :  { %s5441_s14 = smov 8   ;;  %s5442_s15 = smov [#allocation4]  }
   0x5   :  { %41 = dma.hbm_to_vmem [thread:$0]  %s34_s29, 512, %s36_s9, [#allocation8], %s5440_s13, %s5440_s13, %s5441_s14  }
   0x6   :  { %s25_s16 = sshll.u32 %s5442_s15, 4  ;;  %s48_s19 = sshll.u32 %s9678_s4, 4  ;;  %s26_s16 = int_to_ptr.vmem [resolvable:$true] %s25_s16  ;;  %s49_s19 = int_to_ptr.hbm [resolvable:$true] %s48_s19 }
   0x7   :  { %28 = dma.hbm_to_vmem [thread:$0]  %s24_s12, 96, %s26_s16, [#allocation5]  }
   0x8   :  { %s5443_s2 = smov [#allocation9]   ;;  %s5444_s21 = smov 384  }
   0x9   :  { %s50_s20 = sshll.u32 %s5443_s2, 4  ;;  %s5445_s22 = smov 24   ;;  %s51_s20 = int_to_ptr.vmem [resolvable:$true] %s50_s20 }
   0xa   :  { %56 = dma.hbm_to_vmem [thread:$0]  %s49_s19, 1536, %s51_s20, [#allocation8], %s5444_s21, %s5444_s21, %s5445_s22  }
   0xb   :  { %5433 = dma.done.wait [#allocation5], 96  }
   0xc   :  { %5434 = vsyncadd [#allocation5], 4294967200 }
   0xd   :  { %5435 = dma.done.wait [#allocation8], 2048  }
   0xe   :  { %5436 = vsyncadd [#allocation8], 4294965248  ;;  %v5513_v0 = vld [vmem:[%s9674_s0 + $0x20] sm:$0xff]  ;;  %v5518_v1 = vld [vmem:[%s9674_s0 + $0x28] sm:$0xff]  ;;  %s5446_s11 = smov 19   ;;  %s5447_s12 = smov 18   ;;  %v94_v29 = vlaneseq }
   0xf   :  { %v5523_v2 = vld [vmem:[%s9674_s0] sm:$0xff]  ;;  %v4260_v3 = vpack.i.bf16 %v5518_v1, %v5513_v0  ;;  %v5530_v4 = vld [vmem:[%s9674_s0 + $0x8] sm:$0xff]  ;;  %v5535_v5 = vld [vmem:[%s9674_s0 + $0x10] sm:$0xff]  ;;  %s5449_s13 = smov 1   ;;  %s5450_s14 = smov 127   ;;  %vm420_vm8 = vcmask 588800  }
  0x10   :  { %v5540_v6 = vld [vmem:[%s9674_s0 + $0x18] sm:$0xff]  ;;  %v4250_v7 = vpack.i.bf16 %v5530_v4, %v5523_v2  ;;  %s5448_s0 = smov 17   ;;  %s5451_s15 = smov 111   ;;  %v5610_v32 = vand.u32 127, %v94_v29  ;;  %vm1952_vm9 = vcmask 261120  }
  0x11   :  { %v4255_v8 = vpack.i.bf16 %v5540_v6, %v5535_v5  ;;  %4261 = vrot.lane.b32.xlu1 %v4260_v3, %s5446_s11  ;;  %s5452_s16 = smov 110   ;;  %s5453_s17 = smov 109  }
  0x12   :  { %4251 = vrot.lane.b32.xlu0 %v4250_v7, %s5446_s11  ;;  %vm232_vm0 = vcmp.lt.s32.totalorder %v5610_v32, 127  ;;  %vm263_vm1 = vcmp.lt.s32.totalorder %v5610_v32, 111  ;;  %vm325_vm2 = vcmp.lt.s32.totalorder %v5610_v32, 109  ;;  %vm294_vm3 = vcmp.lt.s32.totalorder %v5610_v32, 110 }
  0x13   :  { %4271 = vrot.lane.b32.xlu2 %v4255_v8, %s5447_s12  ;;  %vm189_vm4 = vcmp.lt.s32.totalorder %v5610_v32, 1  ;;  %vm158_vm5 = vcmp.lt.s32.totalorder %v5610_v32, 17  ;;  %vm127_vm6 = vcmp.lt.s32.totalorder %v5610_v32, 18  ;;  %vm96_vm7 = vcmp.lt.s32.totalorder %v5610_v32, 19 }
  0x19   :  { %4266 = vrot.lane.b32.xlu1 %v4250_v7, %s5447_s12 }
  0x1a   :  { %4256 = vrot.lane.b32.xlu0 %v4255_v8, %s5446_s11 }
  0x1b   :  { %4276 = vrot.lane.b32.xlu2 %v4260_v3, %s5447_s12 }
  0x21   :  { %4286 = vrot.lane.b32.xlu1 %v4255_v8, %s5448_s0 }
  0x22   :  { %4281 = vrot.lane.b32.xlu0 %v4250_v7, %s5448_s0 }
  0x23   :  { %4291 = vrot.lane.b32.xlu2 %v4260_v3, %s5448_s0 }
  0x29   :  { %4301 = vrot.lane.b32.xlu1 %v4255_v8, %s5449_s13 }
  0x2a   :  { %4296 = vrot.lane.b32.xlu0 %v4250_v7, %s5449_s13 }
  0x2b   :  { %4306 = vrot.lane.b32.xlu2 %v4260_v3, %s5449_s13 }
  0x31   :  { %4316 = vrot.lane.b32.xlu1 %v4255_v8, %s5450_s14 }
  0x32   :  { %4311 = vrot.lane.b32.xlu0 %v4250_v7, %s5450_s14 }
  0x33   :  { %4321 = vrot.lane.b32.xlu2 %v4260_v3, %s5450_s14 }
  0x39   :  { %4331 = vrot.lane.b32.xlu1 %v4255_v8, %s5451_s15 }
  0x3a   :  { %4326 = vrot.lane.b32.xlu0 %v4250_v7, %s5451_s15 }
  0x3b   :  { %4336 = vrot.lane.b32.xlu2 %v4260_v3, %s5451_s15 }
  0x41   :  { %4346 = vrot.lane.b32.xlu1 %v4255_v8, %s5452_s16 }
  0x42   :  { %4341 = vrot.lane.b32.xlu0 %v4250_v7, %s5452_s16 }
  0x43   :  { %4351 = vrot.lane.b32.xlu2 %v4260_v3, %s5452_s16 }
  0x49   :  { %4361 = vrot.lane.b32.xlu1 %v4255_v8, %s5453_s17 }
  0x4a   :  { %4356 = vrot.lane.b32.xlu0 %v4250_v7, %s5453_s17 }
  0x4b   :  { %4366 = vrot.lane.b32.xlu2 %v4260_v3, %s5453_s17 }
  0x6d   :  { %v5570_v9 = vpop.permute.xlu2 %4271 }
  0x6e   :  { %v4274_v8 = vunpack.i.h.bf16 %v5570_v9 }
  0x75   :  { %v5572_v10 = vpop.permute.xlu2 %4276 }
  0x7d   :  { %v5578_v13 = vpop.permute.xlu2 %4291 }
  0x83   :  { %v5574_v11 = vpop.permute.xlu1 %4261 }
  0x84   :  { %v5576_v12 = vpop.permute.xlu0 %4251 }
  0x85   :  { %v5584_v16 = vpop.permute.xlu2 %4306 }
  0x8b   :  { %v5580_v14 = vpop.permute.xlu1 %4266 }
  0x8c   :  { %v5582_v15 = vpop.permute.xlu0 %4256 }
  0x8d   :  { %v5590_v19 = vpop.permute.xlu2 %4321 }
  0x8e   :  { %v4323_v33 = vunpack.i.l.bf16 %v5590_v19 }
  0x93   :  { %v5586_v17 = vpop.permute.xlu1 %4286 }
  0x94   :  { %v5588_v18 = vpop.permute.xlu0 %4281 }
  0x95   :  { %v5598_v23 = vpop.permute.xlu2 %4336 }
  0x96   :  { %v4338_v34 = vunpack.i.l.bf16 %v5598_v23 }
  0x9b   :  { %v5592_v20 = vpop.permute.xlu1 %4301 }
  0x9c   :  { %v5594_v21 = vpop.permute.xlu0 %4296 }
  0x9d   :  { %v5604_v27 = vpop.permute.xlu2 %4351  ;;  %v4299_v29 = vunpack.i.h.bf16 %v5594_v21 }
  0x9e   :  { %v4353_v36 = vunpack.i.l.bf16 %v5604_v27 }
  0xa3   :  { %v5596_v22 = vpop.permute.xlu1 %4316 }
  0xa4   :  { %v5600_v24 = vpop.permute.xlu0 %4311  ;;  %v4319_v56 = vunpack.i.h.bf16 %v5596_v22  ;;  %v4318_v57 = vunpack.i.l.bf16 %v5596_v22  ;;  %v4304_v22 = vunpack.i.h.bf16 %v5592_v20 }
  0xa5   :  { %v5608_v31 = vpop.permute.xlu2 %4366  ;;  %v4314_v60 = vunpack.i.h.bf16 %v5600_v24  ;;  %v4313_v61 = vunpack.i.l.bf16 %v5600_v24 }
  0xa6   :  { %v4368_v35 = vunpack.i.l.bf16 %v5608_v31 }
  0xab   :  { %v4332_v25 = vpop.permute.xlu1 %4331 }
  0xac   :  { %v5602_v26 = vpop.permute.xlu0 %4326  ;;  %v4334_v48 = vunpack.i.h.bf16 %v4332_v25  ;;  %v4333_v49 = vunpack.i.l.bf16 %v4332_v25 }
  0xad   :  { %v4328_v44 = vunpack.i.l.bf16 %v5602_v26  ;;  %v4329_v52 = vunpack.i.h.bf16 %v5602_v26  ;;  %v4308_v26 = vunpack.i.l.bf16 %v5584_v16 }
  0xae   :  { %v266_v3 = vsel %vm263_vm1, %v4333_v49, %v4334_v48  ;;  %v265_v7 = vsel %vm263_vm1, %v4334_v48, %v4338_v34  ;;  %v4289_v48 = vunpack.i.h.bf16 %v5586_v17 }
  0xaf   :  { %v268_v63 = vsel %vm263_vm1, %v4328_v44, %v4329_v52  ;;  %v267_v25 = vsel %vm263_vm1, %v4329_v52, %v4333_v49  ;;  %v4288_v49 = vunpack.i.l.bf16 %v5586_v17  ;;  %v4279_v52 = vunpack.i.h.bf16 %v5572_v10  ;;  %v341_v17 = vld [vmem:[#allocation7 + $0x18] sm:$0xff] }
  0xb3   :  { %v4347_v28 = vpop.permute.xlu1 %4346 }
  0xb4   :  { %v5606_v30 = vpop.permute.xlu0 %4341  ;;  %v4349_v39 = vunpack.i.h.bf16 %v4347_v28  ;;  %v4348_v40 = vunpack.i.l.bf16 %v4347_v28  ;;  %v4303_v28 = vunpack.i.l.bf16 %v5592_v20  ;;  %v4263_v20 = vunpack.i.l.bf16 %v5574_v11 }
  0xb5   :  { %v4343_v37 = vunpack.i.l.bf16 %v5606_v30  ;;  %v4344_v45 = vunpack.i.h.bf16 %v5606_v30 }
  0xb6   :  { %v297_v58 = vsel %vm294_vm3, %v4348_v40, %v4349_v39  ;;  %v296_v59 = vsel %vm294_vm3, %v4349_v39, %v4353_v36  ;;  %v234_v39 = vsel %vm232_vm0, %v4319_v56, %v4323_v33 }
  0xb7   :  { %v299_v55 = vsel %vm294_vm3, %v4343_v37, %v4344_v45  ;;  %v298_v62 = vsel %vm294_vm3, %v4344_v45, %v4348_v40  ;;  %v4309_v40 = vunpack.i.h.bf16 %v5584_v16  ;;  %v236_v45 = vsel %vm232_vm0, %v4314_v60, %v4318_v57 }
  0xb9   :  { %v190_v24 = vsel %vm189_vm4, %v4308_v26, %v4309_v40 }
  0xbb   :  { %v4362_v38 = vpop.permute.xlu1 %4361 }
  0xbc   :  { %v4364_v41 = vunpack.i.h.bf16 %v4362_v38  ;;  %v4363_v42 = vunpack.i.l.bf16 %v4362_v38  ;;  %v5621_v43 = vpop.permute.xlu0 %4356  ;;  %v235_v38 = vsel %vm232_vm0, %v4318_v57, %v4319_v56 }
  0xbd   :  { %v4359_v46 = vunpack.i.h.bf16 %v5621_v43  ;;  %v4358_v47 = vunpack.i.l.bf16 %v5621_v43  ;;  %v396_v43 = vld [vmem:[%s9677_s3] sm:$0xff] }
  0xbe   :  { %v328_v50 = vsel %vm325_vm2, %v4363_v42, %v4364_v41  ;;  %v327_v51 = vsel %vm325_vm2, %v4364_v41, %v4368_v35  ;;  %v4298_v41 = vunpack.i.l.bf16 %v5594_v21  ;;  %v4294_v21 = vunpack.i.h.bf16 %v5578_v13 }
  0xbf   :  { %v330_v53 = vsel %vm325_vm2, %v4358_v47, %v4359_v46  ;;  %v329_v54 = vsel %vm325_vm2, %v4359_v46, %v4363_v42  ;;  %498 = vmatpush.msra.mxu2 %v328_v50  ;;  %527 = vmatpush.msra.mxu3 %v327_v51  ;;  %v237_v42 = vsel %vm232_vm0, %v4313_v61, %v4314_v60  ;;  %v4273_v46 = vunpack.i.l.bf16 %v5570_v9 }
  0xc0   :  { %440 = vmatpush.msra.mxu0 %v330_v53  ;;  %469 = vmatpush.msra.mxu1 %v329_v54  ;;  %v4284_v50 = vunpack.i.h.bf16 %v5588_v18  ;;  %v4283_v51 = vunpack.i.l.bf16 %v5588_v18  ;;  %v4269_v53 = vunpack.i.h.bf16 %v5580_v14  ;;  %v193_v54 = vsel %vm189_vm4, %v4299_v29, %v4303_v28 }
  0xc1   :  { %499 = vmatpush.msra.mxu2 %v297_v58  ;;  %528 = vmatpush.msra.mxu3 %v296_v59  ;;  %v4268_v18 = vunpack.i.l.bf16 %v5580_v14  ;;  %v161_v14 = vsel %vm158_vm5, %v4288_v49, %v4289_v48  ;;  %v130_v57 = vsel %vm127_vm6, %v4273_v46, %v4274_v8  ;;  %v4264_v58 = vunpack.i.h.bf16 %v5574_v11 }
  0xc2   :  { %441 = vmatpush.msra.mxu0 %v299_v55  ;;  %470 = vmatpush.msra.mxu1 %v298_v62  ;;  %v195_v55 = vsel %vm189_vm4, %v4309_v40, %v4298_v41  ;;  %v162_v56 = vsel %vm158_vm5, %v4284_v50, %v4288_v49  ;;  %v4253_v59 = vunpack.i.l.bf16 %v5576_v12  ;;  %v164_v60 = vsel %vm158_vm5, %v4294_v21, %v4283_v51 }
  0xc3   :  { %500 = vmatpush.msra.mxu2 %v266_v3  ;;  %529 = vmatpush.msra.mxu3 %v265_v7  ;;  %v163_v62 = vsel %vm158_vm5, %v4283_v51, %v4284_v50  ;;  %v4369_v3 = vunpack.i.h.bf16 %v5608_v31  ;;  %v131_v7 = vsel %vm127_vm6, %v4269_v53, %v4273_v46  ;;  %v4339_v49 = vunpack.i.h.bf16 %v5598_v23  ;;  %v339_v23 = vld [vmem:[#allocation7 + $0x8] sm:$0xff] }
  0xc4   :  { %442 = vmatpush.msra.mxu0 %v268_v63  ;;  %471 = vmatpush.msra.mxu1 %v267_v25  ;;  %v4259_v63 = vunpack.i.h.bf16 %v5582_v15  ;;  %v132_v25 = vsel %vm127_vm6, %v4268_v18, %v4269_v53  ;;  %v5454_v50 = vmov 0   ;;  %v97_v9 = vsel %vm96_vm7, %v4263_v20, %v4264_v58 }
  0xc5   :  { %501 = vmatpush.msra.mxu2 %v235_v38  ;;  %530 = vmatpush.msra.mxu3 %v234_v39  ;;  %v5751_v38 = vld [vmem:[#allocation7] sm:$0xff]  ;;  %v102_v39 = vsel %vm96_vm7, %v4264_v58, %v4253_v59  ;;  %v331_v46 = vsel %vm325_vm2, %v4369_v3, %v4358_v47  ;;  %v4324_v47 = vunpack.i.h.bf16 %v5590_v19  ;;  %v269_v51 = vsel %vm263_vm1, %v4339_v49, %v4328_v44 }
  0xc6   :  { %443 = vmatpush.msra.mxu0 %v237_v42  ;;  %472 = vmatpush.msra.mxu1 %v236_v45  ;;  %v4354_v42 = vunpack.i.h.bf16 %v5604_v27  ;;  %v326_v45 = vsel %vm325_vm2, %v4368_v35, %v4369_v3  ;;  %v397_v35 = vld [vmem:[%s9677_s3 + $0x8] sm:$0xff]  ;;  %v4293_v19 = vunpack.i.l.bf16 %v5578_v13  ;;  %v191_v44 = vsel %vm189_vm4, %v4304_v22, %v4308_v26  ;;  %v340_v13 = vld [vmem:[#allocation7 + $0x10] sm:$0xff] }
  0xc7   :  { %502 = vmatpush.msra.mxu2 %v5535_v5  ;;  %531 = vmatpush.msra.mxu3 %v5540_v6  ;;  %v192_v5 = vsel %vm189_vm4, %v4303_v28, %v4304_v22  ;;  %v4254_v6 = vunpack.i.h.bf16 %v5576_v12  ;;  %v133_v12 = vsel %vm127_vm6, %v4279_v52, %v4268_v18  ;;  %v233_v30 = vsel %vm232_vm0, %v4323_v33, %v4324_v47  ;;  %v399_v33 = vld [vmem:[%s9677_s3 + $0x18] sm:$0xff] }
  0xc8   :  { %444 = vmatpush.msra.mxu0 %v5523_v2  ;;  %473 = vmatpush.msra.mxu1 %v5530_v4  ;;  %v194_v2 = vsel %vm189_vm4, %v4298_v41, %v4299_v29  ;;  %v4258_v4 = vunpack.i.l.bf16 %v5582_v15  ;;  %v295_v31 = vsel %vm294_vm3, %v4353_v36, %v4354_v42  ;;  %v300_v27 = vsel %vm294_vm3, %v4354_v42, %v4343_v37 }
  0xc9   :  { %503 = vmatpush.msra.mxu2 %v193_v54  ;;  %532 = vmatpush.msra.mxu3 %v192_v5  ;;  %v101_v41 = vsel %vm96_vm7, %v4253_v59, %v4254_v6  ;;  %v264_v36 = vsel %vm263_vm1, %v4338_v34, %v4339_v49  ;;  %v238_v34 = vsel %vm232_vm0, %v4324_v47, %v4313_v61  ;;  %v4278_v37 = vunpack.i.l.bf16 %v5572_v10 }
  0xca   :  { %445 = vmatpush.msra.mxu0 %v195_v55  ;;  %474 = vmatpush.msra.mxu1 %v194_v2  ;;  %v100_v28 = vsel %vm96_vm7, %v4254_v6, %v4258_v4  ;;  %v99_v29 = vsel %vm96_vm7, %v4258_v4, %v4259_v63  ;;  %v159_v16 = vsel %vm158_vm5, %v4293_v19, %v4294_v21  ;;  %v5878_v21 = vld [vmem:[#allocation4] sm:$0x3f] }
  0xcb   :  { %504 = vmatpush.msra.mxu2 %v162_v56  ;;  %533 = vmatpush.msra.mxu3 %v161_v14  ;;  %v129_v61 = vsel %vm127_vm6, %v4274_v8, %v4278_v37  ;;  %v98_v10 = vsel %vm96_vm7, %v4259_v63, %v4263_v20  ;;  %v398_v8 = vld [vmem:[%s9677_s3 + $0x10] sm:$0xff]  ;;  %v5883_v6 = vperm.slane %v5878_v21, 0  ;;  %v5886_v18 = vperm.slane %v5878_v21, 1 }
  0xcc   :  { %446 = vmatpush.msra.mxu0 %v164_v60  ;;  %475 = vmatpush.msra.mxu1 %v163_v62 }
  0xcd   :  { %505 = vmatpush.msra.mxu2 %v131_v7  ;;  %534 = vmatpush.msra.mxu3 %v130_v57  ;;  %9960 = vst [vmem:[#allocation14_spill] sm:$0xff] %v5883_v6 }
  0xce   :  { %447 = vmatpush.msra.mxu0 %v133_v12  ;;  %476 = vmatpush.msra.mxu1 %v132_v25  ;;  %9961 = vst [vmem:[#allocation15_spill] sm:$0xff] %v5886_v18 }
  0xcf   :  { %506 = vmatpush.msra.mxu2 %v100_v28  ;;  %535 = vmatpush.msra.mxu3 %v99_v29  ;;  %v5912_v28 = vperm.slane %v5878_v21, 2 }
  0xd0   :  { %448 = vmatpush.msra.mxu0 %v102_v39  ;;  %477 = vmatpush.msra.mxu1 %v101_v41 }
  0xd1   :  { %4179 = vmatmul.msk.f32.vlgmr.msra.gmra.mxu0 %vm420_vm8, %v5751_v38  ;;  %4183 = vmatmul.msk.f32.vlgmr.msra.gmra.mxu1 %vm420_vm8, %v5751_v38  ;;  %9962 = vst [vmem:[#allocation16_spill] sm:$0xff] %v5912_v28 }
  0xd2   :  { %4187 = vmatmul.msk.f32.vlgmr.msra.gmra.mxu2 %vm420_vm8, %v5751_v38  ;;  %4191 = vmatmul.msk.f32.vlgmr.msra.gmra.mxu3 %vm420_vm8, %v5751_v38 }
  0xd3   :  { %556 = vmatpush.msrb.mxu0 %v326_v45  ;;  %585 = vmatpush.msrb.mxu1 %v331_v46 }
  0xd4   :  { %4371 = vset.pattern.permute.xlu1 %v5454_v50  ;;  %4370 = vset.pattern.permute.xlu0 %v5454_v50 }
  0xd5   :  { %557 = vmatpush.msrb.mxu0 %v295_v31  ;;  %586 = vmatpush.msrb.mxu1 %v300_v27 }
  0xd6   :  { %407 = vperm.xlu1 %4371, %v397_v35   ;;  %402 = vperm.xlu0 %4370, %v396_v43  }
  0xd7   :  { %558 = vmatpush.msrb.mxu0 %v264_v36  ;;  %587 = vmatpush.msrb.mxu1 %v269_v51 }
  0xd8   :  { %4372 = vset.pattern.permute.xlu2 %v5454_v50 }
  0xd9   :  { %559 = vmatpush.msrb.mxu0 %v233_v30  ;;  %588 = vmatpush.msrb.mxu1 %v238_v34 }
  0xda   :  { %4180 = vmatmul.msk.f32.gmra.mxu0 %vm420_vm8, %v339_v23  ;;  %4184 = vmatmul.msk.f32.gmra.mxu1 %vm420_vm8, %v339_v23 }
  0xdb   :  { %4188 = vmatmul.msk.f32.gmra.mxu2 %vm420_vm8, %v339_v23  ;;  %4192 = vmatmul.msk.f32.gmra.mxu3 %vm420_vm8, %v339_v23 }
  0xdc   :  { %560 = vmatpush.msrb.mxu0 %v5513_v0  ;;  %589 = vmatpush.msrb.mxu1 %v5518_v1  ;;  %v160_v0 = vsel %vm158_vm5, %v4289_v48, %v4293_v19  ;;  %v128_v1 = vsel %vm127_vm6, %v4278_v37, %v4279_v52  ;;  %v5976_v37 = vperm.slane %v5878_v21, 3 }
  0xdd   :  { %412 = vperm.xlu2 %4372, %v398_v8  }
  0xde   :  { %561 = vmatpush.msrb.mxu0 %v191_v44  ;;  %590 = vmatpush.msrb.mxu1 %v190_v24  ;;  %9967 = vst [vmem:[#allocation21_spill] sm:$0xff] %v5976_v37 }
  0xdf   :  { %417 = vperm.xlu1 %4371, %v399_v33  }
  0xe0   :  { %562 = vmatpush.msrb.mxu0 %v160_v0  ;;  %591 = vmatpush.msrb.mxu1 %v159_v16 }
  0xe2   :  { %563 = vmatpush.msrb.mxu0 %v129_v61  ;;  %592 = vmatpush.msrb.mxu1 %v128_v1 }
  0xe3   :  { %4181 = vmatmul.msk.f32.gmra.mxu0 %vm420_vm8, %v340_v13  ;;  %4185 = vmatmul.msk.f32.gmra.mxu1 %vm420_vm8, %v340_v13 }
  0xe4   :  { %4189 = vmatmul.msk.f32.gmra.mxu2 %vm420_vm8, %v340_v13  ;;  %4193 = vmatmul.msk.f32.gmra.mxu3 %vm420_vm8, %v340_v13 }
  0xe5   :  { %564 = vmatpush.msrb.mxu0 %v98_v10  ;;  %593 = vmatpush.msrb.mxu1 %v97_v9 }
  0xeb   :  { %4182 = vmatmul.msk.f32.gmra.mxu0 %vm420_vm8, %v341_v17  ;;  %4186 = vmatmul.msk.f32.gmra.mxu1 %vm420_vm8, %v341_v17 }
  0xec   :  { %4190 = vmatmul.msk.f32.gmra.mxu2 %vm420_vm8, %v341_v17  ;;  %4194 = vmatmul.msk.f32.gmra.mxu3 %vm420_vm8, %v341_v17 }
  0xf3   :  { %4195 = vmatmul.msk.f32.vlgmr.msrb.gmra.mxu0 %vm420_vm8, %v5751_v38  ;;  %4199 = vmatmul.msk.f32.vlgmr.msrb.gmra.mxu1 %vm420_vm8, %v5751_v38 }
  0xfb   :  { %4196 = vmatmul.msk.f32.gmra.mxu0 %vm420_vm8, %v339_v23  ;;  %4200 = vmatmul.msk.f32.gmra.mxu1 %vm420_vm8, %v339_v23 }
 0x103   :  { %4197 = vmatmul.msk.f32.gmra.mxu0 %vm420_vm8, %v340_v13  ;;  %4201 = vmatmul.msk.f32.gmra.mxu1 %vm420_vm8, %v340_v13 }
 0x10b   :  { %4198 = vmatmul.msk.f32.gmra.mxu0 %vm420_vm8, %v341_v17  ;;  %4202 = vmatmul.msk.f32.gmra.mxu1 %vm420_vm8, %v341_v17 }
 0x137   :  { %v5955_v43 = vpop.permute.xlu2 %412 }
 0x148   :  { %v5874_v22 = vpop.permute.xlu0 %402  ;;  %v5880_v53 = vpop.permute.xlu1 %407 }
 0x14e   :  { %v450_v11 = vpop.f32.mrf.mxu0  ;;  %v479_v15 = vpop.f32.mrf.mxu1 }
 0x14f   :  { %v451_v40 = vadd.f32 %v450_v11, %v5874_v22  ;;  %v480_v48 = vadd.f32 %v479_v15, %v5874_v22 }
 0x151   :  { %v607_v54 = vmax.f32 %v451_v40, 0.0  ;;  %v608_v5 = vmax.f32 %v480_v48, 0.0  ;;  %v5953_v35 = vpop.permute.xlu1 %417 }
 0x153   :  { %v5891_v14 = vmul.f32 %v5883_v6, %v607_v54  ;;  %v5894_v57 = vmul.f32 %v5886_v18, %v608_v5 }
 0x155   :  { %v508_v52 = vpop.f32.mrf.mxu2  ;;  %v537_v49 = vpop.f32.mrf.mxu3 }
 0x156   :  { %v509_v60 = vadd.f32 %v508_v52, %v5874_v22  ;;  %v538_v26 = vadd.f32 %v537_v49, %v5874_v22 }
 0x157   :  { %v453_v55 = vpop.f32.mrf.mxu0  ;;  %v482_v2 = vpop.f32.mrf.mxu1 }
 0x158   :  { %v454_v4 = vadd.f32 %v453_v55, %v5880_v53  ;;  %v483_v56 = vadd.f32 %v482_v2, %v5880_v53  ;;  %v609_v25 = vmax.f32 %v509_v60, 0.0  ;;  %v610_v0 = vmax.f32 %v538_v26, 0.0 }
 0x15a   :  { %v613_v58 = vmax.f32 %v454_v4, 0.0  ;;  %v614_v59 = vmax.f32 %v483_v56, 0.0  ;;  %v5920_v39 = vmul.f32 %v5912_v28, %v609_v25  ;;  %v5995_v10 = vmul.f32 %v5976_v37, %v610_v0 }
 0x15b   :  { %v6037_v56 = vperm.slane %v5878_v21, 4 }
 0x15c   :  { %v5898_v62 = vmul.f32 %v5883_v6, %v613_v58  ;;  %v5901_v63 = vmul.f32 %v5886_v18, %v614_v59  ;;  %9963 = vst [vmem:[#allocation17_spill] sm:$0xff] %v5920_v39 }
 0x15d   :  { %9968 = vst [vmem:[#allocation22_spill] sm:$0xff] %v5995_v10 }
 0x15e   :  { %v511_v3 = vpop.f32.mrf.mxu2  ;;  %v5905_v7 = vpack.i.bf16 %v5901_v63, %v5894_v57  ;;  %v5909_v12 = vpack.i.bf16 %v5898_v62, %v5891_v14  ;;  %v540_v30 = vpop.f32.mrf.mxu3  ;;  %9970 = vst [vmem:[#allocation24_spill] sm:$0xff] %v6037_v56 }
 0x15f   :  { %v512_v29 = vadd.f32 %v511_v3, %v5880_v53  ;;  %v541_v19 = vadd.f32 %v540_v30, %v5880_v53 }
 0x160   :  { %4379 = vrot.lane.b32.xlu1 %v5905_v7, %s5446_s11  ;;  %4374 = vrot.lane.b32.xlu2 %v5909_v12, %s5446_s11  ;;  %v456_v46 = vpop.f32.mrf.mxu0  ;;  %v485_v40 = vpop.f32.mrf.mxu1 }
 0x161   :  { %v615_v38 = vmax.f32 %v512_v29, 0.0  ;;  %v457_v23 = vadd.f32 %v456_v46, %v5955_v43  ;;  %v616_v1 = vmax.f32 %v541_v19, 0.0  ;;  %v486_v60 = vadd.f32 %v485_v40, %v5955_v43 }
 0x163   :  { %v5923_v41 = vmul.f32 %v5912_v28, %v615_v38  ;;  %v619_v44 = vmax.f32 %v457_v23, 0.0  ;;  %v5998_v9 = vmul.f32 %v5976_v37, %v616_v1  ;;  %v620_v49 = vmax.f32 %v486_v60, 0.0 }
 0x165   :  { %9964 = vst [vmem:[#allocation18_spill] sm:$0xff] %v5923_v41  ;;  %v5927_v42 = vpack.i.bf16 %v5923_v41, %v5920_v39  ;;  %v5989_v13 = vmul.f32 %v5883_v6, %v619_v44  ;;  %v6006_v8 = vpack.i.bf16 %v5998_v9, %v5995_v10 }
 0x166   :  { %9969 = vst [vmem:[#allocation23_spill] sm:$0xff] %v5998_v9 }
 0x167   :  { %4439 = vrot.lane.b32.xlu0 %v5927_v42, %s5446_s11  ;;  %v514_v45 = vpop.f32.mrf.mxu2  ;;  %v543_v15 = vpop.f32.mrf.mxu3 }
 0x168   :  { %4389 = vrot.lane.b32.xlu1 %v5905_v7, %s5447_s12  ;;  %4384 = vrot.lane.b32.xlu2 %v5909_v12, %s5447_s12  ;;  %v515_v47 = vadd.f32 %v514_v45, %v5955_v43  ;;  %v459_v50 = vpop.f32.mrf.mxu0  ;;  %v488_v2 = vpop.f32.mrf.mxu1  ;;  %v544_v58 = vadd.f32 %v543_v15, %v5955_v43 }
 0x169   :  { %v460_v34 = vadd.f32 %v459_v50, %v5953_v35  ;;  %v489_v3 = vadd.f32 %v488_v2, %v5953_v35 }
 0x16a   :  { %v621_v36 = vmax.f32 %v515_v47, 0.0  ;;  %v622_v45 = vmax.f32 %v544_v58, 0.0 }
 0x16b   :  { %v625_v16 = vmax.f32 %v460_v34, 0.0 }
 0x16c   :  { %v5970_v24 = vmul.f32 %v5912_v28, %v621_v36 }
 0x16d   :  { %v5992_v61 = vmul.f32 %v5883_v6, %v625_v16 }
 0x16e   :  { %9965 = vst [vmem:[#allocation19_spill] sm:$0xff] %v5970_v24 }
 0x16f   :  { %4449 = vrot.lane.b32.xlu0 %v5927_v42, %s5447_s12  ;;  %v517_v31 = vpop.f32.mrf.mxu2  ;;  %v6002_v17 = vpack.i.bf16 %v5992_v61, %v5989_v13  ;;  %v546_v5 = vpop.f32.mrf.mxu3 }
 0x170   :  { %4399 = vrot.lane.b32.xlu1 %v5905_v7, %s5448_s0  ;;  %4394 = vrot.lane.b32.xlu2 %v5909_v12, %s5448_s0  ;;  %v518_v27 = vadd.f32 %v517_v31, %v5953_v35  ;;  %v566_v11 = vpop.f32.mrf.mxu0  ;;  %v547_v59 = vadd.f32 %v546_v5, %v5953_v35  ;;  %v626_v31 = vmax.f32 %v489_v3, 0.0  ;;  %v595_v50 = vpop.f32.mrf.mxu1  ;;  %v6134_v3 = vperm.slane %v5878_v21, 5 }
 0x171   :  { %v567_v54 = vadd.f32 %v566_v11, %v5874_v22 }
 0x172   :  { %v627_v51 = vmax.f32 %v518_v27, 0.0  ;;  %v628_v46 = vmax.f32 %v547_v59, 0.0  ;;  %v6066_v27 = vmul.f32 %v5976_v37, %v622_v45  ;;  %v6075_v30 = vmul.f32 %v5886_v18, %v626_v31  ;;  %9981 = vst [vmem:[#allocation35_spill] sm:$0xff] %v6134_v3 }
 0x173   :  { %v611_v4 = vmax.f32 %v567_v54, 0.0 }
 0x174   :  { %v5973_v33 = vmul.f32 %v5912_v28, %v627_v51  ;;  %9973 = vst [vmem:[#allocation27_spill] sm:$0xff] %v6066_v27  ;;  %v6069_v36 = vmul.f32 %v5976_v37, %v628_v46  ;;  %v6072_v51 = vmul.f32 %v5886_v18, %v620_v49 }
 0x175   :  { %v6053_v38 = vmul.f32 %v6037_v56, %v611_v4 }
 0x176   :  { %9966 = vst [vmem:[#allocation20_spill] sm:$0xff] %v5973_v33  ;;  %v5980_v20 = vpack.i.bf16 %v5973_v33, %v5970_v24  ;;  %v6081_v34 = vpack.i.bf16 %v6069_v36, %v6066_v27  ;;  %v6085_v26 = vpack.i.bf16 %v6075_v30, %v6072_v51 }
 0x177   :  { %4459 = vrot.lane.b32.xlu0 %v5927_v42, %s5448_s0  ;;  %9972 = vst [vmem:[#allocation26_spill] sm:$0xff] %v6053_v38 }
 0x178   :  { %4409 = vrot.lane.b32.xlu1 %v5905_v7, %s5449_s13  ;;  %4404 = vrot.lane.b32.xlu2 %v5909_v12, %s5449_s13  ;;  %v569_v48 = vpop.f32.mrf.mxu0  ;;  %9974 = vst [vmem:[#allocation28_spill] sm:$0xff] %v6069_v36  ;;  %v598_v44 = vpop.f32.mrf.mxu1 }
 0x179   :  { %v570_v52 = vadd.f32 %v569_v48, %v5880_v53  ;;  %v599_v45 = vadd.f32 %v598_v44, %v5880_v53 }
 0x17b   :  { %v617_v55 = vmax.f32 %v570_v52, 0.0  ;;  %v618_v37 = vmax.f32 %v599_v45, 0.0 }
 0x17d   :  { %v6048_v25 = vmul.f32 %v6037_v56, %v617_v55 }
 0x17f   :  { %4469 = vrot.lane.b32.xlu0 %v5927_v42, %s5449_s13  ;;  %9971 = vst [vmem:[#allocation25_spill] sm:$0xff] %v6048_v25  ;;  %v6057_v47 = vpack.i.bf16 %v6048_v25, %v6053_v38 }
 0x180   :  { %4419 = vrot.lane.b32.xlu1 %v5905_v7, %s5450_s14  ;;  %4414 = vrot.lane.b32.xlu2 %v5909_v12, %s5450_s14  ;;  %v601_v1 = vpop.f32.mrf.mxu1  ;;  %v572_v48 = vpop.f32.mrf.mxu0 }
 0x181   :  { %v602_v5 = vadd.f32 %v601_v1, %v5955_v43  ;;  %v573_v49 = vadd.f32 %v572_v48, %v5955_v43 }
 0x183   :  { %v624_v58 = vmax.f32 %v602_v5, 0.0  ;;  %v623_v53 = vmax.f32 %v573_v49, 0.0 }
 0x185   :  { %v6145_v31 = vmul.f32 %v6134_v3, %v624_v58 }
 0x187   :  { %4479 = vrot.lane.b32.xlu0 %v5927_v42, %s5450_s14  ;;  %9983 = vst [vmem:[#allocation37_spill] sm:$0xff] %v6145_v31 }
 0x188   :  { %4429 = vrot.lane.b32.xlu1 %v5905_v7, %s5451_s15  ;;  %4424 = vrot.lane.b32.xlu2 %v5909_v12, %s5451_s15  ;;  %v604_v52 = vpop.f32.mrf.mxu1  ;;  %v575_v60 = vpop.f32.mrf.mxu0 }
 0x189   :  { %v605_v55 = vadd.f32 %v604_v52, %v5953_v35  ;;  %v576_v1 = vadd.f32 %v575_v60, %v5953_v35  ;;  %v6167_v35 = vmul.f32 %v6134_v3, %v618_v37 }
 0x18b   :  { %v630_v59 = vmax.f32 %v605_v55, 0.0  ;;  %v596_v55 = vadd.f32 %v595_v50, %v5874_v22  ;;  %v629_v44 = vmax.f32 %v576_v1, 0.0  ;;  %9986 = vst [vmem:[#allocation40_spill] sm:$0xff] %v6167_v35  ;;  %v6172_v50 = vmul.f32 %v6037_v56, %v623_v53 }
 0x18d   :  { %v6149_v21 = vmul.f32 %v6134_v3, %v630_v59  ;;  %v612_v48 = vmax.f32 %v596_v55, 0.0  ;;  %9988 = vst [vmem:[#allocation42_spill] sm:$0xff] %v6172_v50  ;;  %v6175_v58 = vmul.f32 %v6037_v56, %v629_v44 }
 0x18f   :  { %4489 = vrot.lane.b32.xlu0 %v5927_v42, %s5451_s15  ;;  %9984 = vst [vmem:[#allocation38_spill] sm:$0xff] %v6149_v21  ;;  %v6158_v43 = vpack.i.bf16 %v6149_v21, %v6145_v31  ;;  %v6182_v45 = vmul.f32 %v6134_v3, %v612_v48  ;;  %v6190_v37 = vpack.i.bf16 %v6175_v58, %v6172_v50 }
 0x190   :  { %4559 = vrot.lane.b32.xlu1 %v5980_v20, %s5446_s11  ;;  %4434 = vrot.lane.b32.xlu2 %v5909_v12, %s5452_s16  ;;  %9989 = vst [vmem:[#allocation43_spill] sm:$0xff] %v6175_v58 }
 0x191   :  { %9991 = vst [vmem:[#allocation45_spill] sm:$0xff] %v6182_v45  ;;  %v6186_v49 = vpack.i.bf16 %v6167_v35, %v6182_v45 }
 0x197   :  { %4499 = vrot.lane.b32.xlu0 %v6002_v17, %s5446_s11 }
 0x198   :  { %4569 = vrot.lane.b32.xlu1 %v5980_v20, %s5447_s12  ;;  %4444 = vrot.lane.b32.xlu2 %v6006_v8, %s5446_s11 }
 0x19f   :  { %4509 = vrot.lane.b32.xlu0 %v6002_v17, %s5447_s12 }
 0x1a0   :  { %4579 = vrot.lane.b32.xlu1 %v5980_v20, %s5448_s0  ;;  %4454 = vrot.lane.b32.xlu2 %v6006_v8, %s5447_s12 }
 0x1a7   :  { %4519 = vrot.lane.b32.xlu0 %v6002_v17, %s5448_s0 }
 0x1a8   :  { %4589 = vrot.lane.b32.xlu1 %v5980_v20, %s5449_s13  ;;  %4464 = vrot.lane.b32.xlu2 %v6006_v8, %s5448_s0 }
 0x1af   :  { %4529 = vrot.lane.b32.xlu0 %v6002_v17, %s5449_s13 }
 0x1b0   :  { %4599 = vrot.lane.b32.xlu1 %v5980_v20, %s5450_s14  ;;  %4474 = vrot.lane.b32.xlu2 %v6006_v8, %s5449_s13 }
 0x1b7   :  { %4539 = vrot.lane.b32.xlu0 %v6002_v17, %s5450_s14 }
 0x1b8   :  { %4609 = vrot.lane.b32.xlu1 %v5980_v20, %s5451_s15  ;;  %4484 = vrot.lane.b32.xlu2 %v6006_v8, %s5450_s14 }
 0x1ba   :  { %v6050_v29 = vpop.permute.xlu2 %4374 }
 0x1bf   :  { %4549 = vrot.lane.b32.xlu0 %v6002_v17, %s5451_s15 }
 0x1c0   :  { %4619 = vrot.lane.b32.xlu1 %v6057_v47, %s5446_s11  ;;  %4494 = vrot.lane.b32.xlu2 %v6006_v8, %s5451_s15 }
 0x1c2   :  { %v6077_v23 = vpop.permute.xlu2 %4384 }
 0x1c7   :  { %4564 = vrot.lane.b32.xlu0 %v6081_v34, %s5446_s11 }
 0x1c8   :  { %4629 = vrot.lane.b32.xlu1 %v6057_v47, %s5447_s12  ;;  %4504 = vrot.lane.b32.xlu2 %v6085_v26, %s5446_s11 }
 0x1ca   :  { %v6093_v19 = vpop.permute.xlu2 %4394 }
 0x1cf   :  { %4574 = vrot.lane.b32.xlu0 %v6081_v34, %s5447_s12 }
 0x1d0   :  { %4639 = vrot.lane.b32.xlu1 %v6057_v47, %s5448_s0  ;;  %4514 = vrot.lane.b32.xlu2 %v6085_v26, %s5447_s12 }
 0x1d2   :  { %v6101_v16 = vpop.permute.xlu1 %4379  ;;  %v6103_v0 = vpop.permute.xlu2 %4404 }
 0x1d3   :  { %9975 = vst [vmem:[#allocation29_spill] sm:$0xff] %v6101_v16  ;;  %v10010_v39 = vunpack.i.h.bf16 %v6103_v0 }
 0x1d7   :  { %4584 = vrot.lane.b32.xlu0 %v6081_v34, %s5448_s0 }
 0x1d8   :  { %4649 = vrot.lane.b32.xlu1 %v6057_v47, %s5449_s13  ;;  %4524 = vrot.lane.b32.xlu2 %v6085_v26, %s5448_s0 }
 0x1d9   :  { %v6111_v11 = vpop.permute.xlu0 %4439 }
 0x1da   :  { %9976 = vst [vmem:[#allocation30_spill] sm:$0xff] %v6111_v11  ;;  %v6113_v15 = vpop.permute.xlu1 %4389  ;;  %v6115_v40 = vpop.permute.xlu2 %4414 }
 0x1db   :  { %9977 = vst [vmem:[#allocation31_spill] sm:$0xff] %v6113_v15 }
 0x1df   :  { %4594 = vrot.lane.b32.xlu0 %v6081_v34, %s5449_s13 }
 0x1e0   :  { %4664 = vrot.lane.b32.xlu1 %v6057_v47, %s5450_s14  ;;  %4534 = vrot.lane.b32.xlu2 %v6085_v26, %s5449_s13 }
 0x1e1   :  { %v6123_v54 = vpop.permute.xlu0 %4449 }
 0x1e2   :  { %9978 = vst [vmem:[#allocation32_spill] sm:$0xff] %v6123_v54  ;;  %v6127_v2 = vpop.permute.xlu1 %4399  ;;  %v6129_v4 = vpop.permute.xlu2 %4424 }
 0x1e3   :  { %9979 = vst [vmem:[#allocation33_spill] sm:$0xff] %v6127_v2 }
 0x1e4   :  { %9980 = vst [vmem:[#allocation34_spill] sm:$0xff] %v6129_v4 }
 0x1e7   :  { %4604 = vrot.lane.b32.xlu0 %v6081_v34, %s5450_s14 }
 0x1e8   :  { %4674 = vrot.lane.b32.xlu1 %v6057_v47, %s5451_s15  ;;  %4544 = vrot.lane.b32.xlu2 %v6085_v26, %s5450_s14 }
 0x1e9   :  { %v6141_v46 = vpop.permute.xlu0 %4459 }
 0x1ea   :  { %9982 = vst [vmem:[#allocation36_spill] sm:$0xff] %v6141_v46  ;;  %v6151_v52 = vpop.permute.xlu1 %4409  ;;  %v6153_v5 = vpop.permute.xlu2 %4434 }
 0x1eb   :  { %9985 = vst [vmem:[#allocation39_spill] sm:$0xff] %v6151_v52  ;;  %v10009_v46 = vunpack.i.h.bf16 %v6151_v52 }
 0x1ef   :  { %4614 = vrot.lane.b32.xlu0 %v6081_v34, %s5451_s15 }
 0x1f0   :  { %4689 = vrot.lane.b32.xlu1 %v6158_v43, %s5446_s11  ;;  %4554 = vrot.lane.b32.xlu2 %v6085_v26, %s5451_s15 }
 0x1f1   :  { %v6169_v22 = vpop.permute.xlu0 %4469 }
 0x1f2   :  { %9987 = vst [vmem:[#allocation41_spill] sm:$0xff] %v6169_v22  ;;  %v6177_v59 = vpop.permute.xlu1 %4419  ;;  %v6179_v60 = vpop.permute.xlu2 %4444 }
 0x1f3   :  { %9990 = vst [vmem:[#allocation44_spill] sm:$0xff] %v6179_v60 }
 0x1f7   :  { %4624 = vrot.lane.b32.xlu0 %v6186_v49, %s5446_s11 }
 0x1f8   :  { %4699 = vrot.lane.b32.xlu1 %v6158_v43, %s5447_s12  ;;  %4684 = vrot.lane.b32.xlu2 %v6190_v37, %s5446_s11 }
 0x1f9   :  { %v6198_v1 = vpop.permute.xlu0 %4479 }
 0x1fa   :  { %v6200_v55 = vpop.permute.xlu1 %4429  ;;  %v6202_v53 = vpop.permute.xlu2 %4454 }
 0x1fb   :  { %9992 = vst [vmem:[#allocation46_spill] sm:$0xff] %v6202_v53 }
 0x1ff   :  { %4634 = vrot.lane.b32.xlu0 %v6186_v49, %s5447_s12 }
 0x200   :  { %4709 = vrot.lane.b32.xlu1 %v6158_v43, %s5448_s0  ;;  %4694 = vrot.lane.b32.xlu2 %v6190_v37, %s5447_s12 }
 0x201   :  { %v6210_v44 = vpop.permute.xlu0 %4489 }
 0x202   :  { %v6212_v48 = vpop.permute.xlu1 %4559  ;;  %v6214_v3 = vpop.permute.xlu2 %4464 }
 0x203   :  { %9993 = vst [vmem:[#allocation47_spill] sm:$0xff] %v6212_v48 }
 0x204   :  { %9994 = vst [vmem:[#allocation48_spill] sm:$0xff] %v6214_v3 }
 0x207   :  { %4644 = vrot.lane.b32.xlu0 %v6186_v49, %s5448_s0 }
 0x208   :  { %4719 = vrot.lane.b32.xlu1 %v6158_v43, %s5449_s13  ;;  %4704 = vrot.lane.b32.xlu2 %v6190_v37, %s5448_s0 }
 0x209   :  { %v6222_v56 = vpop.permute.xlu0 %4499 }
 0x20a   :  { %v6224_v28 = vpop.permute.xlu1 %4569  ;;  %v6226_v18 = vpop.permute.xlu2 %4474 }
 0x20b   :  { %9995 = vst [vmem:[#allocation49_spill] sm:$0xff] %v6224_v28 }
 0x20c   :  { %9996 = vst [vmem:[#allocation50_spill] sm:$0xff] %v6226_v18 }
 0x20f   :  { %4654 = vrot.lane.b32.xlu0 %v6186_v49, %s5449_s13 }
 0x210   :  { %4724 = vrot.lane.b32.xlu1 %v5905_v7, %s5452_s16  ;;  %4714 = vrot.lane.b32.xlu2 %v6190_v37, %s5449_s13 }
 0x211   :  { %v6234_v6 = vpop.permute.xlu0 %4509 }
 0x212   :  { %v6236_v45 = vpop.permute.xlu1 %4579  ;;  %v6238_v35 = vpop.permute.xlu2 %4484 }
 0x213   :  { %9997 = vst [vmem:[#allocation51_spill] sm:$0xff] %v6236_v45  ;;  %v1141_v45 = vsel %vm189_vm4, %v10010_v39, %v10009_v46  ;;  %v9738_v46 = vunpack.i.h.bf16 %v6093_v19 }
 0x217   :  { %4659 = vrot.lane.b32.xlu0 %v6002_v17, %s5452_s16 }
 0x218   :  { %4739 = vrot.lane.b32.xlu1 %v5980_v20, %s5452_s16  ;;  %4729 = vrot.lane.b32.xlu2 %v6085_v26, %s5452_s16 }
 0x219   :  { %v6246_v31 = vpop.permute.xlu0 %4519 }
 0x21a   :  { %v6248_v21 = vpop.permute.xlu1 %4589  ;;  %v6250_v38 = vpop.permute.xlu2 %4494 }
 0x21f   :  { %4669 = vrot.lane.b32.xlu0 %v6186_v49, %s5450_s14 }
 0x220   :  { %4754 = vrot.lane.b32.xlu1 %v6057_v47, %s5452_s16  ;;  %4744 = vrot.lane.b32.xlu2 %v6006_v8, %s5452_s16 }
 0x221   :  { %v6258_v25 = vpop.permute.xlu0 %4529 }
 0x222   :  { %v6260_v50 = vpop.permute.xlu1 %4599  ;;  %v6262_v10 = vpop.permute.xlu2 %4504  ;;  %v9718_v48 = vunpack.i.h.bf16 %v6258_v25 }
 0x223   :  { %9998 = vst [vmem:[#allocation52_spill] sm:$0xff] %v6262_v10 }
 0x227   :  { %4679 = vrot.lane.b32.xlu0 %v6186_v49, %s5451_s15 }
 0x228   :  { %4774 = vrot.lane.b32.xlu1 %v5905_v7, %s5453_s17  ;;  %4764 = vrot.lane.b32.xlu2 %v5909_v12, %s5453_s17 }
 0x229   :  { %v6270_v58 = vpop.permute.xlu0 %4539 }
 0x22a   :  { %9999 = vst [vmem:[#allocation53_spill] sm:$0xff] %v6270_v58  ;;  %v6272_v9 = vpop.permute.xlu1 %4609  ;;  %v6274_v27 = vpop.permute.xlu2 %4514 }
 0x22b   :  { %10000 = vst [vmem:[#allocation54_spill] sm:$0xff] %v6274_v27 }
 0x22f   :  { %4734 = vrot.lane.b32.xlu0 %v5927_v42, %s5452_s16 }
 0x230   :  { %4794 = vrot.lane.b32.xlu1 %v6158_v43, %s5450_s14  ;;  %4779 = vrot.lane.b32.xlu2 %v6085_v26, %s5453_s17 }
 0x231   :  { %v6282_v36 = vpop.permute.xlu0 %4549 }
 0x232   :  { %10001 = vst [vmem:[#allocation55_spill] sm:$0xff] %v6282_v36  ;;  %v6284_v7 = vpop.permute.xlu1 %4619  ;;  %v6286_v12 = vpop.permute.xlu2 %4524 }
 0x233   :  { %10002 = vst [vmem:[#allocation56_spill] sm:$0xff] %v6284_v7  ;;  %v10012_v41 = vunpack.i.h.bf16 %v6286_v12 }
 0x234   :  { %10003 = vst [vmem:[#allocation57_spill] sm:$0xff] %v6286_v12 }
 0x237   :  { %4749 = vrot.lane.b32.xlu0 %v6081_v34, %s5452_s16 }
 0x238   :  { %4804 = vrot.lane.b32.xlu1 %v6158_v43, %s5451_s15  ;;  %4789 = vrot.lane.b32.xlu2 %v6190_v37, %s5450_s14 }
 0x239   :  { %v6294_v60 = vpop.permute.xlu0 %4564 }
 0x23a   :  { %10004 = vst [vmem:[#allocation58_spill] sm:$0xff] %v6294_v60  ;;  %v6296_v11 = vpop.permute.xlu1 %4629  ;;  %v6298_v26 = vpop.permute.xlu2 %4534  ;;  %v9723_v60 = vunpack.i.l.bf16 %v6258_v25 }
 0x23b   :  { %10005 = vst [vmem:[#allocation59_spill] sm:$0xff] %v6296_v11  ;;  %v9717_v7 = vunpack.i.h.bf16 %v6298_v26  ;;  %v9722_v53 = vunpack.i.l.bf16 %v6298_v26 }
 0x23c   :  { %10006 = vst [vmem:[#allocation60_spill] sm:$0xff] %v6298_v26 }
 0x23d   :  { %v1143_v54 = vsel %vm189_vm4, %v9718_v48, %v9717_v7  ;;  %v9730_v48 = vunpack.i.l.bf16 %v6103_v0 }
 0x23e   :  { %2052 = vmatpush.msra.mxu1 %v1143_v54  ;;  %v1142_v54 = vsel %vm189_vm4, %v9723_v60, %v9722_v53  ;;  %v9727_v53 = vunpack.i.h.bf16 %v6246_v31  ;;  %v10011_v60 = vunpack.i.l.bf16 %v6151_v52 }
 0x23f   :  { %4759 = vrot.lane.b32.xlu0 %v6186_v49, %s5452_s16 }
 0x240   :  { %4814 = vrot.lane.b32.xlu1 %v6158_v43, %s5452_s16  ;;  %4799 = vrot.lane.b32.xlu2 %v6190_v37, %s5451_s15  ;;  %v1140_v3 = vsel %vm189_vm4, %v9730_v48, %v10011_v60  ;;  %v1023_v39 = vsel %vm158_vm5, %v9727_v53, %v10012_v41  ;;  %v9733_v60 = vunpack.i.l.bf16 %v6127_v2  ;;  %v9739_v48 = vunpack.i.h.bf16 %v6113_v15 }
 0x241   :  { %v6325_v7 = vpop.permute.xlu0 %4574  ;;  %2053 = vmatpush.msra.mxu1 %v1142_v54  ;;  %v9728_v54 = vunpack.i.l.bf16 %v6286_v12 }
 0x242   :  { %10007 = vst [vmem:[#allocation61_spill] sm:$0xff] %v6325_v7  ;;  %v6329_v11 = vpop.permute.xlu1 %4639  ;;  %v6331_v28 = vpop.permute.xlu2 %4544  ;;  %v9729_v7 = vunpack.i.l.bf16 %v6246_v31 }
 0x243   :  { %10008 = vst [vmem:[#allocation62_spill] sm:$0xff] %v6329_v11  ;;  %2054 = vmatpush.msra.mxu1 %v1141_v45  ;;  %v9732_v11 = vunpack.i.h.bf16 %v6127_v2  ;;  %v9736_v45 = vunpack.i.l.bf16 %v6234_v6 }
 0x244   :  { %v1022_v41 = vsel %vm158_vm5, %v9729_v7, %v9728_v54  ;;  %v9734_v54 = vunpack.i.h.bf16 %v6234_v6 }
 0x245   :  { %2055 = vmatpush.msra.mxu1 %v1140_v3  ;;  %v1021_v53 = vsel %vm158_vm5, %v9738_v46, %v9732_v11  ;;  %v9740_v11 = vunpack.i.h.bf16 %v6077_v23  ;;  %v9746_v46 = vunpack.i.h.bf16 %v6222_v56 }
 0x247   :  { %4769 = vrot.lane.b32.xlu0 %v6002_v17, %s5453_s17  ;;  %2056 = vmatpush.msra.mxu1 %v1023_v39  ;;  %v9737_v17 = vunpack.i.l.bf16 %v6093_v19 }
 0x248   :  { %4819 = vrot.lane.b32.xlu1 %v5980_v20, %s5453_s17  ;;  %4809 = vrot.lane.b32.xlu2 %v6190_v37, %s5452_s16 }
 0x249   :  { %v6369_v3 = vpop.permute.xlu0 %4584  ;;  %2057 = vmatpush.msra.mxu1 %v1022_v41  ;;  %v9735_v41 = vunpack.i.l.bf16 %v6274_v27  ;;  %v1020_v7 = vsel %vm158_vm5, %v9737_v17, %v9733_v60  ;;  %v9741_v60 = vunpack.i.l.bf16 %v6113_v15 }
 0x24a   :  { %10013 = vst [vmem:[#allocation63_spill] sm:$0xff] %v6369_v3  ;;  %v6373_v39 = vpop.permute.xlu1 %4649  ;;  %v6375_v20 = vpop.permute.xlu2 %4554 }
 0x24b   :  { %10014 = vst [vmem:[#allocation64_spill] sm:$0xff] %v6373_v39  ;;  %2058 = vmatpush.msra.mxu1 %v1021_v53  ;;  %v10015_v39 = vunpack.i.h.bf16 %v6274_v27 }
 0x24d   :  { %2059 = vmatpush.msra.mxu1 %v1020_v7  ;;  %v903_v53 = vsel %vm127_vm6, %v9734_v54, %v10015_v39  ;;  %v902_v7 = vsel %vm127_vm6, %v9736_v45, %v9735_v41  ;;  %v9742_v41 = vunpack.i.h.bf16 %v6238_v35  ;;  %v9744_v45 = vunpack.i.l.bf16 %v6238_v35 }
 0x24f   :  { %4784 = vrot.lane.b32.xlu0 %v5927_v42, %s5453_s17  ;;  %2060 = vmatpush.msra.mxu1 %v903_v53  ;;  %v9743_v42 = vunpack.i.l.bf16 %v6077_v23  ;;  %v9749_v53 = vunpack.i.h.bf16 %v6101_v16 }
 0x250   :  { %4834 = vrot.lane.b32.xlu1 %v6057_v47, %s5453_s17  ;;  %4824 = vrot.lane.b32.xlu2 %v6006_v8, %s5453_s17  ;;  %v901_v8 = vsel %vm127_vm6, %v9740_v11, %v9739_v48 }
 0x251   :  { %v6413_v39 = vpop.permute.xlu0 %4594  ;;  %2061 = vmatpush.msra.mxu1 %v902_v7  ;;  %v900_v48 = vsel %vm127_vm6, %v9743_v42, %v9741_v60  ;;  %v10019_v60 = vunpack.i.h.bf16 %v6262_v10  ;;  %v9750_v42 = vunpack.i.h.bf16 %v6050_v29 }
 0x252   :  { %v6417_v54 = vpop.permute.xlu1 %4664  ;;  %v6419_v47 = vpop.permute.xlu2 %4684 }
 0x253   :  { %10016 = vst [vmem:[#allocation65_spill] sm:$0xff] %v6419_v47  ;;  %v9747_v7 = vunpack.i.h.bf16 %v6417_v54  ;;  %v9745_v17 = vunpack.i.l.bf16 %v6417_v54  ;;  %2062 = vmatpush.msra.mxu1 %v901_v8 }
 0x255   :  { %2063 = vmatpush.msra.mxu1 %v900_v48  ;;  %v6445_v11 = vsel %vm232_vm0, %v9742_v41, %v9747_v7  ;;  %v6453_v8 = vsel %vm232_vm0, %v9744_v45, %v9745_v17  ;;  %v9748_v48 = vunpack.i.l.bf16 %v6222_v56  ;;  %v783_v41 = vsel %vm96_vm7, %v9746_v46, %v10019_v60 }
 0x256   :  { %10017 = vst [vmem:[#allocation66_spill] sm:$0xff] %v6445_v11  ;;  %v9751_v45 = vunpack.i.l.bf16 %v6101_v16  ;;  %v10020_v17 = vunpack.i.l.bf16 %v6262_v10  ;;  %v6535_v16 = vld [vmem:[#allocation9 + $0x18] sm:$0xff] }
 0x257   :  { %10018 = vst [vmem:[#allocation67_spill] sm:$0xff] %v6453_v8  ;;  %4829 = vrot.lane.b32.xlu0 %v6081_v34, %s5453_s17  ;;  %2064 = vmatpush.msra.mxu1 %v783_v41  ;;  %v6494_v34 = vld [vmem:[#allocation9] sm:$0xff]  ;;  %v10022_v8 = vunpack.i.l.bf16 %v6050_v29 }
 0x258   :  { %4849 = vrot.lane.b32.xlu1 %v6158_v43, %s5453_s17  ;;  %4839 = vrot.lane.b32.xlu2 %v6190_v37, %s5453_s17  ;;  %v782_v60 = vsel %vm96_vm7, %v9748_v48, %v10020_v17  ;;  %v781_v43 = vsel %vm96_vm7, %v9750_v42, %v9749_v53  ;;  %v9752_v37 = vunpack.i.h.bf16 %v6250_v38  ;;  %v9756_v17 = vunpack.i.l.bf16 %v6250_v38  ;;  %v1930_v53 = vld [vmem:[%s9679_s5 + $0x10] sm:$0xff]  ;;  %v1928_v42 = vld [vmem:[%s9679_s5] sm:$0xff] }
 0x259   :  { %v6477_v46 = vpop.permute.xlu0 %4604  ;;  %2065 = vmatpush.msra.mxu1 %v782_v60  ;;  %v780_v11 = vsel %vm96_vm7, %v10022_v8, %v9751_v45 }
 0x25a   :  { %v6480_v41 = vpop.permute.xlu1 %4674  ;;  %v6482_v7 = vpop.permute.xlu2 %4694 }
 0x25b   :  { %10021 = vst [vmem:[#allocation68_spill] sm:$0xff] %v6482_v7  ;;  %v9753_v48 = vunpack.i.h.bf16 %v6480_v41  ;;  %v9757_v60 = vunpack.i.l.bf16 %v6480_v41  ;;  %2066 = vmatpush.msra.mxu1 %v781_v43 }
 0x25d   :  { %2067 = vmatpush.msra.mxu1 %v780_v11  ;;  %v6514_v43 = vsel %vm263_vm1, %v9752_v37, %v9753_v48  ;;  %v6522_v11 = vsel %vm263_vm1, %v9756_v17, %v9757_v60  ;;  %v9766_v17 = vunpack.i.h.bf16 %v6419_v47  ;;  %v9770_v60 = vunpack.i.l.bf16 %v6419_v47 }
 0x25e   :  { %10023 = vst [vmem:[#allocation69_spill] sm:$0xff] %v6514_v43  ;;  %2068 = vmatmul.f32.vlgmr.msra.gmra.mxu1 %v6494_v34  ;;  %v9778_v47 = vunpack.i.l.bf16 %v6482_v7 }
 0x25f   :  { %10024 = vst [vmem:[#allocation70_spill] sm:$0xff] %v6522_v11  ;;  %4844 = vrot.lane.b32.xlu0 %v6186_v49, %s5453_s17  ;;  %v1929_v49 = vld [vmem:[%s9679_s5 + $0x8] sm:$0xff] }
 0x260   :  { %1944 = vperm.xlu1 %4371, %v1930_v53   ;;  %1934 = vperm.xlu2 %4372, %v1928_v42   ;;  %v1931_v42 = vld [vmem:[%s9679_s5 + $0x18] sm:$0xff] }
 0x261   :  { %v6527_v8 = vpop.permute.xlu0 %4614 }
 0x262   :  { %v6529_v45 = vpop.permute.xlu1 %4689  ;;  %v6531_v37 = vpop.permute.xlu2 %4704 }
 0x263   :  { %10025 = vst [vmem:[#allocation71_spill] sm:$0xff] %v6531_v37  ;;  %v9767_v48 = vunpack.i.h.bf16 %v6529_v45  ;;  %v9771_v43 = vunpack.i.l.bf16 %v6529_v45  ;;  %v9785_v3 = vunpack.i.h.bf16 %v6531_v37  ;;  %v9788_v12 = vunpack.i.l.bf16 %v6531_v37 }
 0x265   :  { %v6552_v53 = vsel %vm96_vm7, %v9766_v17, %v9767_v48  ;;  %v6560_v11 = vsel %vm96_vm7, %v9770_v60, %v9771_v43  ;;  %v6570_v48 = vld [vmem:[#allocation9 + $0x30] sm:$0xff] }
 0x266   :  { %2071 = vmatmul.f32.gmra.mxu1 %v6535_v16  ;;  %10026 = vst [vmem:[#allocation72_spill] sm:$0xff] %v6552_v53  ;;  %v9776_v53 = vunpack.i.h.bf16 %v6482_v7 }
 0x267   :  { %10027 = vst [vmem:[#allocation73_spill] sm:$0xff] %v6560_v11  ;;  %1939 = vperm.xlu0 %4370, %v1929_v49  }
 0x268   :  { %1949 = vperm.xlu2 %4372, %v1931_v42  }
 0x269   :  { %v6562_v10 = vpop.permute.xlu0 %4624 }
 0x26a   :  { %v6564_v15 = vpop.permute.xlu1 %4699  ;;  %v6566_v27 = vpop.permute.xlu2 %4714 }
 0x26b   :  { %10028 = vst [vmem:[#allocation74_spill] sm:$0xff] %v6566_v27  ;;  %v9777_v2 = vunpack.i.h.bf16 %v6564_v15  ;;  %v9779_v17 = vunpack.i.l.bf16 %v6564_v15  ;;  %v9792_v7 = vunpack.i.h.bf16 %v6566_v27  ;;  %v9793_v52 = vunpack.i.l.bf16 %v6566_v27 }
 0x26d   :  { %v6581_v49 = vsel %vm127_vm6, %v9776_v53, %v9777_v2  ;;  %v6589_v42 = vsel %vm127_vm6, %v9778_v47, %v9779_v17  ;;  %v6597_v2 = vld [vmem:[#allocation9 + $0x48] sm:$0xff] }
 0x26e   :  { %2074 = vmatmul.f32.gmra.mxu1 %v6570_v48  ;;  %10029 = vst [vmem:[#allocation75_spill] sm:$0xff] %v6581_v49 }
 0x26f   :  { %10030 = vst [vmem:[#allocation76_spill] sm:$0xff] %v6589_v42 }
 0x271   :  { %v6591_v60 = vpop.permute.xlu0 %4634 }
 0x272   :  { %v4710_v43 = vpop.permute.xlu1 %4709  ;;  %v6593_v11 = vpop.permute.xlu2 %4729 }
 0x273   :  { %v4712_v18 = vunpack.i.h.bf16 %v4710_v43  ;;  %v4711_v53 = vunpack.i.l.bf16 %v4710_v43  ;;  %v9801_v27 = vunpack.i.h.bf16 %v6593_v11 }
 0x275   :  { %v6603_v49 = vsel %vm158_vm5, %v9785_v3, %v4712_v18  ;;  %v6609_v47 = vsel %vm158_vm5, %v9788_v12, %v4711_v53 }
 0x276   :  { %10031 = vst [vmem:[#allocation77_spill] sm:$0xff] %v6603_v49  ;;  %2077 = vmatmul.f32.gmra.mxu1 %v6597_v2  ;;  %v10033_v49 = vunpack.i.h.bf16 %v6258_v25 }
 0x277   :  { %10032 = vst [vmem:[#allocation78_spill] sm:$0xff] %v6609_v47 }
 0x279   :  { %v6612_v17 = vpop.permute.xlu0 %4644 }
 0x27a   :  { %v4720_v42 = vpop.permute.xlu1 %4719  ;;  %v6614_v43 = vpop.permute.xlu2 %4744 }
 0x27b   :  { %v4722_v24 = vunpack.i.h.bf16 %v4720_v42  ;;  %v4721_v3 = vunpack.i.l.bf16 %v4720_v42  ;;  %v10036_v42 = vunpack.i.l.bf16 %v6258_v25 }
 0x27d   :  { %v1147_v37 = vsel %vm189_vm4, %v4722_v24, %v10033_v49  ;;  %v6626_v12 = vsel %vm189_vm4, %v9792_v7, %v4722_v24  ;;  %v6632_v47 = vsel %vm189_vm4, %v9793_v52, %v4721_v3  ;;  %v1146_v33 = vsel %vm189_vm4, %v4721_v3, %v10036_v42 }
 0x27e   :  { %10034 = vst [vmem:[#allocation79_spill] sm:$0xff] %v6626_v12  ;;  %1965 = vmatpush.msrb.mxu2 %v1147_v37  ;;  %v10037_v52 = vunpack.i.h.bf16 %v6103_v0  ;;  %v9799_v37 = vunpack.i.h.bf16 %v6612_v17  ;;  %v10039_v42 = vunpack.i.h.bf16 %v6246_v31 }
 0x27f   :  { %10035 = vst [vmem:[#allocation80_spill] sm:$0xff] %v6632_v47 }
 0x280   :  { %1966 = vmatpush.msrb.mxu2 %v1146_v33  ;;  %v10038_v33 = vunpack.i.l.bf16 %v6103_v0  ;;  %v1027_v47 = vsel %vm158_vm5, %v4712_v18, %v10039_v42  ;;  %v10042_v0 = vunpack.i.h.bf16 %v6093_v19  ;;  %v10043_v42 = vunpack.i.l.bf16 %v6093_v19 }
 0x281   :  { %v6638_v49 = vpop.permute.xlu0 %4654 }
 0x282   :  { %v9798_v26 = vunpack.i.h.bf16 %v6638_v49  ;;  %v9797_v24 = vunpack.i.l.bf16 %v6638_v49  ;;  %v6642_v7 = vpop.permute.xlu1 %4724  ;;  %v6644_v12 = vpop.permute.xlu2 %4764 }
 0x284   :  { %v1145_v25 = vsel %vm189_vm4, %v9798_v26, %v10037_v52  ;;  %v1144_v3 = vsel %vm189_vm4, %v9797_v24, %v10038_v33  ;;  %v10041_v24 = vunpack.i.l.bf16 %v6246_v31  ;;  %v10044_v26 = vunpack.i.l.bf16 %v6612_v17 }
 0x285   :  { %1967 = vmatpush.msrb.mxu2 %v1145_v25  ;;  %v1025_v25 = vsel %vm158_vm5, %v9799_v37, %v10042_v0 }
 0x286   :  { %v1026_v18 = vsel %vm158_vm5, %v4711_v53, %v10041_v24  ;;  %v9803_v53 = vunpack.i.h.bf16 %v6153_v5  ;;  %v1024_v0 = vsel %vm158_vm5, %v10044_v26, %v10043_v42  ;;  %v10046_v26 = vunpack.i.h.bf16 %v6234_v6 }
 0x287   :  { %1968 = vmatpush.msrb.mxu2 %v1144_v3  ;;  %v10047_v42 = vunpack.i.h.bf16 %v6564_v15 }
 0x289   :  { %v6664_v22 = vpop.permute.xlu0 %4659  ;;  %1969 = vmatpush.msrb.mxu2 %v1027_v47  ;;  %v9802_v47 = vunpack.i.l.bf16 %v6593_v11  ;;  %v907_v24 = vsel %vm127_vm6, %v10047_v42, %v10046_v26 }
 0x28a   :  { %10040 = vst [vmem:[#allocation81_spill] sm:$0xff] %v6664_v22  ;;  %v9800_v52 = vunpack.i.h.bf16 %v6664_v22  ;;  %v6669_v33 = vpop.permute.xlu1 %4739  ;;  %v6671_v3 = vpop.permute.xlu2 %4779  ;;  %v10045_v37 = vunpack.i.l.bf16 %v6664_v22 }
 0x28b   :  { %1970 = vmatpush.msrb.mxu2 %v1026_v18  ;;  %v10052_v18 = vunpack.i.l.bf16 %v6234_v6 }
 0x28c   :  { %v1551_v31 = vsel %vm294_vm3, %v9800_v52, %v9801_v27  ;;  %v1550_v52 = vsel %vm294_vm3, %v10045_v37, %v9802_v47  ;;  %v10048_v37 = vunpack.i.h.bf16 %v6642_v7 }
 0x28d   :  { %1971 = vmatpush.msrb.mxu2 %v1025_v25  ;;  %1994 = vmatpush.msrb.mxu3 %v1551_v31  ;;  %v10049_v31 = vunpack.i.h.bf16 %v6375_v20 }
 0x28e   :  { %v1549_v47 = vsel %vm294_vm3, %v9803_v53, %v10048_v37  ;;  %v10053_v37 = vunpack.i.l.bf16 %v6564_v15 }
 0x28f   :  { %1972 = vmatpush.msrb.mxu2 %v1024_v0  ;;  %1995 = vmatpush.msrb.mxu3 %v1550_v52  ;;  %v10050_v52 = vunpack.i.h.bf16 %v6282_v36 }
 0x290   :  { %v906_v53 = vsel %vm127_vm6, %v10053_v37, %v10052_v18 }
 0x291   :  { %v1431_v0 = vsel %vm263_vm1, %v10050_v52, %v10049_v31  ;;  %v6733_v42 = vpop.permute.xlu0 %4669  ;;  %1973 = vmatpush.msrb.mxu2 %v907_v24  ;;  %1996 = vmatpush.msrb.mxu3 %v1549_v47  ;;  %v10054_v24 = vunpack.i.l.bf16 %v6642_v7  ;;  %v10055_v47 = vunpack.i.l.bf16 %v6153_v5  ;;  %v10056_v52 = vunpack.i.h.bf16 %v6077_v23 }
 0x292   :  { %10051 = vst [vmem:[#allocation82_spill] sm:$0xff] %v6733_v42  ;;  %v6744_v19 = vpop.permute.xlu1 %4754  ;;  %v6746_v27 = vpop.permute.xlu2 %4789  ;;  %v10057_v31 = vunpack.i.h.bf16 %v6591_v60 }
 0x293   :  { %v1548_v6 = vsel %vm294_vm3, %v10055_v47, %v10054_v24  ;;  %v9806_v15 = vunpack.i.h.bf16 %v6744_v19  ;;  %v9807_v18 = vunpack.i.l.bf16 %v6744_v19  ;;  %1974 = vmatpush.msrb.mxu2 %v906_v53  ;;  %v10058_v24 = vunpack.i.h.bf16 %v6733_v42 }
 0x294   :  { %1997 = vmatpush.msrb.mxu3 %v1548_v6  ;;  %v905_v22 = vsel %vm127_vm6, %v10057_v31, %v10056_v52  ;;  %v10059_v47 = vunpack.i.h.bf16 %v6417_v54  ;;  %v10061_v53 = vunpack.i.l.bf16 %v6733_v42  ;;  %v10062_v6 = vunpack.i.l.bf16 %v6417_v54 }
 0x295   :  { %1975 = vmatpush.msrb.mxu2 %v905_v22  ;;  %v10064_v31 = vunpack.i.h.bf16 %v6614_v43  ;;  %v10065_v54 = vunpack.i.l.bf16 %v6614_v43  ;;  %v10067_v22 = vunpack.i.h.bf16 %v6477_v46  ;;  %v10072_v42 = vunpack.i.l.bf16 %v6746_v27 }
 0x296   :  { %v6771_v37 = vsel %vm232_vm0, %v10059_v47, %v10058_v24  ;;  %v6779_v26 = vsel %vm232_vm0, %v10062_v6, %v10061_v53  ;;  %1998 = vmatpush.msrb.mxu3 %v1431_v0  ;;  %v10066_v47 = vunpack.i.h.bf16 %v6746_v27  ;;  %v10068_v6 = vunpack.i.l.bf16 %v6077_v23 }
 0x297   :  { %10060 = vst [vmem:[#allocation83_spill] sm:$0xff] %v6771_v37  ;;  %v6788_v52 = vsel %vm294_vm3, %v10064_v31, %v9806_v15  ;;  %v6796_v24 = vsel %vm294_vm3, %v10065_v54, %v9807_v18  ;;  %v10069_v31 = vunpack.i.l.bf16 %v6591_v60  ;;  %v10070_v54 = vunpack.i.l.bf16 %v6375_v20 }
 0x298   :  { %10063 = vst [vmem:[#allocation84_spill] sm:$0xff] %v6779_v26  ;;  %v6804_v0 = vsel %vm232_vm0, %v10067_v22, %v10066_v47  ;;  %v10071_v18 = vunpack.i.l.bf16 %v6282_v36  ;;  %v10073_v47 = vunpack.i.l.bf16 %v6477_v46  ;;  %v10076_v26 = vunpack.i.h.bf16 %v6200_v55 }
 0x299   :  { %v904_v15 = vsel %vm127_vm6, %v10069_v31, %v10068_v6  ;;  %v10074_v31 = vunpack.i.h.bf16 %v6222_v56  ;;  %v6845_v6 = vpop.permute.xlu0 %4679  ;;  %v10078_v23 = vunpack.i.l.bf16 %v6200_v55  ;;  %v10082_v37 = vunpack.i.h.bf16 %v6331_v28 }
 0x29a   :  { %v1430_v25 = vsel %vm263_vm1, %v10071_v18, %v10070_v54  ;;  %v6825_v22 = vsel %vm232_vm0, %v10073_v47, %v10072_v42  ;;  %1976 = vmatpush.msrb.mxu2 %v904_v15  ;;  %v10075_v18 = vunpack.i.h.bf16 %v6529_v45  ;;  %v10077_v42 = vunpack.i.h.bf16 %v6129_v4  ;;  %v6856_v53 = vpop.permute.xlu1 %4774  ;;  %v6858_v15 = vpop.permute.xlu2 %4799 }
 0x29b   :  { %1999 = vmatpush.msrb.mxu3 %v1430_v25  ;;  %v10090_v36 = vunpack.i.l.bf16 %v6050_v29 }
 0x29c   :  { %v787_v54 = vsel %vm96_vm7, %v10075_v18, %v10074_v31  ;;  %v1429_v47 = vsel %vm263_vm1, %v10077_v42, %v10076_v26  ;;  %v10079_v31 = vunpack.i.l.bf16 %v6129_v4  ;;  %v10083_v42 = vunpack.i.h.bf16 %v6270_v58 }
 0x29d   :  { %1977 = vmatpush.msrb.mxu2 %v787_v54  ;;  %2000 = vmatpush.msrb.mxu3 %v1429_v47  ;;  %v10080_v54 = vunpack.i.l.bf16 %v6222_v56  ;;  %v10081_v47 = vunpack.i.l.bf16 %v6529_v45  ;;  %v4742_v45 = vunpack.i.h.bf16 %v6669_v33  ;;  %v10084_v26 = vunpack.i.h.bf16 %v6050_v29 }
 0x29e   :  { %v1428_v18 = vsel %vm263_vm1, %v10079_v31, %v10078_v23  ;;  %v1311_v56 = vsel %vm232_vm0, %v10083_v42, %v10082_v37  ;;  %v10086_v23 = vunpack.i.h.bf16 %v6845_v6  ;;  %v10088_v31 = vunpack.i.l.bf16 %v6845_v6 }
 0x29f   :  { %v786_v25 = vsel %vm96_vm7, %v10081_v47, %v10080_v54  ;;  %2001 = vmatpush.msrb.mxu3 %v1428_v18  ;;  %v10085_v54 = vunpack.i.h.bf16 %v6562_v10  ;;  %v10089_v37 = vunpack.i.l.bf16 %v6480_v41  ;;  %v9816_v4 = vunpack.i.h.bf16 %v6115_v40 }
 0x2a0   :  { %1978 = vmatpush.msrb.mxu2 %v786_v25  ;;  %v10087_v25 = vunpack.i.h.bf16 %v6480_v41  ;;  %v10092_v41 = vunpack.i.l.bf16 %v6331_v28  ;;  %v10099_v29 = vunpack.i.l.bf16 %v6177_v59 }
 0x2a1   :  { %v785_v47 = vsel %vm96_vm7, %v10085_v54, %v10084_v26  ;;  %v6896_v42 = vsel %vm263_vm1, %v10089_v37, %v10088_v31  ;;  %2002 = vmatpush.msrb.mxu3 %v1311_v56  ;;  %v4741_v54 = vunpack.i.l.bf16 %v6669_v33  ;;  %v10093_v31 = vunpack.i.l.bf16 %v6270_v58 }
 0x2a2   :  { %v6888_v18 = vsel %vm263_vm1, %v10087_v25, %v10086_v23  ;;  %1979 = vmatpush.msrb.mxu2 %v785_v47  ;;  %v10091_v23 = vunpack.i.l.bf16 %v6562_v10  ;;  %v10094_v26 = vunpack.i.l.bf16 %v6858_v15  ;;  %v10095_v56 = vunpack.i.l.bf16 %v6527_v8 }
 0x2a3   :  { %v1310_v37 = vsel %vm232_vm0, %v10093_v31, %v10092_v41  ;;  %v10100_v58 = vunpack.i.l.bf16 %v6115_v40 }
 0x2a4   :  { %v784_v25 = vsel %vm96_vm7, %v10091_v23, %v10090_v36  ;;  %v6919_v33 = vsel %vm263_vm1, %v10095_v56, %v10094_v26  ;;  %2003 = vmatpush.msrb.mxu3 %v1310_v37  ;;  %v10096_v36 = vunpack.i.h.bf16 %v6593_v11  ;;  %v10097_v23 = vunpack.i.h.bf16 %v6177_v59  ;;  %v6933_v26 = vpop.permute.xlu0 %4734 }
 0x2a5   :  { %1980 = vmatpush.msrb.mxu2 %v784_v25  ;;  %v4737_v25 = vunpack.i.h.bf16 %v6933_v26  ;;  %v4736_v31 = vunpack.i.l.bf16 %v6933_v26  ;;  %v10098_v37 = vunpack.i.l.bf16 %v6593_v11  ;;  %v10101_v11 = vunpack.i.h.bf16 %v6642_v7 }
 0x2a6   :  { %1981 = vmatmul.f32.vlgmr.msrb.gmra.mxu2 %v6494_v34  ;;  %v1547_v47 = vsel %vm294_vm3, %v10096_v36, %v4742_v45  ;;  %v1309_v41 = vsel %vm232_vm0, %v9816_v4, %v10097_v23  ;;  %v6941_v36 = vpop.permute.xlu1 %4794 }
 0x2a7   :  { %2081 = vmatpush.msra.mxu2 %v1547_v47  ;;  %2004 = vmatpush.msrb.mxu3 %v1309_v41  ;;  %v1546_v56 = vsel %vm294_vm3, %v10098_v37, %v4741_v54  ;;  %v1308_v47 = vsel %vm232_vm0, %v10100_v58, %v10099_v29  ;;  %v9818_v23 = vunpack.i.h.bf16 %v6941_v36  ;;  %v9817_v41 = vunpack.i.l.bf16 %v6941_v36 }
 0x2a8   :  { %v1545_v26 = vsel %vm294_vm3, %v10101_v11, %v4737_v25  ;;  %v10102_v37 = vunpack.i.h.bf16 %v6746_v27  ;;  %v10103_v29 = vunpack.i.l.bf16 %v6746_v27  ;;  %v10105_v27 = vunpack.i.h.bf16 %v6375_v20 }
 0x2a9   :  { %2082 = vmatpush.msra.mxu2 %v1546_v56  ;;  %2005 = vmatpush.msrb.mxu3 %v1308_v47  ;;  %v4612_v47 = vunpack.i.h.bf16 %v6272_v9 }
 0x2aa   :  { %v6962_v58 = vsel %vm232_vm0, %v10102_v37, %v9818_v23  ;;  %v6970_v56 = vsel %vm232_vm0, %v10103_v29, %v9817_v41  ;;  %v4611_v37 = vunpack.i.l.bf16 %v6272_v9  ;;  %v10111_v23 = vunpack.i.h.bf16 %v6614_v43 }
 0x2ab   :  { %2006 = vmatpush.msrb.mxu3 %v5992_v61  ;;  %2083 = vmatpush.msra.mxu2 %v1545_v26  ;;  %v10104_v61 = vunpack.i.l.bf16 %v6642_v7  ;;  %v4492_v26 = vunpack.i.h.bf16 %v6210_v44  ;;  %v1427_v29 = vsel %vm263_vm1, %v10105_v27, %v4612_v47  ;;  %v6988_v7 = vld [vmem:[#allocation9 + $0x8] sm:$0xff] }
 0x2ac   :  { %v6985_v4 = vpop.permute.xlu0 %4749 }
 0x2ad   :  { %v1544_v11 = vsel %vm294_vm3, %v10104_v61, %v4736_v31  ;;  %2007 = vmatpush.msrb.mxu3 %v5989_v13  ;;  %v4491_v13 = vunpack.i.l.bf16 %v6210_v44  ;;  %v9821_v61 = vunpack.i.h.bf16 %v6985_v4  ;;  %v9820_v9 = vunpack.i.l.bf16 %v6985_v4 }
 0x2ae   :  { %2084 = vmatpush.msra.mxu2 %v1544_v11  ;;  %v6993_v11 = vpop.permute.xlu1 %4804 }
 0x2af   :  { %1984 = vmatmul.f32.gmra.mxu2 %v6535_v16  ;;  %2008 = vmatpush.msrb.mxu3 %v5898_v62  ;;  %v10106_v16 = vunpack.i.l.bf16 %v6375_v20  ;;  %v9819_v41 = vunpack.i.l.bf16 %v6993_v11  ;;  %v10107_v62 = vunpack.i.h.bf16 %v6200_v55  ;;  %v1543_v20 = vsel %vm294_vm3, %v4742_v45, %v9821_v61 }
 0x2b0   :  { %2085 = vmatpush.msra.mxu2 %v1427_v29  ;;  %2168 = vmatpush.msrb.mxu1 %v1543_v20  ;;  %v10108_v29 = vunpack.i.l.bf16 %v6858_v15  ;;  %v1542_v45 = vsel %vm294_vm3, %v4741_v54, %v9820_v9  ;;  %v1541_v54 = vsel %vm294_vm3, %v4737_v25, %v10111_v23  ;;  %v10112_v61 = vunpack.i.l.bf16 %v6331_v28 }
 0x2b1   :  { %v1426_v27 = vsel %vm263_vm1, %v10106_v16, %v4611_v37  ;;  %2009 = vmatpush.msrb.mxu3 %v5891_v14  ;;  %v1425_v44 = vsel %vm263_vm1, %v10107_v62, %v4492_v26  ;;  %v4602_v16 = vunpack.i.h.bf16 %v6260_v50  ;;  %v10113_v20 = vunpack.i.l.bf16 %v6614_v43 }
 0x2b2   :  { %2086 = vmatpush.msra.mxu2 %v1426_v27  ;;  %2010 = vmatmul.f32.vlgmr.msrb.gmra.mxu3 %v6988_v7  ;;  %v7016_v14 = vsel %vm263_vm1, %v10108_v29, %v9819_v41  ;;  %v10109_v27 = vunpack.i.l.bf16 %v6200_v55  ;;  %v4601_v29 = vunpack.i.l.bf16 %v6260_v50  ;;  %v10110_v55 = vunpack.i.h.bf16 %v6331_v28 }
 0x2b3   :  { %2169 = vmatpush.msrb.mxu1 %v1542_v45  ;;  %v4481_v41 = vunpack.i.l.bf16 %v6198_v1  ;;  %v1540_v25 = vsel %vm294_vm3, %v4736_v31, %v10113_v20  ;;  %v10114_v23 = vunpack.i.h.bf16 %v6177_v59  ;;  %v10116_v43 = vunpack.i.h.bf16 %v6744_v19 }
 0x2b4   :  { %2087 = vmatpush.msra.mxu2 %v1425_v44  ;;  %v1424_v62 = vsel %vm263_vm1, %v10109_v27, %v4491_v13  ;;  %v4482_v44 = vunpack.i.h.bf16 %v6198_v1  ;;  %v1307_v27 = vsel %vm232_vm0, %v10110_v55, %v4602_v16  ;;  %v4760_v9 = vpop.permute.xlu0 %4759  ;;  %v1306_v55 = vsel %vm232_vm0, %v10112_v61, %v4601_v29  ;;  %v7062_v61 = vpop.permute.xlu2 %4809 }
 0x2b5   :  { %2170 = vmatpush.msrb.mxu1 %v1541_v54  ;;  %v4762_v50 = vunpack.i.h.bf16 %v4760_v9  ;;  %v4761_v45 = vunpack.i.l.bf16 %v4760_v9  ;;  %v10117_v20 = vunpack.i.l.bf16 %v6744_v19  ;;  %v10120_v19 = vunpack.i.l.bf16 %v6177_v59  ;;  %v7107_v59 = vld [vmem:[#allocation9 + $0x38] sm:$0xff] }
 0x2b6   :  { %2088 = vmatpush.msra.mxu2 %v1424_v62  ;;  %v7040_v62 = vld [vmem:[#allocation9 + $0x20] sm:$0xff]  ;;  %v1305_v9 = vsel %vm232_vm0, %v10114_v23, %v4482_v44 }
 0x2b7   :  { %1987 = vmatmul.f32.gmra.mxu2 %v6570_v48  ;;  %v7042_v48 = vpop.permute.xlu1 %4814  ;;  %2171 = vmatpush.msrb.mxu1 %v1540_v25  ;;  %v7069_v31 = vsel %vm294_vm3, %v10116_v43, %v4762_v50  ;;  %v7075_v54 = vsel %vm294_vm3, %v10117_v20, %v4761_v45  ;;  %v10119_v25 = vunpack.i.l.bf16 %v6153_v5  ;;  %v10121_v43 = vunpack.i.l.bf16 %v6527_v8 }
 0x2b8   :  { %2089 = vmatpush.msra.mxu2 %v1307_v27  ;;  %v10115_v27 = vunpack.i.h.bf16 %v6527_v8 }
 0x2b9   :  { %v7087_v23 = vsel %vm294_vm3, %v4761_v45, %v10119_v25 }
 0x2ba   :  { %2090 = vmatpush.msra.mxu2 %v1306_v55  ;;  %v1423_v28 = vsel %vm263_vm1, %v4612_v47, %v10115_v27  ;;  %2013 = vmatmul.f32.gmra.mxu3 %v7040_v62  ;;  %v10118_v55 = vunpack.i.h.bf16 %v6153_v5  ;;  %v1304_v27 = vsel %vm232_vm0, %v10120_v19, %v4481_v41  ;;  %v10122_v5 = vunpack.i.h.bf16 %v6250_v38 }
 0x2bb   :  { %2172 = vmatpush.msrb.mxu1 %v1423_v28  ;;  %v4782_v28 = vunpack.i.h.bf16 %v6671_v3  ;;  %v4777_v19 = vunpack.i.h.bf16 %v6856_v53 }
 0x2bc   :  { %v7081_v47 = vsel %vm294_vm3, %v4762_v50, %v10118_v55  ;;  %2091 = vmatpush.msra.mxu2 %v1305_v9  ;;  %v1422_v50 = vsel %vm263_vm1, %v4611_v37, %v10121_v43  ;;  %v1421_v45 = vsel %vm263_vm1, %v4492_v26, %v10122_v5  ;;  %v7104_v9 = vpop.permute.xlu0 %4769  ;;  %v9823_v43 = vunpack.i.h.bf16 %v6644_v12  ;;  %v7139_v5 = vpop.permute.xlu2 %4824 }
 0x2bd   :  { %2173 = vmatpush.msrb.mxu1 %v1422_v50  ;;  %v9825_v37 = vunpack.i.h.bf16 %v7104_v9  ;;  %v9824_v20 = vunpack.i.l.bf16 %v7104_v9  ;;  %v4776_v50 = vunpack.i.l.bf16 %v6856_v53 }
 0x2be   :  { %2092 = vmatpush.msra.mxu2 %v1304_v27  ;;  %v1669_v53 = vsel %vm325_vm2, %v9823_v43, %v4777_v19  ;;  %v10138_v43 = vld [vmem:[#allocation51_spill] sm:$0xff] }
 0x2bf   :  { %1990 = vmatmul.f32.gmra.mxu2 %v6597_v2  ;;  %2174 = vmatpush.msrb.mxu1 %v1421_v45  ;;  %v7112_v55 = vpop.permute.xlu1 %4819  ;;  %v10123_v2 = vunpack.i.l.bf16 %v6250_v38  ;;  %v1671_v38 = vsel %vm325_vm2, %v9825_v37, %v4782_v28 }
 0x2c0   :  { %2093 = vmatpush.msra.mxu2 %v6075_v30  ;;  %v4822_v25 = vunpack.i.h.bf16 %v7112_v55  ;;  %v4781_v30 = vunpack.i.l.bf16 %v6671_v3  ;;  %v9830_v27 = vunpack.i.l.bf16 %v7112_v55  ;;  %2035 = vmatpush.msra.mxu0 %v1671_v38 }
 0x2c1   :  { %v1420_v26 = vsel %vm263_vm1, %v4491_v13, %v10123_v2  ;;  %v10124_v13 = vunpack.i.h.bf16 %v6477_v46 }
 0x2c2   :  { %2094 = vmatpush.msra.mxu2 %v6072_v51  ;;  %2175 = vmatpush.msrb.mxu1 %v1420_v26  ;;  %v1667_v3 = vsel %vm325_vm2, %v4782_v28, %v4822_v25  ;;  %v9822_v28 = vunpack.i.l.bf16 %v6644_v12  ;;  %v7168_v26 = vld [vmem:[#allocation9 + $0x50] sm:$0xff] }
 0x2c3   :  { %2016 = vmatmul.f32.gmra.mxu3 %v7107_v59  ;;  %v1303_v51 = vsel %vm232_vm0, %v4602_v16, %v10124_v13  ;;  %v10125_v16 = vunpack.i.l.bf16 %v6477_v46  ;;  %v10126_v46 = vunpack.i.h.bf16 %v6238_v35 }
 0x2c4   :  { %2095 = vmatpush.msra.mxu2 %v5901_v63  ;;  %2176 = vmatpush.msrb.mxu1 %v1303_v51  ;;  %v1670_v63 = vsel %vm325_vm2, %v9824_v20, %v4781_v30  ;;  %v7160_v2 = vpop.permute.xlu0 %4784  ;;  %v7176_v51 = vld [vmem:[#allocation9 + $0x10] sm:$0xff]  ;;  %v4582_v20 = vunpack.i.h.bf16 %v10138_v43 }
 0x2c5   :  { %2122 = vmatpush.msra.mxu3 %v1667_v3  ;;  %2036 = vmatpush.msra.mxu0 %v1670_v63  ;;  %v1302_v45 = vsel %vm232_vm0, %v4601_v29, %v10125_v16  ;;  %v1301_v29 = vsel %vm232_vm0, %v4482_v44, %v10126_v46  ;;  %v9829_v38 = vunpack.i.h.bf16 %v7160_v2  ;;  %v9827_v13 = vunpack.i.l.bf16 %v7160_v2 }
 0x2c6   :  { %2096 = vmatpush.msra.mxu2 %v5894_v57  ;;  %2177 = vmatpush.msrb.mxu1 %v1302_v45  ;;  %v1666_v57 = vsel %vm325_vm2, %v4781_v30, %v9830_v27  ;;  %v1668_v30 = vsel %vm325_vm2, %v9822_v28, %v4776_v50  ;;  %v4592_v3 = vunpack.i.h.bf16 %v6248_v21  ;;  %v10127_v44 = vunpack.i.l.bf16 %v6238_v35  ;;  %v10129_v35 = vld [vmem:[#allocation60_spill] sm:$0xff]  ;;  %v10137_v28 = vld [vmem:[#allocation18_spill] sm:$0xff] }
 0x2c7   :  { %2097 = vmatmul.f32.vlgmr.msra.gmra.mxu2 %v6988_v7  ;;  %2037 = vmatpush.msra.mxu0 %v1669_v53  ;;  %v9826_v16 = vunpack.i.h.bf16 %v6413_v39  ;;  %v1665_v45 = vsel %vm325_vm2, %v4777_v19, %v9829_v38  ;;  %v10128_v53 = vld [vmem:[#allocation41_spill] sm:$0xff]  ;;  %v4591_v46 = vunpack.i.l.bf16 %v6248_v21  ;;  %v10130_v1 = vunpack.i.h.bf16 %v10129_v35 }
 0x2c8   :  { %2123 = vmatpush.msra.mxu3 %v1666_v57  ;;  %2178 = vmatpush.msrb.mxu1 %v1301_v29  ;;  %v1300_v63 = vsel %vm232_vm0, %v4481_v41, %v10127_v44  ;;  %v4472_v57 = vunpack.i.h.bf16 %v10128_v53  ;;  %v9828_v29 = vunpack.i.l.bf16 %v6413_v39  ;;  %v1664_v19 = vsel %vm325_vm2, %v4776_v50, %v9827_v13  ;;  %v10134_v50 = vld [vmem:[#allocation39_spill] sm:$0xff]  ;;  %v10140_v13 = vld [vmem:[#allocation17_spill] sm:$0xff] }
 0x2c9   :  { %2038 = vmatpush.msra.mxu0 %v1668_v30  ;;  %v1139_v41 = vsel %vm189_vm4, %v10130_v1, %v4592_v3  ;;  %v10131_v30 = vld [vmem:[#allocation20_spill] sm:$0xff]  ;;  %v4471_v21 = vunpack.i.l.bf16 %v10128_v53  ;;  %v10132_v44 = vunpack.i.l.bf16 %v10129_v35  ;;  %v7210_v1 = vpop.permute.xlu2 %4839  ;;  %v10135_v53 = vunpack.i.h.bf16 %v10134_v50 }
 0x2ca   :  { %2179 = vmatpush.msrb.mxu1 %v1300_v63  ;;  %4203 = vmatmul.msk.f32.vlgmr.msra.gmra.mxu0 %vm1952_vm9, %v7176_v51  ;;  %v9831_v37 = vunpack.i.h.bf16 %v7210_v1  ;;  %v9835_v27 = vunpack.i.l.bf16 %v7210_v1 }
 0x2cb   :  { %2019 = vmatmul.f32.gmra.mxu3 %v7168_v26  ;;  %2139 = vmatpush.msrb.mxu0 %v1139_v41  ;;  %v1138_v63 = vsel %vm189_vm4, %v10132_v44, %v4591_v46  ;;  %v1135_v41 = vsel %vm189_vm4, %v4592_v3, %v9826_v16  ;;  %v1137_v35 = vsel %vm189_vm4, %v10135_v53, %v4472_v57 }
 0x2cc   :  { %2124 = vmatpush.msra.mxu3 %v1665_v45  ;;  %2180 = vmatpush.msrb.mxu1 %v10131_v30  ;;  %v10133_v45 = vld [vmem:[#allocation19_spill] sm:$0xff]  ;;  %v4830_v30 = vpop.permute.xlu0 %4829  ;;  %v1134_v3 = vsel %vm189_vm4, %v4591_v46, %v9828_v29  ;;  %v4581_v29 = vunpack.i.l.bf16 %v10138_v43 }
 0x2cd   :  { %2140 = vmatpush.msrb.mxu0 %v1138_v63  ;;  %v4832_v63 = vunpack.i.h.bf16 %v4830_v30  ;;  %v4831_v16 = vunpack.i.l.bf16 %v4830_v30 }
 0x2ce   :  { %2125 = vmatpush.msra.mxu3 %v1664_v19  ;;  %2181 = vmatpush.msrb.mxu1 %v10133_v45  ;;  %v10136_v19 = vld [vmem:[#allocation50_spill] sm:$0xff]  ;;  %v7228_v45 = vld [vmem:[#allocation9 + $0x28] sm:$0xff] }
 0x2cf   :  { %2100 = vmatmul.f32.gmra.mxu2 %v7040_v62  ;;  %v9832_v44 = vunpack.i.h.bf16 %v10136_v19  ;;  %2141 = vmatpush.msrb.mxu0 %v1137_v35  ;;  %v9837_v35 = vunpack.i.l.bf16 %v10136_v19  ;;  %v1663_v46 = vsel %vm325_vm2, %v4822_v25, %v4832_v63 }
 0x2d0   :  { %2226 = vmatpush.msrb.mxu3 %v1135_v41  ;;  %2182 = vmatpush.msrb.mxu1 %v10137_v28  ;;  %v10139_v41 = vunpack.i.l.bf16 %v10134_v50  ;;  %v7237_v28 = vpop.permute.xlu1 %4834  ;;  %v10141_v50 = vld [vmem:[#allocation57_spill] sm:$0xff] }
 0x2d1   :  { %v1133_v38 = vsel %vm189_vm4, %v4472_v57, %v9832_v44  ;;  %2209 = vmatpush.msrb.mxu2 %v1663_v46  ;;  %v1132_v57 = vsel %vm189_vm4, %v4471_v21, %v9837_v35  ;;  %v10146_v44 = vunpack.i.l.bf16 %v7112_v55  ;;  %v4827_v46 = vunpack.i.h.bf16 %v7139_v5 }
 0x2d2   :  { %v1136_v53 = vsel %vm189_vm4, %v10139_v41, %v4471_v21  ;;  %2227 = vmatpush.msrb.mxu3 %v1134_v3  ;;  %2183 = vmatpush.msrb.mxu1 %v10140_v13  ;;  %v10142_v3 = vunpack.i.h.bf16 %v10141_v50  ;;  %v1659_v13 = vsel %vm325_vm2, %v4832_v63, %v9831_v37  ;;  %v10143_v41 = vld [vmem:[#allocation36_spill] sm:$0xff]  ;;  %v10145_v63 = vunpack.i.l.bf16 %v10141_v50  ;;  %v10147_v21 = vld [vmem:[#allocation33_spill] sm:$0xff] }
 0x2d3   :  { %2142 = vmatpush.msrb.mxu0 %v1136_v53  ;;  %4207 = vmatmul.msk.f32.vlgmr.msra.gmra.mxu3 %vm1952_vm9, %v7176_v51  ;;  %v4462_v25 = vunpack.i.h.bf16 %v10143_v41  ;;  %v10144_v53 = vld [vmem:[#allocation63_spill] sm:$0xff]  ;;  %v9833_v50 = vunpack.i.l.bf16 %v7237_v28 }
 0x2d4   :  { %4204 = vmatmul.msk.f32.gmra.mxu0 %vm1952_vm9, %v7228_v45  ;;  %v1019_v30 = vsel %vm158_vm5, %v10142_v3, %v4582_v20  ;;  %2184 = vmatmul.f32.vlgmr.msrb.gmra.mxu1 %v6988_v7  ;;  %v9834_v3 = vunpack.i.h.bf16 %v7237_v28  ;;  %v1018_v37 = vsel %vm158_vm5, %v10145_v63, %v4581_v29  ;;  %v9836_v43 = vunpack.i.l.bf16 %v10144_v53 }
 0x2d5   :  { %2143 = vmatpush.msrb.mxu0 %v1019_v30  ;;  %2228 = vmatpush.msrb.mxu3 %v1133_v38  ;;  %v4461_v30 = vunpack.i.l.bf16 %v10143_v41  ;;  %v1662_v38 = vsel %vm325_vm2, %v10146_v44, %v4831_v16  ;;  %v10149_v44 = vunpack.i.h.bf16 %v10144_v53  ;;  %v4826_v63 = vunpack.i.l.bf16 %v7139_v5 }
 0x2d6   :  { %2296 = vmatpush.msra.mxu1 %v1659_v13  ;;  %2210 = vmatpush.msrb.mxu2 %v1662_v38  ;;  %v10148_v13 = vunpack.i.h.bf16 %v10147_v21  ;;  %v1657_v38 = vsel %vm325_vm2, %v4827_v46, %v9834_v3  ;;  %v10161_v3 = vunpack.i.h.bf16 %v6413_v39 }
 0x2d7   :  { %2144 = vmatpush.msrb.mxu0 %v1018_v37  ;;  %2229 = vmatpush.msrb.mxu3 %v1132_v57  ;;  %v1658_v37 = vsel %vm325_vm2, %v4831_v16, %v9835_v27  ;;  %v1015_v41 = vsel %vm158_vm5, %v4582_v20, %v10149_v44  ;;  %v10150_v57 = vunpack.i.h.bf16 %v7160_v2  ;;  %v10152_v20 = vunpack.i.l.bf16 %v10147_v21  ;;  %v7313_v44 = vld [vmem:[#allocation9 + $0x40] sm:$0xff] }
 0x2d8   :  { %2297 = vmatpush.msra.mxu1 %v1658_v37  ;;  %2103 = vmatmul.f32.gmra.mxu2 %v7107_v59  ;;  %v1017_v55 = vsel %vm158_vm5, %v10148_v13, %v4462_v25  ;;  %v10151_v37 = vld [vmem:[#allocation48_spill] sm:$0xff]  ;;  %v1656_v21 = vsel %vm325_vm2, %v4826_v63, %v9833_v50 }
 0x2d9   :  { %2145 = vmatpush.msrb.mxu0 %v1017_v55  ;;  %2230 = vmatpush.msrb.mxu3 %v1015_v41  ;;  %v1661_v16 = vsel %vm325_vm2, %v10150_v57, %v4827_v46  ;;  %v9838_v13 = vunpack.i.h.bf16 %v10151_v37  ;;  %v1016_v5 = vsel %vm158_vm5, %v10152_v20, %v4461_v30  ;;  %v1014_v55 = vsel %vm158_vm5, %v4581_v29, %v9836_v43  ;;  %v10153_v41 = vld [vmem:[#allocation49_spill] sm:$0xff] }
 0x2da   :  { %2211 = vmatpush.msrb.mxu2 %v1661_v16  ;;  %2298 = vmatpush.msra.mxu1 %v1657_v38  ;;  %v4572_v57 = vunpack.i.h.bf16 %v10153_v41  ;;  %v10154_v46 = vunpack.i.l.bf16 %v7160_v2  ;;  %v9840_v38 = vunpack.i.l.bf16 %v10151_v37  ;;  %v4571_v29 = vunpack.i.l.bf16 %v10153_v41  ;;  %v10155_v2 = vld [vmem:[#allocation54_spill] sm:$0xff] }
 0x2db   :  { %2146 = vmatpush.msrb.mxu0 %v1016_v5  ;;  %2231 = vmatpush.msrb.mxu3 %v1014_v55  ;;  %v10156_v20 = vunpack.i.h.bf16 %v10155_v2  ;;  %v10157_v55 = vld [vmem:[#allocation32_spill] sm:$0xff]  ;;  %v1013_v41 = vsel %vm158_vm5, %v4462_v25, %v9838_v13  ;;  %v10164_v13 = vld [vmem:[#allocation79_spill] sm:$0xff] }
 0x2dc   :  { %v1660_v16 = vsel %vm325_vm2, %v10154_v46, %v4826_v63  ;;  %2299 = vmatpush.msra.mxu1 %v1656_v21  ;;  %4205 = vmatmul.msk.f32.gmra.mxu0 %vm1952_vm9, %v7313_v44  ;;  %v4452_v46 = vunpack.i.h.bf16 %v10157_v55  ;;  %v10158_v63 = vld [vmem:[#allocation61_spill] sm:$0xff]  ;;  %v4451_v50 = vunpack.i.l.bf16 %v10157_v55  ;;  %v10167_v55 = vld [vmem:[#allocation80_spill] sm:$0xff] }
 0x2dd   :  { %2212 = vmatpush.msrb.mxu2 %v1660_v16  ;;  %4208 = vmatmul.msk.f32.gmra.mxu3 %vm1952_vm9, %v7228_v45  ;;  %v899_v5 = vsel %vm127_vm6, %v10156_v20, %v4572_v57  ;;  %v10159_v16 = vld [vmem:[#allocation74_spill] sm:$0xff]  ;;  %v10162_v20 = vld [vmem:[#allocation64_spill] sm:$0xff]  ;;  %v9839_v25 = vunpack.i.l.bf16 %v10158_v63 }
 0x2de   :  { %2147 = vmatpush.msrb.mxu0 %v899_v5  ;;  %2187 = vmatmul.f32.gmra.mxu1 %v7040_v62  ;;  %v10160_v21 = vunpack.i.h.bf16 %v10159_v16  ;;  %v4652_v43 = vunpack.i.h.bf16 %v10162_v20  ;;  %v10163_v5 = vunpack.i.l.bf16 %v10155_v2 }
 0x2df   :  { %2232 = vmatpush.msrb.mxu3 %v1013_v41  ;;  %2400 = vmatpush.msrb.mxu1 %v10164_v13  ;;  %v10165_v41 = vunpack.i.l.bf16 %v10159_v16  ;;  %v10170_v16 = vunpack.i.h.bf16 %v10158_v63 }
 0x2e0   :  { %v1131_v27 = vsel %vm189_vm4, %v10161_v3, %v10160_v21  ;;  %v898_v35 = vsel %vm127_vm6, %v10163_v5, %v4571_v29  ;;  %v1012_v3 = vsel %vm158_vm5, %v4461_v30, %v9840_v38  ;;  %v4651_v21 = vunpack.i.l.bf16 %v10162_v20  ;;  %2106 = vmatmul.f32.gmra.mxu2 %v7168_v26 }
 0x2e1   :  { %2313 = vmatpush.msra.mxu2 %v1131_v27  ;;  %2148 = vmatpush.msrb.mxu0 %v898_v35  ;;  %v10166_v27 = vunpack.i.l.bf16 %v6413_v39  ;;  %v10168_v35 = vld [vmem:[#allocation31_spill] sm:$0xff]  ;;  %v895_v39 = vsel %vm127_vm6, %v4572_v57, %v10170_v16  ;;  %v10171_v20 = vunpack.i.h.bf16 %v10136_v19 }
 0x2e2   :  { %2233 = vmatpush.msrb.mxu3 %v1012_v3  ;;  %2401 = vmatpush.msrb.mxu1 %v10167_v55  ;;  %v10169_v13 = vunpack.i.h.bf16 %v10168_v35  ;;  %v10172_v3 = vunpack.i.h.bf16 %v6638_v49  ;;  %v10174_v55 = vunpack.i.l.bf16 %v10168_v35  ;;  %v10175_v16 = vld [vmem:[#allocation47_spill] sm:$0xff]  ;;  %v10177_v35 = vunpack.i.l.bf16 %v6638_v49 }
 0x2e3   :  { %v1130_v2 = vsel %vm189_vm4, %v10166_v27, %v10165_v41  ;;  %v1129_v5 = vsel %vm189_vm4, %v10171_v20, %v4652_v43  ;;  %v10173_v27 = vld [vmem:[#allocation46_spill] sm:$0xff] }
 0x2e4   :  { %2314 = vmatpush.msra.mxu2 %v1130_v2  ;;  %v897_v30 = vsel %vm127_vm6, %v10169_v13, %v4452_v46  ;;  %2234 = vmatpush.msrb.mxu3 %v895_v39  ;;  %v1125_v41 = vsel %vm189_vm4, %v4652_v43, %v10172_v3  ;;  %v9841_v2 = vunpack.i.h.bf16 %v10173_v27  ;;  %v896_v57 = vsel %vm127_vm6, %v10174_v55, %v4451_v50 }
 0x2e5   :  { %2149 = vmatpush.msrb.mxu0 %v897_v30  ;;  %2402 = vmatpush.msrb.mxu1 %v1125_v41  ;;  %v894_v13 = vsel %vm127_vm6, %v4571_v29, %v9839_v25  ;;  %v7393_v30 = vld [vmem:[#allocation9 + $0x58] sm:$0xff]  ;;  %v4562_v39 = vunpack.i.h.bf16 %v10175_v16  ;;  %v10176_v43 = vunpack.i.l.bf16 %v10136_v19  ;;  %v4456_v3 = vunpack.i.l.bf16 %v10173_v27  ;;  %v10178_v29 = vld [vmem:[#allocation30_spill] sm:$0xff]  ;;  %v10179_v19 = vld [vmem:[#allocation52_spill] sm:$0xff] }
 0x2e6   :  { %2315 = vmatpush.msra.mxu2 %v1129_v5  ;;  %2235 = vmatpush.msrb.mxu3 %v894_v13  ;;  %v1124_v5 = vsel %vm189_vm4, %v4651_v21, %v10177_v35  ;;  %v4442_v41 = vunpack.i.h.bf16 %v10178_v29  ;;  %v4561_v55 = vunpack.i.l.bf16 %v10175_v16  ;;  %v893_v16 = vsel %vm127_vm6, %v4452_v46, %v9841_v2  ;;  %v10185_v25 = vld [vmem:[#allocation62_spill] sm:$0xff]  ;;  %v10187_v2 = vld [vmem:[#allocation77_spill] sm:$0xff] }
 0x2e7   :  { %2150 = vmatpush.msrb.mxu0 %v896_v57  ;;  %v1128_v20 = vsel %vm189_vm4, %v10176_v43, %v4651_v21  ;;  %2403 = vmatpush.msrb.mxu1 %v1124_v5  ;;  %v10180_v57 = vunpack.i.h.bf16 %v10179_v19  ;;  %v10181_v21 = vld [vmem:[#allocation58_spill] sm:$0xff]  ;;  %v10182_v43 = vld [vmem:[#allocation71_spill] sm:$0xff]  ;;  %v10184_v35 = vunpack.i.h.bf16 %v10144_v53  ;;  %v4642_v38 = vunpack.i.h.bf16 %v10185_v25 }
 0x2e8   :  { %2316 = vmatpush.msra.mxu2 %v1128_v20  ;;  %4206 = vmatmul.msk.f32.gmra.mxu0 %vm1952_vm9, %v7393_v30  ;;  %v10183_v20 = vunpack.i.h.bf16 %v10182_v43  ;;  %v4441_v13 = vunpack.i.l.bf16 %v10178_v29  ;;  %v4566_v46 = vunpack.i.l.bf16 %v10181_v21  ;;  %v10190_v29 = vld [vmem:[#allocation29_spill] sm:$0xff] }
 0x2e9   :  { %4209 = vmatmul.msk.f32.gmra.mxu3 %vm1952_vm9, %v7313_v44  ;;  %v779_v49 = vsel %vm96_vm7, %v10180_v57, %v4562_v39  ;;  %2190 = vmatmul.f32.gmra.mxu1 %v7107_v59  ;;  %v10186_v57 = vunpack.i.l.bf16 %v10179_v19 }
 0x2ea   :  { %2151 = vmatpush.msrb.mxu0 %v779_v49  ;;  %v1011_v5 = vsel %vm158_vm5, %v10184_v35, %v10183_v20  ;;  %2236 = vmatpush.msrb.mxu3 %v893_v16  ;;  %v892_v20 = vsel %vm127_vm6, %v4451_v50, %v4456_v3  ;;  %v10188_v16 = vunpack.i.l.bf16 %v10182_v43  ;;  %v10189_v35 = vunpack.i.l.bf16 %v10144_v53 }
 0x2eb   :  { %2317 = vmatpush.msra.mxu2 %v1011_v5  ;;  %v778_v49 = vsel %vm96_vm7, %v10186_v57, %v4561_v55  ;;  %2404 = vmatpush.msrb.mxu1 %v10187_v2  ;;  %v4641_v5 = vunpack.i.l.bf16 %v10185_v25  ;;  %v10191_v57 = vunpack.i.h.bf16 %v10190_v29  ;;  %v10193_v50 = vunpack.i.h.bf16 %v10181_v21 }
 0x2ec   :  { %2152 = vmatpush.msrb.mxu0 %v778_v49  ;;  %v1010_v19 = vsel %vm158_vm5, %v10189_v35, %v10188_v16  ;;  %2237 = vmatpush.msrb.mxu3 %v892_v20  ;;  %v10192_v49 = vld [vmem:[#allocation78_spill] sm:$0xff]  ;;  %v10194_v25 = vunpack.i.h.bf16 %v10151_v37  ;;  %v10195_v20 = vunpack.i.h.bf16 %v6612_v17  ;;  %v10196_v35 = vld [vmem:[#allocation44_spill] sm:$0xff] }
 0x2ed   :  { %2318 = vmatpush.msra.mxu2 %v1010_v19  ;;  %v777_v2 = vsel %vm96_vm7, %v10191_v57, %v4442_v41  ;;  %2405 = vmatpush.msrb.mxu1 %v10192_v49  ;;  %v775_v53 = vsel %vm96_vm7, %v4562_v39, %v10193_v50  ;;  %v4447_v19 = vunpack.i.h.bf16 %v10196_v35  ;;  %v4812_v57 = vunpack.i.h.bf16 %v7062_v61 }
 0x2ee   :  { %2153 = vmatpush.msrb.mxu0 %v777_v2  ;;  %4211 = vmatmul.msk.f32.vlgmr.msrb.gmra.mxu2 %vm1952_vm9, %v7176_v51  ;;  %v1009_v43 = vsel %vm158_vm5, %v10194_v25, %v4642_v38  ;;  %v1005_v16 = vsel %vm158_vm5, %v4642_v38, %v10195_v20  ;;  %v10197_v39 = vunpack.i.l.bf16 %v10190_v29  ;;  %v774_v49 = vsel %vm96_vm7, %v4561_v55, %v4566_v46 }
 0x2ef   :  { %2238 = vmatpush.msrb.mxu3 %v775_v53  ;;  %2319 = vmatpush.msra.mxu2 %v1009_v43  ;;  %v10198_v38 = vunpack.i.l.bf16 %v10151_v37  ;;  %v10199_v53 = vunpack.i.l.bf16 %v6612_v17  ;;  %v4446_v25 = vunpack.i.l.bf16 %v10196_v35  ;;  %v10200_v43 = vunpack.i.h.bf16 %v6985_v4  ;;  %v7615_v35 = vld [vmem:[#allocation9 + $0x30] sm:$0xff] }
 0x2f0   :  { %2406 = vmatpush.msrb.mxu1 %v1005_v16  ;;  %v776_v2 = vsel %vm96_vm7, %v10197_v39, %v4441_v13  ;;  %v4811_v20 = vunpack.i.l.bf16 %v7062_v61  ;;  %v4817_v17 = vunpack.i.h.bf16 %v7042_v48  ;;  %v773_v37 = vsel %vm96_vm7, %v4442_v41, %v4447_v19 }
 0x2f1   :  { %2154 = vmatpush.msrb.mxu0 %v776_v2  ;;  %2239 = vmatpush.msrb.mxu3 %v774_v49  ;;  %v1008_v50 = vsel %vm158_vm5, %v10198_v38, %v4641_v5  ;;  %v1004_v29 = vsel %vm158_vm5, %v4641_v5, %v10199_v53  ;;  %v1539_v55 = vsel %vm294_vm3, %v10200_v43, %v4812_v57  ;;  %v10201_v5 = vld [vmem:[#allocation68_spill] sm:$0xff]  ;;  %v10203_v39 = vunpack.i.h.bf16 %v10158_v63  ;;  %v10204_v2 = vld [vmem:[#allocation59_spill] sm:$0xff] }
 0x2f2   :  { %2320 = vmatpush.msra.mxu2 %v1008_v50  ;;  %2407 = vmatpush.msrb.mxu1 %v1004_v29  ;;  %v10202_v16 = vunpack.i.h.bf16 %v10201_v5  ;;  %v4632_v49 = vunpack.i.h.bf16 %v10204_v2  ;;  %v4816_v50 = vunpack.i.l.bf16 %v7042_v48  ;;  %v10206_v53 = vld [vmem:[#allocation75_spill] sm:$0xff]  ;;  %v772_v41 = vsel %vm96_vm7, %v4441_v13, %v4446_v25 }
 0x2f3   :  { %2255 = vmatpush.msra.mxu0 %v1539_v55  ;;  %4210 = vmatmul.msk.f32.gmra.mxu3 %vm1952_vm9, %v7393_v30  ;;  %v10207_v29 = vunpack.i.l.bf16 %v10201_v5  ;;  %v10208_v43 = vunpack.i.l.bf16 %v10158_v63  ;;  %v4631_v55 = vunpack.i.l.bf16 %v10204_v2  ;;  %v1535_v13 = vsel %vm294_vm3, %v4812_v57, %v4817_v17  ;;  %v10231_v48 = vld [vmem:[#allocation55_spill] sm:$0xff] }
 0x2f4   :  { %2155 = vmatmul.f32.vlgmr.msrb.gmra.mxu0 %v6494_v34  ;;  %2193 = vmatmul.f32.gmra.mxu1 %v7168_v26  ;;  %v891_v61 = vsel %vm127_vm6, %v10203_v39, %v10202_v16  ;;  %v10205_v34 = vunpack.i.l.bf16 %v6985_v4  ;;  %v10209_v16 = vld [vmem:[#allocation76_spill] sm:$0xff]  ;;  %v10210_v63 = vunpack.i.h.bf16 %v10173_v27  ;;  %v7558_v27 = vld [vmem:[#allocation9 + $0x18] sm:$0xff] }
 0x2f5   :  { %2240 = vmatpush.msrb.mxu3 %v773_v37  ;;  %2321 = vmatpush.msra.mxu2 %v891_v61  ;;  %v890_v4 = vsel %vm127_vm6, %v10208_v43, %v10207_v29  ;;  %v4802_v37 = vunpack.i.h.bf16 %v6858_v15  ;;  %v10211_v15 = vunpack.i.h.bf16 %v6591_v60  ;;  %v888_v57 = vsel %vm127_vm6, %v4456_v3, %v4631_v55  ;;  %v10214_v3 = vld [vmem:[#allocation65_spill] sm:$0xff] }
 0x2f6   :  { %v1538_v38 = vsel %vm294_vm3, %v10205_v34, %v4811_v20  ;;  %2408 = vmatpush.msrb.mxu1 %v10206_v53  ;;  %4212 = vmatmul.msk.f32.gmra.mxu2 %vm1952_vm9, %v7228_v45  ;;  %v889_v5 = vsel %vm127_vm6, %v10210_v63, %v4632_v49  ;;  %v10212_v61 = vunpack.i.l.bf16 %v6591_v60  ;;  %v7561_v60 = vld [vmem:[#allocation9] sm:$0xff]  ;;  %v10215_v34 = vunpack.i.h.bf16 %v10214_v3 }
 0x2f7   :  { %2256 = vmatpush.msra.mxu0 %v1538_v38  ;;  %2241 = vmatpush.msrb.mxu3 %v772_v41  ;;  %v885_v39 = vsel %vm127_vm6, %v4632_v49, %v10211_v15  ;;  %v10213_v49 = vunpack.i.h.bf16 %v6527_v8  ;;  %v10216_v8 = vunpack.i.h.bf16 %v10181_v21  ;;  %v10217_v53 = vld [vmem:[#allocation56_spill] sm:$0xff]  ;;  %v10219_v29 = vunpack.i.l.bf16 %v10214_v3 }
 0x2f8   :  { %2322 = vmatpush.msra.mxu2 %v890_v4  ;;  %2409 = vmatpush.msrb.mxu1 %v10209_v16  ;;  %v884_v2 = vsel %vm127_vm6, %v4631_v55, %v10212_v61  ;;  %v4622_v41 = vunpack.i.h.bf16 %v10217_v53  ;;  %v4621_v4 = vunpack.i.l.bf16 %v10217_v53  ;;  %v10220_v55 = vld [vmem:[#allocation73_spill] sm:$0xff]  ;;  %v10222_v21 = vunpack.i.h.bf16 %v6562_v10  ;;  %v10237_v61 = vld [vmem:[#allocation84_spill] sm:$0xff] }
 0x2f9   :  { %2257 = vmatpush.msra.mxu0 %v6788_v52  ;;  %2342 = vmatpush.msra.mxu3 %v1535_v13  ;;  %v1534_v52 = vsel %vm294_vm3, %v4811_v20, %v4816_v50  ;;  %v1419_v20 = vsel %vm263_vm1, %v10213_v49, %v4802_v37  ;;  %v771_v38 = vsel %vm96_vm7, %v10216_v8, %v10215_v34  ;;  %v10221_v16 = vld [vmem:[#allocation69_spill] sm:$0xff]  ;;  %v10224_v63 = vunpack.i.l.bf16 %v6562_v10  ;;  %v10239_v49 = vld [vmem:[#allocation34_spill] sm:$0xff]  ;;  %v4845_v34 = vpop.permute.xlu0 %4844  ;;  %v10242_v8 = vld [vmem:[#allocation43_spill] sm:$0xff] }
 0x2fa   :  { %2323 = vmatpush.msra.mxu2 %v889_v5  ;;  %2410 = vmatpush.msrb.mxu1 %v885_v39  ;;  %v770_v43 = vsel %vm96_vm7, %v4566_v46, %v10219_v29  ;;  %v10223_v46 = vld [vmem:[#allocation70_spill] sm:$0xff]  ;;  %v10225_v5 = vld [vmem:[#allocation81_spill] sm:$0xff]  ;;  %v10236_v39 = vunpack.i.l.bf16 %v6993_v11  ;;  %v10244_v53 = vunpack.i.l.bf16 %v10239_v49 }
 0x2fb   :  { %2258 = vmatpush.msra.mxu0 %v6796_v24  ;;  %2343 = vmatpush.msra.mxu3 %v1534_v52  ;;  %v4807_v24 = vunpack.i.h.bf16 %v6993_v11  ;;  %v10226_v15 = vunpack.i.h.bf16 %v10225_v5  ;;  %v10227_v10 = vunpack.i.l.bf16 %v10225_v5  ;;  %v10246_v29 = vld [vmem:[#allocation42_spill] sm:$0xff] }
 0x2fc   :  { %2324 = vmatpush.msra.mxu2 %v888_v57  ;;  %2411 = vmatpush.msrb.mxu1 %v884_v2  ;;  %v10238_v2 = vld [vmem:[#allocation23_spill] sm:$0xff] }
 0x2fd   :  { %2259 = vmatpush.msra.mxu0 %v1419_v20  ;;  %2344 = vmatpush.msra.mxu3 %v7069_v31  ;;  %v10218_v31 = vld [vmem:[#allocation72_spill] sm:$0xff]  ;;  %v1415_v13 = vsel %vm263_vm1, %v4802_v37, %v4807_v24  ;;  %v768_v37 = vsel %vm96_vm7, %v4446_v25, %v4621_v4  ;;  %v10232_v25 = vunpack.i.h.bf16 %v10231_v48  ;;  %v10240_v20 = vunpack.i.h.bf16 %v10239_v49 }
 0x2fe   :  { %2158 = vmatmul.f32.gmra.mxu0 %v7558_v27  ;;  %2242 = vmatmul.f32.vlgmr.msrb.gmra.mxu3 %v7561_v60 }
 0x2ff   :  { %4215 = vmatmul.msk.f32.vlgmr.msra.gmra.mxu1 %vm1952_vm9, %v7176_v51  ;;  %2325 = vmatpush.msra.mxu2 %v771_v38  ;;  %v10243_v38 = vld [vmem:[#allocation22_spill] sm:$0xff] }
 0x300   :  { %2412 = vmatpush.msrb.mxu1 %v10218_v31  ;;  %2260 = vmatpush.msra.mxu0 %v6919_v33  ;;  %v769_v33 = vsel %vm96_vm7, %v4447_v19, %v4622_v41  ;;  %v764_v19 = vsel %vm96_vm7, %v4621_v4, %v10224_v63 }
 0x301   :  { %2345 = vmatpush.msra.mxu3 %v7075_v54  ;;  %2326 = vmatpush.msra.mxu2 %v770_v43  ;;  %v765_v54 = vsel %vm96_vm7, %v4622_v41, %v10222_v21  ;;  %v10245_v41 = vunpack.i.l.bf16 %v6845_v6  ;;  %v10247_v43 = vunpack.i.h.bf16 %v7210_v1  ;;  %v10251_v21 = vld [vmem:[#allocation25_spill] sm:$0xff] }
 0x302   :  { %2413 = vmatpush.msrb.mxu1 %v10220_v55  ;;  %2261 = vmatpush.msra.mxu0 %v10221_v16  ;;  %v4847_v55 = vunpack.i.h.bf16 %v4845_v34  ;;  %v10248_v16 = vld [vmem:[#allocation53_spill] sm:$0xff] }
 0x303   :  { %2346 = vmatpush.msra.mxu3 %v1415_v13  ;;  %4213 = vmatmul.msk.f32.gmra.mxu2 %vm1952_vm9, %v7313_v44  ;;  %v1432_v31 = vsel %vm263_vm1, %v10245_v41, %v10244_v53  ;;  %v10249_v13 = vunpack.i.h.bf16 %v10248_v16  ;;  %v10253_v63 = vunpack.i.l.bf16 %v10248_v16 }
 0x304   :  { %2327 = vmatpush.msra.mxu2 %v769_v33  ;;  %2414 = vmatpush.msrb.mxu1 %v765_v54  ;;  %v10250_v33 = vunpack.i.h.bf16 %v6941_v36  ;;  %v4846_v54 = vunpack.i.l.bf16 %v4845_v34 }
 0x305   :  { %2262 = vmatpush.msra.mxu0 %v10223_v46  ;;  %2347 = vmatpush.msra.mxu3 %v7016_v14  ;;  %v1555_v14 = vsel %vm294_vm3, %v4817_v17, %v10226_v15  ;;  %v1435_v17 = vsel %vm263_vm1, %v4807_v24, %v10232_v25  ;;  %v10241_v24 = vunpack.i.h.bf16 %v6845_v6  ;;  %v10252_v46 = vunpack.i.l.bf16 %v7210_v1  ;;  %v10255_v15 = vld [vmem:[#allocation26_spill] sm:$0xff] }
 0x306   :  { %2328 = vmatpush.msra.mxu2 %v768_v37  ;;  %2415 = vmatpush.msrb.mxu1 %v764_v19  ;;  %v1315_v6 = vsel %vm232_vm0, %v10250_v33, %v10249_v13  ;;  %v10254_v19 = vunpack.i.l.bf16 %v6941_v36  ;;  %v10258_v36 = vunpack.i.h.bf16 %v6115_v40  ;;  %v10271_v13 = vld [vmem:[#allocation14_spill] sm:$0xff] }
 0x307   :  { %2263 = vmatpush.msra.mxu0 %v6804_v0  ;;  %2348 = vmatpush.msra.mxu3 %v6888_v18  ;;  %v1554_v0 = vsel %vm294_vm3, %v4816_v50, %v10227_v10  ;;  %v10228_v18 = vld [vmem:[#allocation66_spill] sm:$0xff]  ;;  %v4850_v50 = vpop.permute.xlu1 %4849  ;;  %v1433_v3 = vsel %vm263_vm1, %v10241_v24, %v10240_v20  ;;  %v10257_v10 = vunpack.i.h.bf16 %v7104_v9  ;;  %v2069_v24 = vpop.f32.mrf.mxu1 }
 0x308   :  { %2429 = vmatpush.msrb.mxu2 %v1555_v14  ;;  %2161 = vmatmul.f32.gmra.mxu0 %v7615_v35  ;;  %v4852_v57 = vunpack.i.h.bf16 %v4850_v50  ;;  %v4851_v11 = vunpack.i.l.bf16 %v4850_v50  ;;  %v1314_v5 = vsel %vm232_vm0, %v10254_v19, %v10253_v63  ;;  %v10256_v14 = vunpack.i.h.bf16 %v7237_v28  ;;  %v10274_v63 = vld [vmem:[#allocation15_spill] sm:$0xff] }
 0x309   :  { %2245 = vmatmul.f32.gmra.mxu3 %v7558_v27  ;;  %4216 = vmatmul.msk.f32.gmra.mxu1 %vm1952_vm9, %v7228_v45 }
 0x30a   :  { %2264 = vmatpush.msra.mxu0 %v6825_v22  ;;  %2349 = vmatpush.msra.mxu3 %v6896_v42  ;;  %v10229_v22 = vld [vmem:[#allocation67_spill] sm:$0xff]  ;;  %v10230_v42 = vld [vmem:[#allocation28_spill] sm:$0xff]  ;;  %v1655_v4 = vsel %vm325_vm2, %v10247_v43, %v4852_v57  ;;  %v1654_v37 = vsel %vm325_vm2, %v10252_v46, %v4851_v11  ;;  %v1653_v1 = vsel %vm325_vm2, %v10256_v14, %v4847_v55 }
 0x30b   :  { %2430 = vmatpush.msrb.mxu2 %v1554_v0  ;;  %v1675_v0 = vsel %vm325_vm2, %v4852_v57, %v10257_v10  ;;  %v10268_v57 = vld [vmem:[#allocation37_spill] sm:$0xff] }
 0x30c   :  { %2265 = vmatpush.msra.mxu0 %v10228_v18  ;;  %2350 = vmatpush.msra.mxu3 %v6962_v58  ;;  %v10233_v58 = vld [vmem:[#allocation83_spill] sm:$0xff]  ;;  %v10259_v18 = vld [vmem:[#allocation82_spill] sm:$0xff] }
 0x30d   :  { %2431 = vmatpush.msrb.mxu2 %v7081_v47  ;;  %v7643_v47 = vld [vmem:[#allocation9 + $0x48] sm:$0xff] }
 0x30e   :  { %4214 = vmatmul.msk.f32.gmra.mxu2 %vm1952_vm9, %v7393_v30  ;;  %2266 = vmatpush.msra.mxu0 %v10229_v22  ;;  %v10260_v22 = vunpack.i.h.bf16 %v10259_v18 }
 0x30f   :  { %2351 = vmatpush.msra.mxu3 %v6970_v56  ;;  %2432 = vmatpush.msrb.mxu2 %v7087_v23  ;;  %v10234_v56 = vld [vmem:[#allocation27_spill] sm:$0xff]  ;;  %v10235_v23 = vunpack.i.l.bf16 %v10231_v48  ;;  %v10261_v48 = vunpack.i.l.bf16 %v7237_v28  ;;  %v10265_v28 = vunpack.i.h.bf16 %v6644_v12 }
 0x310   :  { %2267 = vmatpush.msra.mxu0 %v10230_v42  ;;  %v1313_v42 = vsel %vm232_vm0, %v10260_v22, %v10258_v36 }
 0x311   :  { %2352 = vmatpush.msra.mxu3 %v10233_v58  ;;  %2433 = vmatpush.msrb.mxu2 %v1435_v17  ;;  %v1434_v52 = vsel %vm263_vm1, %v10236_v39, %v10235_v23  ;;  %v1652_v25 = vsel %vm325_vm2, %v10261_v48, %v4846_v54  ;;  %v10262_v17 = vunpack.i.l.bf16 %v7104_v9  ;;  %v10263_v58 = vunpack.i.l.bf16 %v6115_v40 }
 0x312   :  { %2164 = vmatmul.f32.gmra.mxu0 %v7643_v47  ;;  %2248 = vmatmul.f32.gmra.mxu3 %v7615_v35  ;;  %v1673_v39 = vsel %vm325_vm2, %v4847_v55, %v10265_v28  ;;  %v10267_v40 = vunpack.i.l.bf16 %v6644_v12 }
 0x313   :  { %4217 = vmatmul.msk.f32.gmra.mxu1 %vm1952_vm9, %v7313_v44  ;;  %2268 = vmatpush.msra.mxu0 %v10234_v56  ;;  %v1674_v50 = vsel %vm325_vm2, %v4851_v11, %v10262_v17  ;;  %v10264_v56 = vunpack.i.l.bf16 %v10259_v18  ;;  %v2072_v11 = vpop.f32.mrf.mxu1 }
 0x314   :  { %2353 = vmatpush.msra.mxu3 %v10237_v61  ;;  %2434 = vmatpush.msrb.mxu2 %v1434_v52  ;;  %v10266_v52 = vld [vmem:[#allocation38_spill] sm:$0xff]  ;;  %v1672_v9 = vsel %vm325_vm2, %v4846_v54, %v10267_v40  ;;  %v10269_v61 = vld [vmem:[#allocation40_spill] sm:$0xff] }
 0x315   :  { %2269 = vmatpush.msra.mxu0 %v10238_v2  ;;  %v1312_v23 = vsel %vm232_vm0, %v10264_v56, %v10263_v58  ;;  %v10270_v2 = vld [vmem:[#allocation45_spill] sm:$0xff] }
 0x316   :  { %2354 = vmatpush.msra.mxu3 %v10242_v8  ;;  %2435 = vmatpush.msrb.mxu2 %v1433_v3 }
 0x317   :  { %2329 = vmatmul.f32.vlgmr.msra.gmra.mxu2 %v7561_v60  ;;  %2270 = vmatpush.msra.mxu0 %v10243_v38  ;;  %v7770_v38 = vpop.permute.xlu0 %1939 }
 0x318   :  { %2355 = vmatpush.msra.mxu3 %v10246_v29  ;;  %2436 = vmatpush.msrb.mxu2 %v1432_v31 }
 0x319   :  { %2383 = vmatpush.msrb.mxu0 %v1655_v4 }
 0x31a   :  { %2356 = vmatpush.msra.mxu3 %v10251_v21  ;;  %2437 = vmatpush.msrb.mxu2 %v1315_v6 }
 0x31b   :  { %2251 = vmatmul.f32.gmra.mxu3 %v7643_v47  ;;  %2271 = vmatmul.f32.vlgmr.msra.gmra.mxu0 %v6988_v7  ;;  %v7779_v16 = vpop.f32.mrf.mxu1 }
 0x31c   :  { %4218 = vmatmul.msk.f32.gmra.mxu1 %vm1952_vm9, %v7393_v30  ;;  %2384 = vmatpush.msrb.mxu0 %v1654_v37 }
 0x31d   :  { %2357 = vmatpush.msra.mxu3 %v10255_v15  ;;  %2438 = vmatpush.msrb.mxu2 %v1314_v5  ;;  %v7795_v5 = vpop.permute.xlu1 %1944  ;;  %v2073_v15 = vadd.f32 %v2072_v11, %v7770_v38 }
 0x31e   :  { %2385 = vmatpush.msrb.mxu0 %v1653_v1 }
 0x31f   :  { %2470 = vmatpush.msrb.mxu3 %v1675_v0  ;;  %2439 = vmatpush.msrb.mxu2 %v1313_v42 }
 0x320   :  { %2332 = vmatmul.f32.gmra.mxu2 %v7558_v27  ;;  %2386 = vmatpush.msrb.mxu0 %v1652_v25 }
 0x321   :  { %2471 = vmatpush.msrb.mxu3 %v1674_v50  ;;  %2440 = vmatpush.msrb.mxu2 %v1312_v23 }
 0x323   :  { %2472 = vmatpush.msrb.mxu3 %v1673_v39  ;;  %2441 = vmatpush.msrb.mxu2 %v10266_v52  ;;  %v2078_v0 = vpop.f32.mrf.mxu1 }
 0x324   :  { %2274 = vmatmul.f32.gmra.mxu0 %v7040_v62  ;;  %2358 = vmatmul.f32.vlgmr.msra.gmra.mxu3 %v6988_v7 }
 0x325   :  { %2416 = vmatmul.f32.vlgmr.msrb.gmra.mxu1 %v7561_v60  ;;  %2473 = vmatpush.msrb.mxu3 %v1672_v9 }
 0x326   :  { %2442 = vmatpush.msrb.mxu2 %v10268_v57 }
 0x328   :  { %2443 = vmatpush.msrb.mxu2 %v10269_v61 }
 0x329   :  { %2335 = vmatmul.f32.gmra.mxu2 %v7615_v35  ;;  %v1982_v49 = vpop.f32.mrf.mxu2 }
 0x32a   :  { %2444 = vmatpush.msrb.mxu2 %v10270_v2 }
 0x32c   :  { %2277 = vmatmul.f32.gmra.mxu0 %v7107_v59  ;;  %2361 = vmatmul.f32.gmra.mxu3 %v7040_v62 }
 0x32d   :  { %2419 = vmatmul.f32.gmra.mxu1 %v7558_v27 }
 0x331   :  { %2338 = vmatmul.f32.gmra.mxu2 %v7643_v47 }
 0x332   :  { %v1985_v12 = vpop.f32.mrf.mxu2 }
 0x334   :  { %2280 = vmatmul.f32.gmra.mxu0 %v7168_v26  ;;  %2364 = vmatmul.f32.gmra.mxu3 %v7107_v59 }
 0x335   :  { %2422 = vmatmul.f32.gmra.mxu1 %v7615_v35  ;;  %v2011_v60 = vpop.f32.mrf.mxu3  ;;  %v7763_v35 = vpop.permute.xlu2 %1934 }
 0x336   :  { %v1983_v8 = vadd.f32 %v1982_v49, %v7763_v35 }
 0x339   :  { %2445 = vmatmul.f32.vlgmr.msrb.gmra.mxu2 %v6988_v7 }
 0x33a   :  { %v1988_v20 = vpop.f32.mrf.mxu2 }
 0x33b   :  { %v1989_v14 = vadd.f32 %v1988_v20, %v7795_v5 }
 0x33c   :  { %2367 = vmatmul.f32.gmra.mxu3 %v7168_v26  ;;  %4219 = vmatmul.msk.f32.vlgmr.msrb.gmra.mxu0 %vm1952_vm9, %v7176_v51 }
 0x33d   :  { %2425 = vmatmul.f32.gmra.mxu1 %v7643_v47  ;;  %v2014_v27 = vpop.f32.mrf.mxu3 }
 0x341   :  { %2448 = vmatmul.f32.gmra.mxu2 %v7040_v62  ;;  %v2012_v62 = vadd.f32 %v2011_v60, %v1983_v8 }
 0x342   :  { %v1991_v3 = vpop.f32.mrf.mxu2 }
 0x344   :  { %4220 = vmatmul.msk.f32.gmra.mxu0 %vm1952_vm9, %v7228_v45  ;;  %4223 = vmatmul.msk.f32.vlgmr.msrb.gmra.mxu3 %vm1952_vm9, %v7176_v51  ;;  %v1986_v51 = vadd.f32 %v1985_v12, %v7770_v38 }
 0x346   :  { %v2017_v7 = vpop.f32.mrf.mxu3  ;;  %v2015_v41 = vadd.f32 %v2014_v27, %v1986_v51 }
 0x347   :  { %v2040_v34 = vpop.f32.mrf.mxu0  ;;  %v2018_v36 = vadd.f32 %v2017_v7, %v1989_v14 }
 0x348   :  { %v2041_v53 = vadd.f32 %v2040_v34, %v2012_v62 }
 0x349   :  { %2451 = vmatmul.f32.gmra.mxu2 %v7107_v59 }
 0x34a   :  { %v2098_v47 = vpop.f32.mrf.mxu2  ;;  %v2487_v29 = vmax.f32 %v2041_v53, 0.0 }
 0x34c   :  { %4221 = vmatmul.msk.f32.gmra.mxu0 %vm1952_vm9, %v7313_v44  ;;  %4224 = vmatmul.msk.f32.gmra.mxu3 %vm1952_vm9, %v7228_v45  ;;  %v2070_v45 = vadd.f32 %v2069_v24, %v7763_v35  ;;  %v7782_v33 = vmul.f32 %v2487_v29, %v10271_v13 }
 0x34e   :  { %v2020_v59 = vpop.f32.mrf.mxu3  ;;  %10272 = vst [vmem:[#allocation41_spill] sm:$0xff] %v7782_v33  ;;  %v2099_v6 = vadd.f32 %v2098_v47, %v2070_v45 }
 0x351   :  { %2454 = vmatmul.f32.gmra.mxu2 %v7168_v26  ;;  %v2043_v31 = vpop.f32.mrf.mxu0  ;;  %v2185_v39 = vpop.f32.mrf.mxu1 }
 0x352   :  { %v2044_v43 = vadd.f32 %v2043_v31, %v2015_v41  ;;  %v2101_v55 = vpop.f32.mrf.mxu2 }
 0x353   :  { %v2102_v18 = vadd.f32 %v2101_v55, %v2073_v15 }
 0x354   :  { %4222 = vmatmul.msk.f32.gmra.mxu0 %vm1952_vm9, %v7393_v30  ;;  %4225 = vmatmul.msk.f32.gmra.mxu3 %vm1952_vm9, %v7313_v44  ;;  %v2493_v4 = vmax.f32 %v2044_v43, 0.0 }
 0x356   :  { %v7785_v26 = vmul.f32 %v2493_v4, %v10271_v13  ;;  %v2127_v21 = vpop.f32.mrf.mxu3 }
 0x357   :  { %v2128_v54 = vadd.f32 %v2127_v21, %v2099_v6 }
 0x358   :  { %10273 = vst [vmem:[#allocation60_spill] sm:$0xff] %v7785_v26  ;;  %v4853_v46 = vpack.i.bf16 %v7785_v26, %v7782_v33 }
 0x359   :  { %v2488_v37 = vmax.f32 %v2128_v54, 0.0  ;;  %v2046_v44 = vpop.f32.mrf.mxu0 }
 0x35a   :  { %4854 = vrot.lane.b32.xlu0 %v4853_v46, %s5446_s11  ;;  %v2047_v48 = vadd.f32 %v2046_v44, %v2018_v36 }
 0x35b   :  { %v7793_v19 = vmul.f32 %v2488_v37, %v10274_v63  ;;  %v2104_v1 = vpop.f32.mrf.mxu2  ;;  %v2188_v60 = vpop.f32.mrf.mxu1 }
 0x35c   :  { %4226 = vmatmul.msk.f32.gmra.mxu3 %vm1952_vm9, %v7393_v30  ;;  %v7805_v30 = vpop.permute.xlu2 %1949  ;;  %v2499_v56 = vmax.f32 %v2047_v48, 0.0 }
 0x35d   :  { %10275 = vst [vmem:[#allocation20_spill] sm:$0xff] %v7793_v19  ;;  %v7801_v10 = vpack.i.bf16 %v7793_v19, %v7782_v33  ;;  %v1992_v42 = vadd.f32 %v1991_v3, %v7805_v30  ;;  %v2079_v62 = vadd.f32 %v2078_v0, %v7805_v30 }
 0x35e   :  { %v7815_v57 = vmul.f32 %v2499_v56, %v10271_v13 }
 0x35f   :  { %4904 = vrot.lane.b32.xlu2 %v7801_v10, %s5452_s16  ;;  %v2021_v17 = vadd.f32 %v2020_v59, %v1992_v42  ;;  %v2076_v59 = vadd.f32 %v7779_v16, %v7795_v5 }
 0x360   :  { %v2130_v22 = vpop.f32.mrf.mxu3 }
 0x361   :  { %v2131_v25 = vadd.f32 %v2130_v22, %v2102_v18  ;;  %v2105_v29 = vadd.f32 %v2104_v1, %v2076_v59 }
 0x362   :  { %4859 = vrot.lane.b32.xlu0 %v4853_v46, %s5447_s12 }
 0x363   :  { %v2494_v50 = vmax.f32 %v2131_v25, 0.0  ;;  %v2107_v40 = vpop.f32.mrf.mxu2 }
 0x364   :  { %v2108_v51 = vadd.f32 %v2107_v40, %v2079_v62 }
 0x365   :  { %v2049_v58 = vpop.f32.mrf.mxu0  ;;  %v7810_v23 = vmul.f32 %v2494_v50, %v10274_v63 }
 0x366   :  { %v2050_v28 = vadd.f32 %v2049_v58, %v2021_v17  ;;  %v2191_v3 = vpop.f32.mrf.mxu1 }
 0x367   :  { %10276 = vst [vmem:[#allocation19_spill] sm:$0xff] %v7810_v23  ;;  %v4913_v9 = vpack.i.bf16 %v7810_v23, %v7793_v19  ;;  %v7844_v54 = vpack.i.bf16 %v7810_v23, %v7785_v26 }
 0x368   :  { %v2505_v52 = vmax.f32 %v2050_v28, 0.0 }
 0x369   :  { %4914 = vrot.lane.b32.xlu2 %v4913_v9, %s5446_s11 }
 0x36a   :  { %v7818_v61 = vmul.f32 %v2505_v52, %v10271_v13  ;;  %4864 = vrot.lane.b32.xlu0 %v4853_v46, %s5448_s0 }
 0x36c   :  { %v4878_v2 = vpack.i.bf16 %v7818_v61, %v7815_v57  ;;  %v2133_v49 = vpop.f32.mrf.mxu3 }
 0x36d   :  { %v2134_v55 = vadd.f32 %v2133_v49, %v2105_v29 }
 0x36e   :  { %4879 = vrot.lane.b32.xlu1 %v4878_v2, %s5446_s11 }
 0x36f   :  { %v2500_v16 = vmax.f32 %v2134_v55, 0.0 }
 0x371   :  { %v2156_v12 = vpop.f32.mrf.mxu0  ;;  %v2214_v20 = vpop.f32.mrf.mxu2  ;;  %4919 = vrot.lane.b32.xlu2 %v4913_v9, %s5447_s12  ;;  %v7856_v18 = vmul.f32 %v2500_v16, %v10274_v63 }
 0x372   :  { %4869 = vrot.lane.b32.xlu0 %v4853_v46, %s5449_s13  ;;  %v2194_v47 = vpop.f32.mrf.mxu1  ;;  %v2157_v43 = vadd.f32 %v2156_v12, %v7763_v35 }
 0x373   :  { %10278 = vst [vmem:[#allocation50_spill] sm:$0xff] %v7856_v18  ;;  %v7870_v40 = vpack.i.bf16 %v7856_v18, %v7815_v57 }
 0x376   :  { %4884 = vrot.lane.b32.xlu1 %v4878_v2, %s5447_s12  ;;  %v2136_v27 = vpop.f32.mrf.mxu3 }
 0x377   :  { %v2137_v41 = vadd.f32 %v2136_v27, %v2108_v51 }
 0x379   :  { %4924 = vrot.lane.b32.xlu2 %v4913_v9, %s5448_s0  ;;  %v2217_v7 = vpop.f32.mrf.mxu2  ;;  %v2506_v13 = vmax.f32 %v2137_v41, 0.0  ;;  %v10284_v41 = vld [vmem:[#allocation21_spill] sm:$0xff] }
 0x37a   :  { %4874 = vrot.lane.b32.xlu0 %v4853_v46, %s5450_s14  ;;  %v2186_v46 = vadd.f32 %v2185_v39, %v2157_v43  ;;  %v10279_v39 = vld [vmem:[#allocation16_spill] sm:$0xff] }
 0x37b   :  { %v2159_v24 = vpop.f32.mrf.mxu0  ;;  %v7849_v37 = vmul.f32 %v2506_v13, %v10274_v63 }
 0x37c   :  { %v2160_v31 = vadd.f32 %v2159_v24, %v7770_v38  ;;  %v2301_v4 = vpop.f32.mrf.mxu1  ;;  %v2215_v1 = vadd.f32 %v2214_v20, %v2186_v46 }
 0x37d   :  { %10277 = vst [vmem:[#allocation39_spill] sm:$0xff] %v7849_v37  ;;  %v7860_v48 = vpack.i.bf16 %v7849_v37, %v7818_v61 }
 0x37e   :  { %4889 = vrot.lane.b32.xlu1 %v4878_v2, %s5448_s0  ;;  %v2189_v6 = vadd.f32 %v2188_v60, %v2160_v31  ;;  %v2489_v58 = vmax.f32 %v2215_v1, 0.0 }
 0x380   :  { %v2218_v44 = vadd.f32 %v2217_v7, %v2189_v6 }
 0x381   :  { %v2243_v34 = vpop.f32.mrf.mxu3  ;;  %4929 = vrot.lane.b32.xlu2 %v4913_v9, %s5449_s13 }
 0x382   :  { %4909 = vrot.lane.b32.xlu0 %v7801_v10, %s5451_s15  ;;  %v2495_v22 = vmax.f32 %v2218_v44, 0.0  ;;  %v2244_v25 = vadd.f32 %v2243_v34, %v7763_v35 }
 0x384   :  { %v7866_v52 = vmul.f32 %v2495_v22, %v10279_v39 }
 0x385   :  { %v2162_v8 = vpop.f32.mrf.mxu0 }
 0x386   :  { %v2220_v11 = vpop.f32.mrf.mxu2  ;;  %4894 = vrot.lane.b32.xlu1 %v4878_v2, %s5449_s13  ;;  %v2163_v0 = vadd.f32 %v2162_v8, %v7795_v5  ;;  %v2304_v17 = vpop.f32.mrf.mxu1  ;;  %10280 = vst [vmem:[#allocation18_spill] sm:$0xff] %v7866_v52 }
 0x388   :  { %v2192_v56 = vadd.f32 %v2191_v3, %v2163_v0 }
 0x389   :  { %4934 = vrot.lane.b32.xlu2 %v4913_v9, %s5450_s14 }
 0x38a   :  { %v2221_v49 = vadd.f32 %v2220_v11, %v2192_v56 }
 0x38c   :  { %v2246_v53 = vpop.f32.mrf.mxu3  ;;  %v2501_v7 = vmax.f32 %v2221_v49, 0.0 }
 0x38d   :  { %v2247_v12 = vadd.f32 %v2246_v53, %v7770_v38 }
 0x38e   :  { %4899 = vrot.lane.b32.xlu1 %v4878_v2, %s5450_s14  ;;  %v7873_v2 = vmul.f32 %v2489_v58, %v10279_v39  ;;  %v7888_v53 = vmul.f32 %v2501_v7, %v10279_v39 }
 0x38f   :  { %v2165_v45 = vpop.f32.mrf.mxu0 }
 0x390   :  { %v2166_v15 = vadd.f32 %v2165_v45, %v7805_v30  ;;  %10281 = vst [vmem:[#allocation51_spill] sm:$0xff] %v7873_v2  ;;  %v7880_v24 = vpack.i.bf16 %v7873_v2, %v7866_v52  ;;  %v2307_v8 = vpop.f32.mrf.mxu1 }
 0x391   :  { %v2223_v21 = vpop.f32.mrf.mxu2  ;;  %4944 = vrot.lane.b32.xlu2 %v7844_v54, %s5451_s15  ;;  %10283 = vst [vmem:[#allocation57_spill] sm:$0xff] %v7888_v53 }
 0x392   :  { %v2195_v42 = vadd.f32 %v2194_v47, %v2166_v15 }
 0x394   :  { %v2224_v63 = vadd.f32 %v2223_v21, %v2195_v42 }
 0x395   :  { %v2249_v14 = vpop.f32.mrf.mxu3 }
 0x396   :  { %4939 = vrot.lane.b32.xlu1 %v7844_v54, %s5452_s16  ;;  %v2507_v20 = vmax.f32 %v2224_v63, 0.0 }
 0x398   :  { %v2272_v36 = vpop.f32.mrf.mxu0  ;;  %v7885_v62 = vmul.f32 %v2507_v20, %v10279_v39 }
 0x399   :  { %5004 = vrot.lane.b32.xlu2 %v7860_v48, %s5452_s16  ;;  %v2273_v28 = vadd.f32 %v2272_v36, %v2244_v25  ;;  %v2310_v21 = vpop.f32.mrf.mxu1 }
 0x39a   :  { %v2330_v50 = vpop.f32.mrf.mxu2  ;;  %10282 = vst [vmem:[#allocation17_spill] sm:$0xff] %v7885_v62  ;;  %v5063_v45 = vpack.i.bf16 %v7885_v62, %v7888_v53 }
 0x39b   :  { %v2302_v60 = vadd.f32 %v2301_v4, %v2273_v28  ;;  %v2250_v4 = vadd.f32 %v2249_v14, %v7795_v5 }
 0x39d   :  { %v2490_v47 = vmax.f32 %v2302_v60, 0.0 }
 0x39e   :  { %v2252_v9 = vpop.f32.mrf.mxu3  ;;  %4974 = vrot.lane.b32.xlu1 %v7870_v40, %s5451_s15 }
 0x39f   :  { %v7891_v31 = vmul.f32 %v2490_v47, %v10284_v41  ;;  %v2253_v16 = vadd.f32 %v2252_v9, %v7805_v30  ;;  %v2331_v9 = vadd.f32 %v2330_v50, %v7763_v35 }
 0x3a1   :  { %v2275_v27 = vpop.f32.mrf.mxu0  ;;  %5054 = vrot.lane.b32.xlu2 %v7880_v24, %s5452_s16  ;;  %10285 = vst [vmem:[#allocation36_spill] sm:$0xff] %v7891_v31 }
 0x3a2   :  { %v2276_v3 = vadd.f32 %v2275_v27, %v2247_v12 }
 0x3a3   :  { %v2333_v34 = vpop.f32.mrf.mxu2 }
 0x3a4   :  { %v2305_v11 = vadd.f32 %v2304_v17, %v2276_v3  ;;  %v2417_v17 = vpop.f32.mrf.mxu1  ;;  %v2334_v3 = vadd.f32 %v2333_v34, %v7770_v38 }
 0x3a5   :  { %v2418_v49 = vadd.f32 %v2417_v17, %v7763_v35 }
 0x3a6   :  { %v2496_v51 = vmax.f32 %v2305_v11, 0.0 }
 0x3a7   :  { %v2359_v59 = vpop.f32.mrf.mxu3 }
 0x3a8   :  { %v7894_v29 = vmul.f32 %v2496_v51, %v10284_v41  ;;  %v2360_v20 = vadd.f32 %v2359_v59, %v2331_v9 }
 0x3a9   :  { %v2278_v43 = vpop.f32.mrf.mxu0  ;;  %5064 = vrot.lane.b32.xlu2 %v5063_v45, %s5446_s11 }
 0x3aa   :  { %10286 = vst [vmem:[#allocation63_spill] sm:$0xff] %v7894_v29  ;;  %v4948_v55 = vpack.i.bf16 %v7894_v29, %v7891_v31  ;;  %v2279_v13 = vadd.f32 %v2278_v43, %v2250_v4  ;;  %v10289_v43 = vld [vmem:[#allocation24_spill] sm:$0xff] }
 0x3ac   :  { %v2336_v6 = vpop.f32.mrf.mxu2  ;;  %4949 = vrot.lane.b32.xlu0 %v4948_v55, %s5446_s11  ;;  %v2308_v44 = vadd.f32 %v2307_v8, %v2279_v13 }
 0x3ad   :  { %v2337_v22 = vadd.f32 %v2336_v6, %v7795_v5 }
 0x3ae   :  { %v2502_v0 = vmax.f32 %v2308_v44, 0.0 }
 0x3af   :  { %v2362_v46 = vpop.f32.mrf.mxu3 }
 0x3b0   :  { %v7910_v58 = vmul.f32 %v2502_v0, %v10284_v41  ;;  %v2363_v47 = vadd.f32 %v2362_v46, %v2334_v3 }
 0x3b1   :  { %v2281_v15 = vpop.f32.mrf.mxu0  ;;  %5069 = vrot.lane.b32.xlu2 %v5063_v45, %s5447_s12 }
 0x3b2   :  { %v2282_v1 = vadd.f32 %v2281_v15, %v2253_v16  ;;  %10287 = vst [vmem:[#allocation33_spill] sm:$0xff] %v7910_v58  ;;  %v4978_v15 = vpack.i.bf16 %v7849_v37, %v7856_v18 }
 0x3b4   :  { %v2311_v14 = vadd.f32 %v2310_v21, %v2282_v1  ;;  %v7905_v36 = vpop.f32.mrf.mxu2  ;;  %4954 = vrot.lane.b32.xlu0 %v4948_v55, %s5447_s12 }
 0x3b6   :  { %v2508_v42 = vmax.f32 %v2311_v14, 0.0 }
 0x3b7   :  { %v2365_v25 = vpop.f32.mrf.mxu3 }
 0x3b8   :  { %v7913_v56 = vmul.f32 %v2508_v42, %v10284_v41  ;;  %v7915_v28 = vadd.f32 %v2365_v25, %v2337_v22  ;;  %v7932_v41 = vpop.f32.mrf.mxu1  ;;  %v5033_v22 = vpack.i.bf16 %v7866_v52, %v7873_v2 }
 0x3b9   :  { %v2388_v39 = vpop.f32.mrf.mxu0  ;;  %5074 = vrot.lane.b32.xlu2 %v5063_v45, %s5448_s0  ;;  %v7922_v12 = vpop.permute.xlu2 %4904 }
 0x3ba   :  { %10288 = vst [vmem:[#allocation48_spill] sm:$0xff] %v7913_v56  ;;  %v5013_v63 = vpack.i.bf16 %v7913_v56, %v7910_v58  ;;  %v2389_v7 = vadd.f32 %v2388_v39, %v2360_v20 }
 0x3bc   :  { %v2446_v60 = vpop.f32.mrf.mxu2  ;;  %5014 = vrot.lane.b32.xlu1 %v5013_v63, %s5446_s11  ;;  %4959 = vrot.lane.b32.xlu0 %v4948_v55, %s5448_s0  ;;  %v2491_v35 = vmax.f32 %v2389_v7, 0.0 }
 0x3bd   :  { %v2447_v27 = vadd.f32 %v2446_v60, %v2418_v49 }
 0x3be   :  { %v7940_v4 = vmul.f32 %v2491_v35, %v10289_v43 }
 0x3bf   :  { %v7927_v8 = vpop.f32.mrf.mxu3 }
 0x3c0   :  { %10291 = vst [vmem:[#allocation54_spill] sm:$0xff] %v7940_v4  ;;  %v2423_v46 = vpop.f32.mrf.mxu1 }
 0x3c1   :  { %v2391_v50 = vpop.f32.mrf.mxu0  ;;  %5079 = vrot.lane.b32.xlu2 %v5063_v45, %s5449_s13  ;;  %v2424_v42 = vadd.f32 %v2423_v46, %v7795_v5 }
 0x3c2   :  { %v2392_v11 = vadd.f32 %v2391_v50, %v2363_v47  ;;  %v10292_v47 = vld [vmem:[#allocation35_spill] sm:$0xff] }
 0x3c3   :  { %v7934_v59 = vpop.permute.xlu2 %4914 }
 0x3c4   :  { %v2497_v51 = vmax.f32 %v2392_v11, 0.0  ;;  %5019 = vrot.lane.b32.xlu1 %v5013_v63, %s5447_s12  ;;  %4964 = vrot.lane.b32.xlu0 %v4948_v55, %s5449_s13  ;;  %v7942_v13 = vpop.f32.mrf.mxu2 }
 0x3c6   :  { %v7937_v34 = vmul.f32 %v2497_v51, %v10289_v43 }
 0x3c7   :  { %v2475_v6 = vpop.f32.mrf.mxu3 }
 0x3c8   :  { %10290 = vst [vmem:[#allocation49_spill] sm:$0xff] %v7937_v34  ;;  %v7944_v21 = vadd.f32 %v2475_v6, %v2447_v27  ;;  %v5098_v45 = vpack.i.bf16 %v7937_v34, %v7940_v4  ;;  %v2426_v14 = vpop.f32.mrf.mxu1 }
 0x3c9   :  { %v2427_v17 = vadd.f32 %v2426_v14, %v7805_v30 }
 0x3ca   :  { %5099 = vrot.lane.b32.xlu2 %v5098_v45, %s5446_s11 }
 0x3cb   :  { %v7952_v55 = vpop.permute.xlu2 %4919 }
 0x3cc   :  { %5024 = vrot.lane.b32.xlu1 %v5013_v63, %s5448_s0  ;;  %4969 = vrot.lane.b32.xlu0 %v7870_v40, %s5452_s16  ;;  %v2452_v44 = vpop.f32.mrf.mxu2  ;;  %v7975_v7 = vpop.permute.xlu0 %4854 }
 0x3cd   :  { %v2453_v39 = vadd.f32 %v2452_v44, %v2424_v42  ;;  %v2394_v44 = vpop.f32.mrf.mxu0 }
 0x3cf   :  { %v7954_v16 = vpop.f32.mrf.mxu3 }
 0x3d2   :  { %5104 = vrot.lane.b32.xlu2 %v5098_v45, %s5447_s12 }
 0x3d3   :  { %v7961_v1 = vpop.permute.xlu2 %4924 }
 0x3d4   :  { %5029 = vrot.lane.b32.xlu1 %v5013_v63, %s5449_s13  ;;  %4979 = vrot.lane.b32.xlu0 %v4978_v15, %s5446_s11  ;;  %v2455_v25 = vpop.f32.mrf.mxu2  ;;  %v7996_v46 = vpop.permute.xlu0 %4859 }
 0x3d5   :  { %v2456_v9 = vadd.f32 %v2455_v25, %v2427_v17 }
 0x3d7   :  { %v2481_v0 = vpop.f32.mrf.mxu3 }
 0x3d8   :  { %v2482_v49 = vadd.f32 %v2481_v0, %v2453_v39 }
 0x3da   :  { %5109 = vrot.lane.b32.xlu2 %v5098_v45, %s5448_s0  ;;  %v2504_v5 = vmax.f32 %v2482_v49, 0.0 }
 0x3db   :  { %v7970_v63 = vpop.permute.xlu2 %4929 }
 0x3dc   :  { %5034 = vrot.lane.b32.xlu1 %v5033_v22, %s5446_s11  ;;  %4984 = vrot.lane.b32.xlu0 %v4978_v15, %s5447_s12  ;;  %v7985_v35 = vmul.f32 %v2504_v5, %v10292_v47  ;;  %v8007_v17 = vpop.permute.xlu0 %4864 }
 0x3de   :  { %10294 = vst [vmem:[#allocation61_spill] sm:$0xff] %v7985_v35 }
 0x3df   :  { %v2484_v60 = vpop.f32.mrf.mxu3 }
 0x3e0   :  { %v2485_v20 = vadd.f32 %v2484_v60, %v2456_v9  ;;  %v7972_v27 = vpop.permute.xlu1 %4879 }
 0x3e2   :  { %v2510_v3 = vmax.f32 %v2485_v20, 0.0  ;;  %5114 = vrot.lane.b32.xlu2 %v5098_v45, %s5449_s13 }
 0x3e3   :  { %v7982_v11 = vpop.permute.xlu2 %4934 }
 0x3e4   :  { %5039 = vrot.lane.b32.xlu1 %v5033_v22, %s5447_s12  ;;  %4989 = vrot.lane.b32.xlu0 %v4978_v15, %s5448_s0  ;;  %v7980_v50 = vmul.f32 %v2510_v3, %v10292_v47  ;;  %v2395_v3 = vadd.f32 %v2394_v44, %v7915_v28 }
 0x3e6   :  { %10293 = vst [vmem:[#allocation32_spill] sm:$0xff] %v7980_v50  ;;  %v5158_v6 = vpack.i.bf16 %v7980_v50, %v7985_v35 }
 0x3e8   :  { %v7987_v51 = vpop.permute.xlu1 %4884 }
 0x3ea   :  { %5159 = vrot.lane.b32.xlu2 %v5158_v6, %s5446_s11 }
 0x3eb   :  { %v7994_v45 = vpop.permute.xlu2 %4944 }
 0x3ec   :  { %5044 = vrot.lane.b32.xlu1 %v5033_v22, %s5448_s0  ;;  %4994 = vrot.lane.b32.xlu0 %v4978_v15, %s5449_s13  ;;  %10295 = vst [vmem:[#allocation74_spill] sm:$0xff] %v7994_v45 }
 0x3f0   :  { %v7998_v0 = vpop.permute.xlu1 %4889 }
 0x3f2   :  { %5164 = vrot.lane.b32.xlu2 %v5158_v6, %s5447_s12 }
 0x3f3   :  { %v8003_v14 = vpop.permute.xlu2 %5004 }
 0x3f4   :  { %5049 = vrot.lane.b32.xlu1 %v5033_v22, %s5449_s13  ;;  %4999 = vrot.lane.b32.xlu0 %v4978_v15, %s5450_s14  ;;  %v9844_v42 = vunpack.i.h.bf16 %v8003_v14  ;;  %v9842_v25 = vunpack.i.l.bf16 %v8003_v14  ;;  %v2340_v15 = vadd.f32 %v7905_v36, %v7805_v30  ;;  %v2397_v22 = vpop.f32.mrf.mxu0  ;;  %v2421_v30 = vadd.f32 %v7932_v41, %v7770_v38 }
 0x3f6   :  { %v3418_v39 = vsel %vm294_vm3, %v9842_v25, %v9844_v42  ;;  %v2369_v49 = vadd.f32 %v7927_v8, %v2340_v15  ;;  %v5083_v8 = vpack.i.bf16 %v7885_v62, %v7873_v2  ;;  %v2450_v15 = vadd.f32 %v7942_v13, %v2421_v30 }
 0x3f7   :  { %3815 = vmatpush.msra.mxu1 %v3418_v39  ;;  %v8032_v39 = vpop.permute.xlu0 %4869  ;;  %v5178_v13 = vpack.i.bf16 %v7866_v52, %v7888_v53 }
 0x3f8   :  { %v8015_v9 = vpop.permute.xlu1 %4894  ;;  %v2398_v20 = vadd.f32 %v2397_v22, %v2369_v49  ;;  %v2503_v22 = vmax.f32 %v2395_v3, 0.0  ;;  %v2479_v38 = vadd.f32 %v7954_v16, %v2450_v15  ;;  %v2492_v16 = vmax.f32 %v7944_v21, 0.0 }
 0x3fa   :  { %5169 = vrot.lane.b32.xlu2 %v5158_v6, %s5448_s0  ;;  %v2509_v36 = vmax.f32 %v2398_v20, 0.0  ;;  %v8049_v44 = vmul.f32 %v2503_v22, %v10289_v43  ;;  %v8079_v21 = vmul.f32 %v2492_v16, %v10292_v47 }
 0x3fb   :  { %v8025_v60 = vpop.permute.xlu2 %5054 }
 0x3fc   :  { %5059 = vrot.lane.b32.xlu1 %v7880_v24, %s5451_s15  ;;  %5009 = vrot.lane.b32.xlu0 %v7860_v48, %s5451_s15  ;;  %v5093_v24 = vpack.i.bf16 %v7888_v53, %v7885_v62  ;;  %v8046_v41 = vmul.f32 %v2509_v36, %v10289_v43  ;;  %10298 = vst [vmem:[#allocation80_spill] sm:$0xff] %v8049_v44  ;;  %v9843_v20 = vunpack.i.l.bf16 %v8025_v60 }
 0x3fd   :  { %10302 = vst [vmem:[#allocation30_spill] sm:$0xff] %v8079_v21 }
 0x3fe   :  { %10297 = vst [vmem:[#allocation79_spill] sm:$0xff] %v8046_v41  ;;  %v5118_v3 = vpack.i.bf16 %v8046_v41, %v8049_v44 }
 0x3ff   :  { %v8061_v36 = vpop.permute.xlu0 %4874 }
 0x400   :  { %v8028_v5 = vpop.permute.xlu1 %4899  ;;  %10300 = vst [vmem:[#allocation46_spill] sm:$0xff] %v8061_v36 }
 0x401   :  { %10296 = vst [vmem:[#allocation64_spill] sm:$0xff] %v8028_v5 }
 0x402   :  { %5174 = vrot.lane.b32.xlu2 %v5158_v6, %s5449_s13  ;;  %v2498_v6 = vmax.f32 %v2479_v38, 0.0 }
 0x403   :  { %v8042_v28 = vpop.permute.xlu2 %5064 }
 0x404   :  { %5084 = vrot.lane.b32.xlu1 %v5083_v8, %s5450_s14  ;;  %5094 = vrot.lane.b32.xlu0 %v5093_v24, %s5451_s15  ;;  %v8076_v15 = vmul.f32 %v2498_v6, %v10292_v47  ;;  %v5223_v6 = vpack.i.bf16 %v7894_v29, %v7866_v52  ;;  %v10312_v18 = vunpack.i.h.bf16 %v8042_v28 }
 0x406   :  { %10301 = vst [vmem:[#allocation47_spill] sm:$0xff] %v8076_v15 }
 0x407   :  { %v8089_v38 = vpop.permute.xlu0 %4909 }
 0x408   :  { %v8051_v49 = vpop.permute.xlu1 %4939  ;;  %10303 = vst [vmem:[#allocation52_spill] sm:$0xff] %v8089_v38 }
 0x409   :  { %10299 = vst [vmem:[#allocation31_spill] sm:$0xff] %v8051_v49  ;;  %v9845_v30 = vunpack.i.h.bf16 %v8051_v49 }
 0x40a   :  { %5179 = vrot.lane.b32.xlu2 %v5178_v13, %s5450_s14  ;;  %v5208_v13 = vpack.i.bf16 %v7891_v31, %v7894_v29 }
 0x40b   :  { %v8071_v43 = vsel %vm294_vm3, %v9845_v30, %v9843_v20  ;;  %v8073_v8 = vpop.permute.xlu2 %5069 }
 0x40c   :  { %5089 = vrot.lane.b32.xlu1 %v5093_v24, %s5452_s16  ;;  %5119 = vrot.lane.b32.xlu0 %v5118_v3, %s5446_s11  ;;  %v5138_v24 = vpack.i.bf16 %v8076_v15, %v8079_v21 }
 0x410   :  { %v8107_v25 = vpop.permute.xlu1 %4974 }
 0x411   :  { %10305 = vst [vmem:[#allocation71_spill] sm:$0xff] %v8107_v25 }
 0x412   :  { %5194 = vrot.lane.b32.xlu2 %v7870_v40, %s5453_s17 }
 0x413   :  { %v8087_v22 = vpop.permute.xlu2 %5074 }
 0x414   :  { %5139 = vrot.lane.b32.xlu1 %v5138_v24, %s5446_s11  ;;  %5124 = vrot.lane.b32.xlu0 %v5118_v3, %s5447_s12 }
 0x41a   :  { %5209 = vrot.lane.b32.xlu2 %v5208_v13, %s5452_s16 }
 0x41b   :  { %v8096_v47 = vpop.permute.xlu2 %5079 }
 0x41c   :  { %5144 = vrot.lane.b32.xlu1 %v5138_v24, %s5447_s12  ;;  %5129 = vrot.lane.b32.xlu0 %v5118_v3, %s5448_s0 }
 0x41e   :  { %v8098_v40 = vpop.permute.xlu0 %4949 }
 0x41f   :  { %v9850_v20 = vunpack.i.h.bf16 %v8098_v40  ;;  %v9853_v42 = vunpack.i.l.bf16 %v8098_v40 }
 0x422   :  { %5224 = vrot.lane.b32.xlu2 %v5223_v6, %s5453_s17 }
 0x424   :  { %5149 = vrot.lane.b32.xlu1 %v5138_v24, %s5448_s0  ;;  %5134 = vrot.lane.b32.xlu0 %v5118_v3, %s5449_s13  ;;  %v8105_v16 = vpop.permute.xlu2 %5099 }
 0x425   :  { %10304 = vst [vmem:[#allocation58_spill] sm:$0xff] %v8105_v16  ;;  %v9849_v19 = vunpack.i.h.bf16 %v8105_v16  ;;  %v9852_v29 = vunpack.i.l.bf16 %v8105_v16 }
 0x426   :  { %v8111_v30 = vpop.permute.xlu0 %4954 }
 0x427   :  { %v8121_v3 = vsel %vm96_vm7, %v9850_v20, %v9849_v19  ;;  %v8129_v6 = vsel %vm96_vm7, %v9853_v42, %v9852_v29  ;;  %v9859_v19 = vunpack.i.h.bf16 %v8111_v30  ;;  %v10310_v37 = vunpack.i.l.bf16 %v8111_v30 }
 0x428   :  { %10306 = vst [vmem:[#allocation62_spill] sm:$0xff] %v8121_v3 }
 0x429   :  { %10307 = vst [vmem:[#allocation77_spill] sm:$0xff] %v8129_v6 }
 0x42a   :  { %5239 = vrot.lane.b32.xlu2 %v5208_v13, %s5451_s15 }
 0x42c   :  { %5154 = vrot.lane.b32.xlu1 %v5138_v24, %s5449_s13  ;;  %5184 = vrot.lane.b32.xlu0 %v7860_v48, %s5453_s17  ;;  %v8135_v52 = vpop.permute.xlu2 %5104  ;;  %v5248_v24 = vpack.i.bf16 %v7910_v58, %v7913_v56 }
 0x42d   :  { %10308 = vst [vmem:[#allocation29_spill] sm:$0xff] %v8135_v52  ;;  %v9858_v29 = vunpack.i.h.bf16 %v8135_v52  ;;  %v9860_v42 = vunpack.i.l.bf16 %v8135_v52 }
 0x42e   :  { %v8139_v3 = vpop.permute.xlu1 %5014  ;;  %v8141_v23 = vpop.permute.xlu0 %4959 }
 0x42f   :  { %v9861_v48 = vunpack.i.h.bf16 %v8139_v3  ;;  %v8155_v20 = vsel %vm127_vm6, %v9859_v19, %v9858_v29  ;;  %v8163_v6 = vsel %vm127_vm6, %v10310_v37, %v9860_v42  ;;  %v10314_v29 = vunpack.i.l.bf16 %v8139_v3 }
 0x430   :  { %10309 = vst [vmem:[#allocation78_spill] sm:$0xff] %v8155_v20  ;;  %v10315_v19 = vunpack.i.l.bf16 %v8042_v28  ;;  %v10318_v33 = vunpack.i.l.bf16 %v8141_v23 }
 0x431   :  { %10311 = vst [vmem:[#allocation44_spill] sm:$0xff] %v8163_v6  ;;  %v8173_v16 = vsel %vm96_vm7, %v10312_v18, %v9861_v48  ;;  %v9867_v18 = vunpack.i.h.bf16 %v8141_v23 }
 0x432   :  { %10313 = vst [vmem:[#allocation68_spill] sm:$0xff] %v8173_v16  ;;  %v8181_v20 = vsel %vm96_vm7, %v10315_v19, %v10314_v29  ;;  %5249 = vrot.lane.b32.xlu2 %v5248_v24, %s5450_s14  ;;  %v10320_v16 = vunpack.i.h.bf16 %v8073_v8 }
 0x433   :  { %10316 = vst [vmem:[#allocation59_spill] sm:$0xff] %v8181_v20 }
 0x434   :  { %5189 = vrot.lane.b32.xlu1 %v5248_v24, %s5452_s16  ;;  %5199 = vrot.lane.b32.xlu0 %v7844_v54, %s5453_s17  ;;  %v8187_v37 = vpop.permute.xlu2 %5109 }
 0x435   :  { %v9866_v19 = vunpack.i.h.bf16 %v8187_v37  ;;  %v9868_v29 = vunpack.i.l.bf16 %v8187_v37 }
 0x436   :  { %v8191_v48 = vpop.permute.xlu1 %5019  ;;  %v8193_v6 = vpop.permute.xlu0 %4964 }
 0x437   :  { %v9869_v54 = vunpack.i.h.bf16 %v8191_v48  ;;  %v8207_v42 = vsel %vm158_vm5, %v9867_v18, %v9866_v19  ;;  %v8215_v20 = vsel %vm158_vm5, %v10318_v33, %v9868_v29  ;;  %v10322_v26 = vunpack.i.l.bf16 %v8191_v48 }
 0x438   :  { %10317 = vst [vmem:[#allocation75_spill] sm:$0xff] %v8207_v42  ;;  %v10323_v19 = vunpack.i.l.bf16 %v8073_v8  ;;  %v5203_v33 = vpack.i.bf16 %v7913_v56, %v7885_v62  ;;  %v10327_v29 = vunpack.i.l.bf16 %v8193_v6 }
 0x439   :  { %10319 = vst [vmem:[#allocation76_spill] sm:$0xff] %v8215_v20  ;;  %v8223_v52 = vsel %vm127_vm6, %v10320_v16, %v9869_v54 }
 0x43a   :  { %10321 = vst [vmem:[#allocation65_spill] sm:$0xff] %v8223_v52  ;;  %v8231_v18 = vsel %vm127_vm6, %v10323_v19, %v10322_v26  ;;  %5264 = vrot.lane.b32.xlu2 %v5208_v13, %s5450_s14  ;;  %v8282_v19 = vpack.i.bf16 %v7940_v4, %v7985_v35 }
 0x43b   :  { %10324 = vst [vmem:[#allocation56_spill] sm:$0xff] %v8231_v18  ;;  %v10325_v18 = vunpack.i.h.bf16 %v8193_v6 }
 0x43c   :  { %5204 = vrot.lane.b32.xlu1 %v5203_v33, %s5453_s17  ;;  %5214 = vrot.lane.b32.xlu0 %v7801_v10, %s5453_s17  ;;  %v8242_v20 = vpop.permute.xlu2 %5114 }
 0x43d   :  { %v9871_v33 = vunpack.i.h.bf16 %v8242_v20  ;;  %v9872_v10 = vunpack.i.l.bf16 %v8242_v20 }
 0x43e   :  { %v8246_v56 = vpop.permute.xlu1 %5024  ;;  %v8248_v13 = vpop.permute.xlu0 %4969 }
 0x43f   :  { %v9874_v54 = vunpack.i.h.bf16 %v8248_v13  ;;  %v9873_v42 = vunpack.i.l.bf16 %v8248_v13  ;;  %v8264_v52 = vsel %vm189_vm4, %v10325_v18, %v9871_v33  ;;  %v8272_v16 = vsel %vm189_vm4, %v10327_v29, %v9872_v10 }
 0x440   :  { %10326 = vst [vmem:[#allocation72_spill] sm:$0xff] %v8264_v52  ;;  %v10329_v18 = vunpack.i.h.bf16 %v8246_v56  ;;  %v10330_v33 = vunpack.i.h.bf16 %v8087_v22  ;;  %v10332_v29 = vunpack.i.l.bf16 %v8246_v56  ;;  %v10333_v10 = vunpack.i.l.bf16 %v8087_v22 }
 0x441   :  { %10328 = vst [vmem:[#allocation73_spill] sm:$0xff] %v8272_v16  ;;  %v3417_v26 = vsel %vm294_vm3, %v9873_v42, %v9874_v54  ;;  %v5218_v42 = vpack.i.bf16 %v7910_v58, %v7888_v53  ;;  %v10338_v58 = vunpack.i.l.bf16 %v7922_v12 }
 0x442   :  { %v8290_v52 = vsel %vm158_vm5, %v10330_v33, %v10329_v18  ;;  %v8298_v16 = vsel %vm158_vm5, %v10333_v10, %v10332_v29  ;;  %3816 = vmatpush.msra.mxu1 %v3417_v26  ;;  %5274 = vrot.lane.b32.xlu2 %v8282_v19, %s5451_s15  ;;  %v10335_v33 = vunpack.i.h.bf16 %v8051_v49  ;;  %v10336_v18 = vunpack.i.l.bf16 %v8051_v49 }
 0x443   :  { %10331 = vst [vmem:[#allocation69_spill] sm:$0xff] %v8290_v52  ;;  %v10337_v29 = vunpack.i.h.bf16 %v7922_v12  ;;  %v10342_v52 = vunpack.i.l.bf16 %v7972_v27 }
 0x444   :  { %10334 = vst [vmem:[#allocation70_spill] sm:$0xff] %v8298_v16  ;;  %5219 = vrot.lane.b32.xlu1 %v5218_v42, %s5453_s17  ;;  %5229 = vrot.lane.b32.xlu0 %v5248_v24, %s5451_s15  ;;  %v3416_v54 = vsel %vm294_vm3, %v10336_v18, %v10335_v33  ;;  %v8320_v24 = vpop.permute.xlu2 %5159  ;;  %v10340_v16 = vunpack.i.h.bf16 %v7972_v27 }
 0x445   :  { %3817 = vmatpush.msra.mxu1 %v3416_v54  ;;  %v3415_v42 = vsel %vm294_vm3, %v10338_v58, %v10337_v29  ;;  %v9878_v18 = vunpack.i.h.bf16 %v8320_v24  ;;  %v9879_v54 = vunpack.i.l.bf16 %v8320_v24  ;;  %v8352_v29 = vpack.i.bf16 %v8079_v21, %v8076_v15 }
 0x446   :  { %v8324_v53 = vpop.permute.xlu1 %5029  ;;  %v8326_v33 = vpop.permute.xlu0 %4979  ;;  %v10347_v58 = vunpack.i.l.bf16 %v8096_v47  ;;  %v8374_v21 = vpack.i.bf16 %v8049_v44, %v8046_v41  ;;  %v10349_v15 = vunpack.i.h.bf16 %v8042_v28 }
 0x447   :  { %10339 = vst [vmem:[#allocation81_spill] sm:$0xff] %v8324_v53  ;;  %v9882_v26 = vunpack.i.h.bf16 %v8324_v53  ;;  %3818 = vmatpush.msra.mxu1 %v3415_v42  ;;  %v8340_v49 = vsel %vm96_vm7, %v9878_v18, %v10340_v16  ;;  %v8348_v10 = vsel %vm96_vm7, %v9879_v54, %v10342_v52  ;;  %v10344_v42 = vunpack.i.h.bf16 %v8096_v47 }
 0x448   :  { %10341 = vst [vmem:[#allocation66_spill] sm:$0xff] %v8340_v49  ;;  %v10346_v18 = vunpack.i.l.bf16 %v8324_v53  ;;  %v5233_v54 = vpack.i.bf16 %v7891_v31, %v7873_v2  ;;  %v10352_v53 = vunpack.i.l.bf16 %v8042_v28  ;;  %v10357_v2 = vunpack.i.l.bf16 %v7987_v51 }
 0x449   :  { %10343 = vst [vmem:[#allocation67_spill] sm:$0xff] %v8348_v10  ;;  %v8360_v16 = vsel %vm189_vm4, %v10344_v42, %v9882_v26  ;;  %v10350_v42 = vunpack.i.h.bf16 %v8326_v33  ;;  %v10367_v10 = vunpack.i.l.bf16 %v8098_v40  ;;  %v10378_v49 = vunpack.i.h.bf16 %v8111_v30 }
 0x44a   :  { %10345 = vst [vmem:[#allocation28_spill] sm:$0xff] %v8360_v16  ;;  %v8368_v52 = vsel %vm189_vm4, %v10347_v58, %v10346_v18  ;;  %v10353_v18 = vunpack.i.l.bf16 %v8326_v33  ;;  %5309 = vrot.lane.b32.xlu2 %v8352_v29, %s5450_s14 }
 0x44b   :  { %10348 = vst [vmem:[#allocation55_spill] sm:$0xff] %v8368_v52  ;;  %v8382_v26 = vsel %vm96_vm7, %v10350_v42, %v10349_v15  ;;  %v9890_v15 = vunpack.i.h.bf16 %v7987_v51 }
 0x44c   :  { %10351 = vst [vmem:[#allocation83_spill] sm:$0xff] %v8382_v26  ;;  %v8390_v58 = vsel %vm96_vm7, %v10353_v18, %v10352_v53  ;;  %5234 = vrot.lane.b32.xlu1 %v5233_v54, %s5453_s17  ;;  %5244 = vrot.lane.b32.xlu0 %v8374_v21, %s5452_s16  ;;  %v8397_v44 = vpop.permute.xlu2 %5164  ;;  %v8429_v54 = vpack.i.bf16 %v7937_v34, %v7980_v50  ;;  %v10359_v26 = vunpack.i.h.bf16 %v8073_v8 }
 0x44d   :  { %10354 = vst [vmem:[#allocation27_spill] sm:$0xff] %v8390_v58  ;;  %v9889_v53 = vunpack.i.h.bf16 %v8397_v44  ;;  %v9892_v18 = vunpack.i.l.bf16 %v8397_v44 }
 0x44e   :  { %v8401_v42 = vpop.permute.xlu1 %5034  ;;  %v8403_v41 = vpop.permute.xlu0 %4984 }
 0x44f   :  { %10355 = vst [vmem:[#allocation84_spill] sm:$0xff] %v8401_v42  ;;  %v9893_v58 = vunpack.i.h.bf16 %v8403_v41  ;;  %v8417_v28 = vsel %vm127_vm6, %v9889_v53, %v9890_v15  ;;  %v8425_v31 = vsel %vm127_vm6, %v9892_v18, %v10357_v2  ;;  %v10361_v15 = vunpack.i.l.bf16 %v8073_v8 }
 0x450   :  { %10356 = vst [vmem:[#allocation23_spill] sm:$0xff] %v8417_v28  ;;  %v10362_v62 = vunpack.i.l.bf16 %v8403_v41  ;;  %v10364_v18 = vunpack.i.h.bf16 %v8098_v40  ;;  %v10365_v52 = vunpack.i.h.bf16 %v8401_v42 }
 0x451   :  { %10358 = vst [vmem:[#allocation34_spill] sm:$0xff] %v8425_v31  ;;  %v8437_v53 = vsel %vm127_vm6, %v9893_v58, %v10359_v26  ;;  %v10368_v26 = vunpack.i.l.bf16 %v8401_v42 }
 0x452   :  { %10360 = vst [vmem:[#allocation43_spill] sm:$0xff] %v8437_v53  ;;  %v8445_v2 = vsel %vm127_vm6, %v10362_v62, %v10361_v15  ;;  %v8453_v16 = vsel %vm96_vm7, %v10365_v52, %v10364_v18  ;;  %5314 = vrot.lane.b32.xlu2 %v8429_v54, %s5450_s14  ;;  %v4892_v52 = vunpack.i.h.bf16 %v7998_v0 }
 0x453   :  { %10363 = vst [vmem:[#allocation22_spill] sm:$0xff] %v8445_v2  ;;  %v8461_v8 = vsel %vm96_vm7, %v10368_v26, %v10367_v10  ;;  %v10372_v2 = vunpack.i.l.bf16 %v7998_v0 }
 0x454   :  { %10366 = vst [vmem:[#allocation42_spill] sm:$0xff] %v8453_v16  ;;  %5259 = vrot.lane.b32.xlu1 %v8352_v29, %s5452_s16  ;;  %5254 = vrot.lane.b32.xlu0 %v8282_v19, %s5452_s16  ;;  %v8469_v62 = vpop.permute.xlu2 %5169 }
 0x455   :  { %10369 = vst [vmem:[#allocation53_spill] sm:$0xff] %v8461_v8  ;;  %v9896_v10 = vunpack.i.h.bf16 %v8469_v62  ;;  %v9897_v26 = vunpack.i.l.bf16 %v8469_v62  ;;  %v10374_v8 = vunpack.i.h.bf16 %v8087_v22 }
 0x456   :  { %v8473_v15 = vpop.permute.xlu1 %5039  ;;  %v8475_v18 = vpop.permute.xlu0 %4989 }
 0x457   :  { %10370 = vst [vmem:[#allocation25_spill] sm:$0xff] %v8473_v15  ;;  %v4992_v42 = vunpack.i.h.bf16 %v8475_v18  ;;  %v4991_v16 = vunpack.i.l.bf16 %v8475_v18  ;;  %v8487_v40 = vsel %vm158_vm5, %v9896_v10, %v4892_v52  ;;  %v8495_v53 = vsel %vm158_vm5, %v9897_v26, %v10372_v2 }
 0x458   :  { %10371 = vst [vmem:[#allocation26_spill] sm:$0xff] %v8487_v40  ;;  %v10376_v18 = vunpack.i.l.bf16 %v8087_v22  ;;  %v10379_v31 = vunpack.i.h.bf16 %v8473_v15  ;;  %v10381_v26 = vunpack.i.l.bf16 %v8111_v30  ;;  %v10382_v28 = vunpack.i.l.bf16 %v8473_v15 }
 0x459   :  { %10373 = vst [vmem:[#allocation82_spill] sm:$0xff] %v8495_v53  ;;  %v8501_v58 = vsel %vm158_vm5, %v4992_v42, %v10374_v8 }
 0x45a   :  { %10375 = vst [vmem:[#allocation38_spill] sm:$0xff] %v8501_v58  ;;  %v8507_v10 = vsel %vm158_vm5, %v4991_v16, %v10376_v18  ;;  %v8515_v2 = vsel %vm127_vm6, %v10379_v31, %v10378_v49  ;;  %v8523_v8 = vsel %vm127_vm6, %v10382_v28, %v10381_v26  ;;  %5329 = vrot.lane.b32.xlu2 %v8352_v29, %s5453_s17  ;;  %v4897_v31 = vunpack.i.h.bf16 %v8015_v9 }
 0x45b   :  { %10377 = vst [vmem:[#allocation37_spill] sm:$0xff] %v8507_v10  ;;  %v4896_v10 = vunpack.i.l.bf16 %v8015_v9  ;;  %v10384_v28 = vunpack.i.h.bf16 %v8096_v47 }
 0x45c   :  { %10380 = vst [vmem:[#allocation40_spill] sm:$0xff] %v8515_v2  ;;  %5284 = vrot.lane.b32.xlu1 %v8374_v21, %s5450_s14  ;;  %5269 = vrot.lane.b32.xlu0 %v8374_v21, %s5451_s15  ;;  %v8531_v22 = vpop.permute.xlu2 %5174 }
 0x45d   :  { %10383 = vst [vmem:[#allocation45_spill] sm:$0xff] %v8523_v8  ;;  %v9900_v18 = vunpack.i.h.bf16 %v8531_v22 }
 0x45e   :  { %v8534_v49 = vpop.permute.xlu1 %5044  ;;  %v4995_v30 = vpop.permute.xlu0 %4994 }
 0x45f   :  { %v9901_v26 = vunpack.i.h.bf16 %v8534_v49  ;;  %v4997_v15 = vunpack.i.h.bf16 %v4995_v30  ;;  %v4996_v2 = vunpack.i.l.bf16 %v4995_v30  ;;  %v3014_v58 = vsel %vm189_vm4, %v9900_v18, %v4897_v31 }
 0x460   :  { %3795 = vmatpush.msra.mxu2 %v3014_v58  ;;  %v10385_v30 = vunpack.i.l.bf16 %v8096_v47  ;;  %v10386_v18 = vunpack.i.l.bf16 %v8531_v22  ;;  %v10387_v58 = vunpack.i.h.bf16 %v8141_v23  ;;  %v10388_v47 = vunpack.i.l.bf16 %v8141_v23 }
 0x461   :  { %v3010_v40 = vsel %vm189_vm4, %v4897_v31, %v4997_v15  ;;  %v8552_v8 = vsel %vm189_vm4, %v4997_v15, %v10384_v28  ;;  %v10389_v31 = vunpack.i.l.bf16 %v8534_v49  ;;  %v9902_v28 = vunpack.i.h.bf16 %v7970_v63 }
 0x462   :  { %v8558_v9 = vsel %vm189_vm4, %v4996_v2, %v10385_v30  ;;  %3855 = vmatpush.msra.mxu3 %v3010_v40  ;;  %v3013_v53 = vsel %vm189_vm4, %v10386_v18, %v4896_v10  ;;  %v8570_v15 = vsel %vm158_vm5, %v9901_v26, %v10387_v58  ;;  %v9904_v18 = vunpack.i.l.bf16 %v8032_v39 }
 0x463   :  { %v8578_v40 = vsel %vm158_vm5, %v10389_v31, %v10388_v47  ;;  %3796 = vmatpush.msra.mxu2 %v3013_v53  ;;  %v3009_v23 = vsel %vm189_vm4, %v4896_v10, %v4996_v2  ;;  %v9903_v30 = vunpack.i.l.bf16 %v7970_v63  ;;  %v10390_v53 = vunpack.i.h.bf16 %v8032_v39 }
 0x464   :  { %5294 = vrot.lane.b32.xlu1 %v8429_v54, %s5452_s16  ;;  %5279 = vrot.lane.b32.xlu0 %v8352_v29, %s5451_s15  ;;  %v10391_v2 = vunpack.i.h.bf16 %v8193_v6  ;;  %s4168_s16 = sshll.u32 %s9682_s8, 4  ;;  %s4169_s16 = int_to_ptr.hbm [resolvable:$true] %s4168_s16 }
 0x465   :  { %3856 = vmatpush.msra.mxu3 %v3009_v23  ;;  %v3008_v31 = vsel %vm189_vm4, %v10390_v53, %v9902_v28  ;;  %v3007_v10 = vsel %vm189_vm4, %v9904_v18, %v9903_v30  ;;  %v9908_v53 = vunpack.i.h.bf16 %v8007_v17  ;;  %v10392_v28 = vunpack.i.l.bf16 %v8193_v6 }
 0x466   :  { %v8589_v58 = vpop.permute.xlu1 %5049  ;;  %v8591_v47 = vpop.permute.xlu0 %4999  ;;  %v9905_v30 = vunpack.i.h.bf16 %v7961_v1  ;;  %v9910_v18 = vunpack.i.l.bf16 %v8007_v17 }
 0x467   :  { %v9907_v26 = vunpack.i.h.bf16 %v8589_v58  ;;  %v9906_v29 = vunpack.i.l.bf16 %v8589_v58  ;;  %3857 = vmatpush.msra.mxu3 %v3008_v31  ;;  %v2890_v31 = vsel %vm158_vm5, %v4892_v52, %v4992_v42  ;;  %v10393_v42 = vunpack.i.l.bf16 %v7998_v0 }
 0x468   :  { %v9909_v52 = vunpack.i.l.bf16 %v7961_v1 }
 0x469   :  { %3858 = vmatpush.msra.mxu3 %v3007_v10  ;;  %v8613_v23 = vsel %vm189_vm4, %v9907_v26, %v10391_v2  ;;  %v8624_v10 = vsel %vm189_vm4, %v9906_v29, %v10392_v28  ;;  %v2889_v6 = vsel %vm158_vm5, %v10393_v42, %v4991_v16  ;;  %v9919_v16 = vunpack.i.h.bf16 %v8107_v25 }
 0x46a   :  { %v2887_v42 = vsel %vm158_vm5, %v9910_v18, %v9909_v52  ;;  %v9913_v29 = vunpack.i.l.bf16 %v7994_v45  ;;  %v10394_v26 = vunpack.i.h.bf16 %v8403_v41  ;;  %v9915_v18 = vunpack.i.h.bf16 %v7952_v55 }
 0x46b   :  { %3859 = vmatpush.msra.mxu3 %v2890_v31  ;;  %v9914_v31 = vunpack.i.l.bf16 %v8107_v25 }
 0x46c   :  { %5299 = vrot.lane.b32.xlu1 %v8429_v54, %s5451_s15  ;;  %5289 = vrot.lane.b32.xlu0 %v8374_v21, %s5453_s17  ;;  %v2888_v54 = vsel %vm158_vm5, %v9908_v53, %v9905_v30  ;;  %v9918_v30 = vunpack.i.h.bf16 %v7994_v45  ;;  %v10395_v53 = vunpack.i.h.bf16 %v7987_v51 }
 0x46d   :  { %3860 = vmatpush.msra.mxu3 %v2889_v6 }
 0x46e   :  { %v8637_v28 = vpop.permute.xlu1 %5059  ;;  %v8639_v2 = vpop.permute.xlu0 %5009  ;;  %v2770_v52 = vsel %vm127_vm6, %v10395_v53, %v10394_v26  ;;  %v3297_v26 = vsel %vm263_vm1, %v9914_v31, %v9919_v16  ;;  %v10396_v53 = vunpack.i.l.bf16 %v8403_v41  ;;  %v10398_v41 = vunpack.i.h.bf16 %v7996_v46  ;;  %v8783_v16 = vld [vmem:[%s9680_s6] sm:$0xff] }
 0x46f   :  { %v9912_v21 = vunpack.i.h.bf16 %v8639_v2  ;;  %v9911_v0 = vunpack.i.l.bf16 %v8639_v2  ;;  %3861 = vmatpush.msra.mxu3 %v2888_v54  ;;  %v10400_v31 = vunpack.i.l.bf16 %v7996_v46 }
 0x471   :  { %3862 = vmatpush.msra.mxu3 %v2887_v42  ;;  %v3298_v54 = vsel %vm263_vm1, %v9911_v0, %v9912_v21  ;;  %v5318_v42 = vpack.i.bf16 %v7980_v50, %v7937_v34  ;;  %v9916_v0 = vunpack.i.h.bf16 %v8089_v38 }
 0x472   :  { %3819 = vmatpush.msra.mxu1 %v3298_v54 }
 0x473   :  { %3863 = vmatpush.msra.mxu3 %v2770_v52  ;;  %v10397_v52 = vunpack.i.l.bf16 %v7987_v51  ;;  %v3296_v51 = vsel %vm263_vm1, %v9913_v29, %v9918_v30  ;;  %v9924_v30 = vunpack.i.h.bf16 %v7934_v59 }
 0x474   :  { %5304 = vrot.lane.b32.xlu1 %v8282_v19, %s5450_s14  ;;  %5319 = vrot.lane.b32.xlu0 %v5318_v42, %s5453_s17  ;;  %v9917_v19 = vunpack.i.l.bf16 %v7952_v55  ;;  %v9921_v42 = vunpack.i.h.bf16 %v8591_v47 }
 0x475   :  { %v2769_v54 = vsel %vm127_vm6, %v10397_v52, %v10396_v53  ;;  %3820 = vmatpush.msra.mxu1 %v3297_v26  ;;  %v2768_v26 = vsel %vm127_vm6, %v10398_v41, %v9915_v18  ;;  %v9920_v53 = vunpack.i.h.bf16 %v8028_v5  ;;  %v9923_v52 = vunpack.i.l.bf16 %v8591_v47  ;;  %v3786_v18 = vld [vmem:[%s9681_s7] sm:$0xff] }
 0x476   :  { %3864 = vmatpush.msra.mxu3 %v2769_v54  ;;  %v8695_v6 = vpop.permute.xlu1 %5084  ;;  %v8697_v21 = vpop.permute.xlu0 %5094  ;;  %v10399_v54 = vunpack.i.l.bf16 %v8089_v38  ;;  %v2767_v41 = vsel %vm127_vm6, %v10400_v31, %v9917_v19 }
 0x477   :  { %3821 = vmatpush.msra.mxu1 %v3296_v51  ;;  %v3178_v31 = vsel %vm232_vm0, %v9920_v53, %v9921_v42  ;;  %v9930_v51 = vunpack.i.h.bf16 %v7982_v11  ;;  %v10404_v53 = vunpack.i.l.bf16 %v7972_v27 }
 0x478   :  { %3865 = vmatpush.msra.mxu3 %v2768_v26  ;;  %v3295_v29 = vsel %vm263_vm1, %v10399_v54, %v9916_v0  ;;  %v5323_v26 = vpack.i.bf16 %v7985_v35, %v7940_v4  ;;  %v9922_v0 = vunpack.i.l.bf16 %v8028_v5  ;;  %v9925_v54 = vunpack.i.l.bf16 %v8061_v36 }
 0x479   :  { %3822 = vmatpush.msra.mxu1 %v3295_v29  ;;  %v10401_v29 = vunpack.i.h.bf16 %v8326_v33  ;;  %v10439_v35 = vunpack.i.h.bf16 %v8591_v47 }
 0x47a   :  { %3866 = vmatpush.msra.mxu3 %v2767_v41  ;;  %v10402_v41 = vunpack.i.h.bf16 %v7972_v27  ;;  %v10406_v27 = vunpack.i.h.bf16 %v7975_v7 }
 0x47b   :  { %3823 = vmatpush.msra.mxu1 %v3178_v31  ;;  %v9927_v31 = vunpack.i.l.bf16 %v7934_v59 }
 0x47c   :  { %v2650_v19 = vsel %vm96_vm7, %v10402_v41, %v10401_v29  ;;  %5324 = vrot.lane.b32.xlu1 %v5323_v26, %s5453_s17  ;;  %3789 = vperm.xlu0 %4370, %v3786_v18   ;;  %v3177_v29 = vsel %vm232_vm0, %v9922_v0, %v9923_v52  ;;  %v10403_v41 = vunpack.i.l.bf16 %v8326_v33  ;;  %v9926_v18 = vunpack.i.l.bf16 %v7982_v11 }
 0x47d   :  { %3867 = vmatpush.msra.mxu3 %v2650_v19  ;;  %3824 = vmatpush.msra.mxu1 %v3177_v29  ;;  %v10405_v0 = vunpack.i.h.bf16 %v8061_v36  ;;  %v10464_v36 = vld [vmem:[#allocation20_spill] sm:$0xff] }
 0x47e   :  { %v2649_v19 = vsel %vm96_vm7, %v10404_v53, %v10403_v41  ;;  %v8764_v26 = vpop.permute.xlu1 %5089  ;;  %v5120_v42 = vpop.permute.xlu0 %5119  ;;  %v2648_v53 = vsel %vm96_vm7, %v10406_v27, %v9924_v30  ;;  %v10407_v27 = vunpack.i.l.bf16 %v7975_v7  ;;  %v10409_v30 = vunpack.i.h.bf16 %v8139_v3 }
 0x47f   :  { %3868 = vmatpush.msra.mxu3 %v2649_v19  ;;  %v3176_v33 = vsel %vm232_vm0, %v10405_v0, %v9930_v51  ;;  %v9928_v29 = vunpack.i.h.bf16 %v8764_v26  ;;  %v9929_v41 = vunpack.i.l.bf16 %v8764_v26  ;;  %v5122_v19 = vunpack.i.h.bf16 %v5120_v42 }
 0x480   :  { %v5121_v52 = vunpack.i.l.bf16 %v5120_v42  ;;  %3825 = vmatpush.msra.mxu1 %v3176_v33  ;;  %v3175_v0 = vsel %vm232_vm0, %v9925_v54, %v9926_v18  ;;  %v2647_v42 = vsel %vm96_vm7, %v10407_v27, %v9927_v31  ;;  %v10408_v33 = vunpack.i.h.bf16 %v8003_v14 }
 0x481   :  { %3869 = vmatpush.msra.mxu3 %v2648_v53  ;;  %v8807_v54 = vsel %vm96_vm7, %v10409_v30, %v5122_v19  ;;  %v9931_v18 = vunpack.i.h.bf16 %v8025_v60  ;;  %v10413_v30 = vunpack.i.l.bf16 %v8320_v24  ;;  %v10429_v51 = vunpack.i.h.bf16 %v8697_v21 }
 0x482   :  { %3826 = vmatpush.msra.mxu1 %v3175_v0  ;;  %v3414_v53 = vsel %vm294_vm3, %v10408_v33, %v9929_v41  ;;  %v10410_v0 = vunpack.i.l.bf16 %v8139_v3  ;;  %v10415_v3 = vunpack.i.h.bf16 %v8248_v13  ;;  %v10417_v41 = vld [vmem:[#allocation60_spill] sm:$0xff] }
 0x483   :  { %3870 = vmatpush.msra.mxu3 %v2647_v42  ;;  %3875 = vmatpush.msra.mxu0 %v3414_v53  ;;  %v10411_v42 = vunpack.i.h.bf16 %v8320_v24  ;;  %v8827_v31 = vsel %vm96_vm7, %v5121_v52, %v10413_v30  ;;  %v10418_v24 = vld [vmem:[#allocation41_spill] sm:$0xff] }
 0x484   :  { %3871 = vmatmul.f32.vlgmr.msra.gmra.mxu3 %v8783_v16  ;;  %v8815_v27 = vsel %vm96_vm7, %v10410_v0, %v5121_v52  ;;  %10414 = vst [vmem:[#allocation15_spill] sm:$0xff] %v8827_v31  ;;  %3827 = vmatpush.msra.mxu1 %v7818_v61  ;;  %v3413_v53 = vsel %vm294_vm3, %v10415_v3, %v9928_v29  ;;  %v8836_v0 = vpop.permute.xlu2 %5179  ;;  %v10416_v61 = vunpack.i.h.bf16 %v7922_v12  ;;  %v10430_v31 = vunpack.i.h.bf16 %v8107_v25 }
 0x485   :  { %v8821_v33 = vsel %vm96_vm7, %v5122_v19, %v10411_v42  ;;  %3876 = vmatpush.msra.mxu0 %v3413_v53  ;;  %v9932_v19 = vunpack.i.l.bf16 %v8697_v21 }
 0x486   :  { %10412 = vst [vmem:[#allocation14_spill] sm:$0xff] %v8821_v33  ;;  %3828 = vmatpush.msra.mxu1 %v7815_v57  ;;  %v8841_v52 = vpop.permute.xlu1 %5139  ;;  %v5125_v42 = vpop.permute.xlu0 %5124  ;;  %v3411_v30 = vsel %vm294_vm3, %v10416_v61, %v9931_v18  ;;  %v8864_v18 = vld [vmem:[%s9680_s6 + $0x8] sm:$0xff] }
 0x487   :  { %3877 = vmatpush.msra.mxu0 %v8071_v43  ;;  %v9933_v3 = vunpack.i.h.bf16 %v8841_v52  ;;  %v5127_v29 = vunpack.i.h.bf16 %v5125_v42  ;;  %v5126_v57 = vunpack.i.l.bf16 %v5125_v42  ;;  %v10419_v43 = vunpack.i.h.bf16 %v8639_v2 }
 0x488   :  { %3829 = vmatpush.msra.mxu1 %v10417_v41  ;;  %v10420_v42 = vunpack.i.h.bf16 %v8191_v48 }
 0x489   :  { %3878 = vmatpush.msra.mxu0 %v3411_v30  ;;  %v3294_v61 = vsel %vm263_vm1, %v10419_v43, %v9932_v19  ;;  %v10422_v43 = vunpack.i.h.bf16 %v8397_v44 }
 0x48a   :  { %3830 = vmatpush.msra.mxu1 %v10418_v24  ;;  %v8870_v41 = vsel %vm127_vm6, %v10420_v42, %v5127_v29  ;;  %v10421_v24 = vunpack.i.l.bf16 %v8191_v48  ;;  %v10424_v42 = vunpack.i.l.bf16 %v8397_v44  ;;  %v10431_v44 = vunpack.i.l.bf16 %v8841_v52 }
 0x48b   :  { %3879 = vmatpush.msra.mxu0 %v3294_v61  ;;  %3831 = vmatmul.f32.vlgmr.msra.gmra.mxu1 %v8864_v18  ;;  %v8884_v19 = vsel %vm127_vm6, %v5127_v29, %v10422_v43  ;;  %v3293_v29 = vsel %vm263_vm1, %v10430_v31, %v10429_v51 }
 0x48c   :  { %v8876_v30 = vsel %vm127_vm6, %v10421_v24, %v5126_v57  ;;  %10423 = vst [vmem:[#allocation16_spill] sm:$0xff] %v8884_v19  ;;  %v8890_v48 = vsel %vm127_vm6, %v5126_v57, %v10424_v42  ;;  %v10426_v24 = vld [vmem:[#allocation58_spill] sm:$0xff] }
 0x48d   :  { %10425 = vst [vmem:[#allocation21_spill] sm:$0xff] %v8890_v48  ;;  %v10427_v53 = vunpack.i.h.bf16 %v10426_v24  ;;  %v10432_v57 = vunpack.i.l.bf16 %v10426_v24  ;;  %3880 = vmatpush.msra.mxu0 %v3293_v29  ;;  %v10436_v24 = vunpack.i.h.bf16 %v8637_v28  ;;  %v10468_v48 = vunpack.i.l.bf16 %v8032_v39 }
 0x48e   :  { %v8922_v31 = vpop.permute.xlu1 %5144  ;;  %v5130_v4 = vpop.permute.xlu0 %5129 }
 0x48f   :  { %v8898_v61 = vsel %vm96_vm7, %v10427_v53, %v9933_v3  ;;  %v8912_v43 = vsel %vm96_vm7, %v10432_v57, %v10431_v44  ;;  %v10434_v53 = vunpack.i.l.bf16 %v8637_v28  ;;  %v10435_v3 = vunpack.i.h.bf16 %v7994_v45  ;;  %v8930_v57 = vpop.permute.xlu2 %5194 }
 0x490   :  { %10428 = vst [vmem:[#allocation24_spill] sm:$0xff] %v8898_v61  ;;  %v10437_v44 = vunpack.i.h.bf16 %v8089_v38  ;;  %v9937_v42 = vunpack.i.h.bf16 %v8922_v31  ;;  %v10484_v38 = vld [vmem:[#allocation66_spill] sm:$0xff] }
 0x491   :  { %10433 = vst [vmem:[#allocation35_spill] sm:$0xff] %v8912_v43  ;;  %v3292_v61 = vsel %vm263_vm1, %v10435_v3, %v10434_v53  ;;  %v5132_v3 = vunpack.i.h.bf16 %v5130_v4  ;;  %v5131_v53 = vunpack.i.l.bf16 %v5130_v4  ;;  %v10441_v43 = vunpack.i.l.bf16 %v8246_v56 }
 0x492   :  { %3881 = vmatpush.msra.mxu0 %v3292_v61  ;;  %v3291_v29 = vsel %vm263_vm1, %v10437_v44, %v10436_v24  ;;  %v10438_v61 = vunpack.i.h.bf16 %v8695_v6  ;;  %v10440_v24 = vunpack.i.h.bf16 %v8246_v56  ;;  %v10445_v56 = vld [vmem:[#allocation29_spill] sm:$0xff] }
 0x493   :  { %v8951_v4 = vsel %vm158_vm5, %v10441_v43, %v5131_v53  ;;  %v10449_v34 = vunpack.i.l.bf16 %v10445_v56 }
 0x494   :  { %3882 = vmatpush.msra.mxu0 %v3291_v29  ;;  %v3174_v33 = vsel %vm232_vm0, %v10439_v35, %v10438_v61  ;;  %v8945_v44 = vsel %vm158_vm5, %v10440_v24, %v5132_v3  ;;  %v10442_v29 = vunpack.i.h.bf16 %v8469_v62  ;;  %v10443_v35 = vunpack.i.l.bf16 %v8469_v62 }
 0x495   :  { %v10446_v24 = vunpack.i.h.bf16 %v10445_v56 }
 0x496   :  { %3883 = vmatpush.msra.mxu0 %v3174_v33  ;;  %v8957_v51 = vsel %vm158_vm5, %v5132_v3, %v10442_v29  ;;  %v8963_v61 = vsel %vm158_vm5, %v5131_v53, %v10443_v35  ;;  %v10448_v33 = vunpack.i.l.bf16 %v8922_v31  ;;  %v10451_v53 = vunpack.i.l.bf16 %v8836_v0  ;;  %v5150_v50 = vpop.permute.xlu1 %5149 }
 0x497   :  { %10444 = vst [vmem:[#allocation60_spill] sm:$0xff] %v8963_v61  ;;  %v8971_v43 = vsel %vm127_vm6, %v10446_v24, %v9937_v42  ;;  %v10452_v29 = vunpack.i.l.bf16 %v8591_v47  ;;  %v10453_v24 = vunpack.i.h.bf16 %v8836_v0  ;;  %v10454_v42 = vunpack.i.h.bf16 %v7982_v11  ;;  %v10610_v32 = vld [vmem:[#allocation24_spill] sm:$0xff] }
 0x498   :  { %10447 = vst [vmem:[#allocation41_spill] sm:$0xff] %v8971_v43  ;;  %v8979_v3 = vsel %vm127_vm6, %v10449_v34, %v10448_v33  ;;  %v8994_v34 = vpop.permute.xlu0 %5134  ;;  %v5152_v33 = vunpack.i.h.bf16 %v5150_v50  ;;  %v5151_v62 = vunpack.i.l.bf16 %v5150_v50  ;;  %v10456_v47 = vunpack.i.l.bf16 %v7982_v11  ;;  %v10462_v11 = vld [vmem:[#allocation50_spill] sm:$0xff] }
 0x499   :  { %10450 = vst [vmem:[#allocation58_spill] sm:$0xff] %v8979_v3  ;;  %v3173_v35 = vsel %vm232_vm0, %v10452_v29, %v10451_v53  ;;  %v3172_v56 = vsel %vm232_vm0, %v10454_v42, %v10453_v24  ;;  %v10455_v3 = vunpack.i.l.bf16 %v8695_v6  ;;  %v9002_v29 = vpop.permute.xlu2 %5209  ;;  %v10458_v42 = vunpack.i.h.bf16 %v8187_v37 }
 0x49a   :  { %3884 = vmatpush.msra.mxu0 %v3173_v35  ;;  %v10457_v35 = vld [vmem:[#allocation39_spill] sm:$0xff]  ;;  %v10460_v50 = vunpack.i.l.bf16 %v8187_v37 }
 0x49b   :  { %v3171_v53 = vsel %vm232_vm0, %v10456_v47, %v10455_v3  ;;  %v9009_v24 = vsel %vm158_vm5, %v10458_v42, %v5152_v33  ;;  %v10465_v42 = vunpack.i.h.bf16 %v8032_v39  ;;  %v10471_v39 = vunpack.i.h.bf16 %v8007_v17 }
 0x49c   :  { %3885 = vmatpush.msra.mxu0 %v3172_v56  ;;  %10459 = vst [vmem:[#allocation29_spill] sm:$0xff] %v9009_v24  ;;  %v9015_v56 = vsel %vm158_vm5, %v10460_v50, %v5151_v62  ;;  %v10466_v50 = vunpack.i.h.bf16 %v8242_v20 }
 0x49d   :  { %10461 = vst [vmem:[#allocation39_spill] sm:$0xff] %v9015_v56 }
 0x49e   :  { %3886 = vmatpush.msra.mxu0 %v3171_v53  ;;  %v5155_v3 = vpop.permute.xlu1 %5154  ;;  %v10463_v53 = vld [vmem:[#allocation19_spill] sm:$0xff] }
 0x49f   :  { %v5156_v43 = vunpack.i.l.bf16 %v5155_v3 }
 0x4a0   :  { %3887 = vmatpush.msra.mxu0 %v10457_v35  ;;  %v9018_v47 = vpop.permute.xlu0 %5184  ;;  %v5157_v35 = vunpack.i.h.bf16 %v5155_v3 }
 0x4a1   :  { %v9951_v25 = vunpack.i.l.bf16 %v9018_v47 }
 0x4a2   :  { %3888 = vmatpush.msra.mxu0 %v10462_v11  ;;  %v3012_v37 = vsel %vm189_vm4, %v5157_v35, %v10465_v42  ;;  %v9031_v11 = vsel %vm189_vm4, %v10466_v50, %v5157_v35  ;;  %v3011_v42 = vsel %vm189_vm4, %v5156_v43, %v10468_v48  ;;  %v10469_v35 = vld [vmem:[#allocation26_spill] sm:$0xff]  ;;  %v2892_v48 = vsel %vm158_vm5, %v5152_v33, %v10471_v39 }
 0x4a3   :  { %3797 = vmatpush.msra.mxu2 %v3012_v37  ;;  %v10470_v50 = vld [vmem:[#allocation82_spill] sm:$0xff]  ;;  %v10474_v33 = vunpack.i.h.bf16 %v8764_v26 }
 0x4a4   :  { %3889 = vmatpush.msra.mxu0 %v10463_v53  ;;  %v10467_v53 = vunpack.i.l.bf16 %v8242_v20 }
 0x4a5   :  { %3798 = vmatpush.msra.mxu2 %v3011_v42 }
 0x4a6   :  { %3890 = vmatpush.msra.mxu0 %v10464_v36  ;;  %v9037_v3 = vsel %vm189_vm4, %v10467_v53, %v5156_v43  ;;  %v9039_v36 = vpop.permute.xlu2 %5224  ;;  %v9045_v19 = vpop.permute.xlu1 %5189  ;;  %v10472_v43 = vunpack.i.l.bf16 %v8764_v26  ;;  %v5187_v26 = vunpack.i.h.bf16 %v9018_v47 }
 0x4a7   :  { %3891 = vmatmul.f32.vlgmr.msra.gmra.mxu0 %v8864_v18  ;;  %3799 = vmatpush.msra.mxu2 %v10469_v35  ;;  %v9943_v20 = vunpack.i.h.bf16 %v9045_v19  ;;  %v9944_v37 = vunpack.i.l.bf16 %v9045_v19  ;;  %v9945_v35 = vunpack.i.h.bf16 %v9002_v29 }
 0x4a8   :  { %v9047_v5 = vpop.permute.xlu0 %5199 }
 0x4a9   :  { %3800 = vmatpush.msra.mxu2 %v10470_v50  ;;  %v3410_v42 = vsel %vm294_vm3, %v10472_v43, %v9944_v37  ;;  %v10473_v50 = vunpack.i.l.bf16 %v8007_v17  ;;  %v3409_v39 = vsel %vm294_vm3, %v10474_v33, %v9943_v20  ;;  %v10476_v43 = vunpack.i.l.bf16 %v8025_v60 }
 0x4aa   :  { %3935 = vmatpush.msrb.mxu3 %v3410_v42  ;;  %v10480_v20 = vunpack.i.h.bf16 %v7996_v46 }
 0x4ab   :  { %3801 = vmatpush.msra.mxu2 %v2892_v48  ;;  %v2891_v53 = vsel %vm158_vm5, %v5151_v62, %v10473_v50  ;;  %v10475_v48 = vunpack.i.l.bf16 %v9002_v29  ;;  %v10477_v50 = vld [vmem:[#allocation23_spill] sm:$0xff] }
 0x4ac   :  { %3936 = vmatpush.msrb.mxu3 %v3409_v39  ;;  %v10478_v39 = vunpack.i.h.bf16 %v8025_v60 }
 0x4ad   :  { %3802 = vmatpush.msra.mxu2 %v2891_v53  ;;  %v3408_v17 = vsel %vm294_vm3, %v10476_v43, %v10475_v48  ;;  %v10479_v43 = vld [vmem:[#allocation34_spill] sm:$0xff] }
 0x4ae   :  { %v9075_v56 = vpop.permute.xlu2 %5239  ;;  %v9083_v42 = vpop.permute.xlu1 %5204  ;;  %3937 = vmatpush.msrb.mxu3 %v3408_v17  ;;  %v3407_v48 = vsel %vm294_vm3, %v10478_v39, %v9945_v35  ;;  %v10481_v17 = vunpack.i.h.bf16 %v8922_v31  ;;  %v10482_v39 = vunpack.i.l.bf16 %v7996_v46 }
 0x4af   :  { %3803 = vmatpush.msra.mxu2 %v10477_v50  ;;  %v9947_v53 = vunpack.i.h.bf16 %v9083_v42  ;;  %v5206_v33 = vunpack.i.l.bf16 %v9083_v42  ;;  %v9952_v61 = vunpack.i.l.bf16 %v9075_v56 }
 0x4b0   :  { %v9085_v62 = vpop.permute.xlu0 %5214  ;;  %3938 = vmatpush.msrb.mxu3 %v3407_v48  ;;  %v2772_v50 = vsel %vm127_vm6, %v10481_v17, %v10480_v20  ;;  %v10483_v48 = vunpack.i.l.bf16 %v8922_v31  ;;  %v5197_v20 = vunpack.i.h.bf16 %v8930_v57 }
 0x4b1   :  { %3804 = vmatpush.msra.mxu2 %v10479_v43  ;;  %v3534_v37 = vsel %vm325_vm2, %v5187_v26, %v5206_v33  ;;  %v3530_v60 = vsel %vm325_vm2, %v5206_v33, %v9947_v53  ;;  %v10487_v53 = vunpack.i.h.bf16 %v8841_v52 }
 0x4b2   :  { %3907 = vmatpush.msrb.mxu0 %v3534_v37  ;;  %3967 = vmatpush.msrb.mxu1 %v3530_v60  ;;  %v2771_v43 = vsel %vm127_vm6, %v10483_v48, %v10482_v39  ;;  %v5202_v37 = vunpack.i.h.bf16 %v9047_v5  ;;  %v5226_v39 = vunpack.i.l.bf16 %v9039_v36  ;;  %v10488_v60 = vunpack.i.l.bf16 %v8697_v21 }
 0x4b3   :  { %3805 = vmatpush.msra.mxu2 %v2772_v50 }
 0x4b5   :  { %3806 = vmatpush.msra.mxu2 %v2771_v43  ;;  %v10485_v43 = vld [vmem:[#allocation67_spill] sm:$0xff] }
 0x4b6   :  { %v9117_v17 = vpop.permute.xlu1 %5219  ;;  %v9122_v33 = vpop.permute.xlu2 %5249 }
 0x4b7   :  { %3807 = vmatpush.msra.mxu2 %v10484_v38  ;;  %v5221_v31 = vunpack.i.l.bf16 %v9117_v17  ;;  %v10486_v38 = vunpack.i.h.bf16 %v7975_v7  ;;  %v10489_v48 = vunpack.i.h.bf16 %v9117_v17 }
 0x4b8   :  { %v9119_v35 = vpop.permute.xlu0 %5229 }
 0x4b9   :  { %v9950_v50 = vunpack.i.l.bf16 %v9119_v35  ;;  %3808 = vmatpush.msra.mxu2 %v10485_v43  ;;  %v2652_v24 = vsel %vm96_vm7, %v10487_v53, %v10486_v38  ;;  %v3533_v46 = vsel %vm325_vm2, %v5197_v20, %v5221_v31  ;;  %v3529_v43 = vsel %vm325_vm2, %v5221_v31, %v10489_v48 }
 0x4ba   :  { %3908 = vmatpush.msrb.mxu0 %v3533_v46  ;;  %3968 = vmatpush.msrb.mxu1 %v3529_v43  ;;  %v10490_v53 = vunpack.i.l.bf16 %v7975_v7  ;;  %v10491_v38 = vunpack.i.l.bf16 %v8841_v52  ;;  %v9953_v31 = vunpack.i.l.bf16 %v8930_v57  ;;  %v5242_v48 = vunpack.i.h.bf16 %v9075_v56 }
 0x4bb   :  { %v3290_v45 = vsel %vm263_vm1, %v10488_v60, %v9950_v50  ;;  %3809 = vmatpush.msra.mxu2 %v2652_v24  ;;  %v3532_v50 = vsel %vm325_vm2, %v5202_v37, %v5226_v39  ;;  %v10492_v24 = vunpack.i.h.bf16 %v9119_v35  ;;  %v10494_v52 = vunpack.i.h.bf16 %v9039_v36 }
 0x4bc   :  { %3939 = vmatpush.msrb.mxu3 %v3290_v45  ;;  %v2651_v60 = vsel %vm96_vm7, %v10491_v38, %v10490_v53  ;;  %3909 = vmatpush.msrb.mxu0 %v3532_v50  ;;  %v10493_v45 = vunpack.i.h.bf16 %v8697_v21  ;;  %v5251_v43 = vunpack.i.l.bf16 %v9122_v33  ;;  %v5201_v53 = vunpack.i.l.bf16 %v9047_v5 }
 0x4bd   :  { %3810 = vmatpush.msra.mxu2 %v2651_v60  ;;  %v3528_v46 = vsel %vm325_vm2, %v5226_v39, %v10494_v52  ;;  %v3538_v21 = vsel %vm325_vm2, %v9951_v25, %v5187_v26  ;;  %v10495_v39 = vunpack.i.l.bf16 %v8637_v28  ;;  %v9957_v52 = vunpack.i.l.bf16 %v9085_v62 }
 0x4be   :  { %v3289_v7 = vsel %vm263_vm1, %v10493_v45, %v10492_v24  ;;  %3969 = vmatpush.msrb.mxu1 %v3528_v46  ;;  %3811 = vmatmul.f32.vlgmr.msra.gmra.mxu2 %v8783_v16  ;;  %v9179_v50 = vpop.permute.xlu1 %5234  ;;  %v5217_v24 = vunpack.i.h.bf16 %v9085_v62  ;;  %v3537_v46 = vsel %vm325_vm2, %v9953_v31, %v5197_v20  ;;  %v5252_v25 = vunpack.i.h.bf16 %v9122_v33 }
 0x4bf   :  { %3940 = vmatpush.msrb.mxu3 %v3289_v7  ;;  %v3288_v60 = vsel %vm263_vm1, %v10495_v39, %v9952_v61  ;;  %3847 = vmatpush.msrb.mxu2 %v3538_v21  ;;  %v9954_v45 = vunpack.i.h.bf16 %v9179_v50  ;;  %v5236_v7 = vunpack.i.l.bf16 %v9179_v50  ;;  %v10496_v39 = vunpack.i.h.bf16 %v8637_v28  ;;  %v9205_v61 = vpop.permute.xlu2 %5264  ;;  %v9216_v28 = vld [vmem:[%s9680_s6 + $0x10] sm:$0xff]  ;;  %s5455_s6 = smov [#allocation10]  }
 0x4c0   :  { %v9181_v38 = vpop.permute.xlu0 %5244  ;;  %s4166_s13 = sshll.u32 %s5455_s6, 4  ;;  %s4167_s13 = int_to_ptr.vmem [resolvable:$true] %s4166_s13 }
 0x4c1   :  { %v5246_v26 = vunpack.i.l.bf16 %v9181_v38  ;;  %3941 = vmatpush.msrb.mxu3 %v3288_v60  ;;  %v3287_v21 = vsel %vm263_vm1, %v10496_v39, %v5242_v48  ;;  %3848 = vmatpush.msrb.mxu2 %v3537_v46  ;;  %v3531_v60 = vsel %vm325_vm2, %v5217_v24, %v5236_v7  ;;  %v3527_v20 = vsel %vm325_vm2, %v5236_v7, %v9954_v45 }
 0x4c2   :  { %v3536_v39 = vsel %vm325_vm2, %v5201_v53, %v5202_v37  ;;  %3910 = vmatpush.msrb.mxu0 %v3531_v60  ;;  %v10497_v46 = vunpack.i.h.bf16 %v8695_v6  ;;  %3970 = vmatpush.msrb.mxu1 %v3527_v20  ;;  %v10498_v7 = vunpack.i.l.bf16 %v9045_v19  ;;  %v5247_v45 = vunpack.i.h.bf16 %v9181_v38  ;;  %v10499_v20 = vld [vmem:[#allocation28_spill] sm:$0xff] }
 0x4c3   :  { %3942 = vmatpush.msrb.mxu3 %v3287_v21  ;;  %3849 = vmatpush.msrb.mxu2 %v3536_v39  ;;  %v5266_v37 = vunpack.i.l.bf16 %v9205_v61  ;;  %v3535_v60 = vsel %vm325_vm2, %v9957_v52, %v5217_v24 }
 0x4c4   :  { %v3170_v21 = vsel %vm232_vm0, %v10497_v46, %v5251_v43  ;;  %v3406_v31 = vsel %vm294_vm3, %v10498_v7, %v5246_v26  ;;  %4228 = vmatmul.msk.f32.vlgmr.msrb.gmra.mxu0 %vm1952_vm9, %v9216_v28  ;;  %3975 = vmatpush.msra.mxu1 %v10499_v20  ;;  %v10500_v46 = vunpack.i.l.bf16 %v8836_v0 }
 0x4c5   :  { %3943 = vmatpush.msrb.mxu3 %v3170_v21  ;;  %3850 = vmatpush.msrb.mxu2 %v3535_v60  ;;  %v5267_v21 = vunpack.i.h.bf16 %v9205_v61  ;;  %v10502_v60 = vunpack.i.h.bf16 %v9045_v19  ;;  %v10505_v19 = vunpack.i.h.bf16 %v7970_v63 }
 0x4c6   :  { %3995 = vmatpush.msra.mxu0 %v3406_v31  ;;  %v3169_v39 = vsel %vm232_vm0, %v10500_v46, %v5252_v25  ;;  %v9251_v24 = vpop.permute.xlu1 %5259  ;;  %4227 = vmatmul.msk.f32.vlgmr.msrb.gmra.mxu2 %vm1952_vm9, %v9216_v28  ;;  %v10501_v31 = vld [vmem:[#allocation55_spill] sm:$0xff] }
 0x4c7   :  { %3915 = vmatpush.msra.mxu2 %v8552_v8  ;;  %3944 = vmatpush.msrb.mxu3 %v3169_v39  ;;  %v3405_v20 = vsel %vm294_vm3, %v10502_v60, %v5247_v45  ;;  %v10503_v8 = vunpack.i.h.bf16 %v8836_v0  ;;  %v10504_v39 = vunpack.i.h.bf16 %v8589_v58  ;;  %v10508_v60 = vunpack.i.l.bf16 %v7970_v63  ;;  %v10514_v63 = vld [vmem:[#allocation37_spill] sm:$0xff] }
 0x4c8   :  { %v9253_v7 = vpop.permute.xlu0 %5254  ;;  %3976 = vmatpush.msra.mxu1 %v10501_v31  ;;  %3996 = vmatpush.msra.mxu0 %v3405_v20 }
 0x4c9   :  { %3916 = vmatpush.msra.mxu2 %v8558_v9  ;;  %v3168_v46 = vsel %vm232_vm0, %v10503_v8, %v5266_v37  ;;  %v3004_v31 = vsel %vm189_vm4, %v10505_v19, %v10504_v39  ;;  %v10506_v9 = vunpack.i.l.bf16 %v8695_v6  ;;  %4229 = vmatmul.msk.f32.vlgmr.msrb.gmra.mxu1 %vm1952_vm9, %v9216_v28  ;;  %v10509_v8 = vld [vmem:[#allocation17_spill] sm:$0xff] }
 0x4ca   :  { %3945 = vmatpush.msrb.mxu3 %v3168_v46  ;;  %3977 = vmatpush.msra.mxu1 %v8613_v23  ;;  %v10507_v23 = vunpack.i.l.bf16 %v8589_v58  ;;  %v10510_v6 = vld [vmem:[#allocation69_spill] sm:$0xff]  ;;  %v10511_v46 = vld [vmem:[#allocation38_spill] sm:$0xff] }
 0x4cb   :  { %3917 = vmatpush.msra.mxu2 %v3004_v31  ;;  %v3167_v0 = vsel %vm232_vm0, %v10506_v9, %v5267_v21  ;;  %v10512_v31 = vld [vmem:[#allocation57_spill] sm:$0xff]  ;;  %v10513_v58 = vld [vmem:[#allocation70_spill] sm:$0xff]  ;;  %v9955_v9 = vunpack.i.l.bf16 %v8994_v34 }
 0x4cc   :  { %3946 = vmatpush.msrb.mxu3 %v3167_v0  ;;  %3978 = vmatpush.msra.mxu1 %v8624_v10  ;;  %v3003_v20 = vsel %vm189_vm4, %v10508_v60, %v10507_v23  ;;  %v9956_v10 = vunpack.i.h.bf16 %v8994_v34  ;;  %v9305_v0 = vpop.permute.xlu2 %5274  ;;  %v10515_v23 = vld [vmem:[#allocation18_spill] sm:$0xff]  ;;  %v10516_v60 = vunpack.i.h.bf16 %v8534_v49 }
 0x4cd   :  { %3918 = vmatpush.msra.mxu2 %v3003_v20  ;;  %v10517_v20 = vunpack.i.h.bf16 %v7961_v1 }
 0x4ce   :  { %3947 = vmatpush.msrb.mxu3 %v10509_v8  ;;  %3979 = vmatpush.msra.mxu1 %v10510_v6  ;;  %v9296_v39 = vpop.permute.xlu1 %5284  ;;  %v10518_v6 = vld [vmem:[#allocation51_spill] sm:$0xff] }
 0x4cf   :  { %3919 = vmatpush.msra.mxu2 %v10511_v46  ;;  %v2884_v8 = vsel %vm158_vm5, %v10517_v20, %v10516_v60  ;;  %v10519_v46 = vld [vmem:[#allocation81_spill] sm:$0xff] }
 0x4d0   :  { %v9298_v19 = vpop.permute.xlu0 %5269  ;;  %3948 = vmatpush.msrb.mxu3 %v10512_v31  ;;  %3980 = vmatpush.msra.mxu1 %v10513_v58  ;;  %v10520_v31 = vunpack.i.h.bf16 %v10519_v46  ;;  %v10523_v60 = vld [vmem:[#allocation65_spill] sm:$0xff] }
 0x4d1   :  { %3920 = vmatpush.msra.mxu2 %v10514_v63  ;;  %v10522_v63 = vunpack.i.l.bf16 %v7961_v1  ;;  %v9958_v52 = vunpack.i.h.bf16 %v9298_v19 }
 0x4d2   :  { %3949 = vmatpush.msrb.mxu3 %v10515_v23  ;;  %3981 = vmatpush.msra.mxu1 %v8570_v15  ;;  %v2998_v58 = vsel %vm189_vm4, %v10520_v31, %v9956_v10  ;;  %v10521_v15 = vunpack.i.l.bf16 %v8534_v49  ;;  %v10525_v49 = vld [vmem:[#allocation43_spill] sm:$0xff] }
 0x4d3   :  { %3921 = vmatpush.msra.mxu2 %v2884_v8 }
 0x4d4   :  { %3950 = vmatpush.msrb.mxu3 %v10518_v6  ;;  %3982 = vmatpush.msra.mxu1 %v8578_v40  ;;  %v2883_v23 = vsel %vm158_vm5, %v10522_v63, %v10521_v15  ;;  %v10524_v40 = vunpack.i.l.bf16 %v10519_v46  ;;  %v10526_v6 = vld [vmem:[#allocation56_spill] sm:$0xff]  ;;  %v10528_v46 = vld [vmem:[#allocation22_spill] sm:$0xff] }
 0x4d5   :  { %3922 = vmatpush.msra.mxu2 %v2883_v23  ;;  %3951 = vmatmul.f32.vlgmr.msrb.gmra.mxu3 %v8864_v18  ;;  %v10527_v15 = vld [vmem:[#allocation72_spill] sm:$0xff]  ;;  %v10530_v23 = vld [vmem:[#allocation25_spill] sm:$0xff] }
 0x4d6   :  { %4035 = vmatpush.msra.mxu3 %v2998_v58  ;;  %3983 = vmatpush.msra.mxu1 %v10523_v60  ;;  %v2997_v20 = vsel %vm189_vm4, %v10524_v40, %v9955_v9  ;;  %v9338_v1 = vpop.permute.xlu1 %5294  ;;  %v5257_v58 = vunpack.i.h.bf16 %v9253_v7  ;;  %v10529_v63 = vld [vmem:[#allocation40_spill] sm:$0xff]  ;;  %v10531_v60 = vunpack.i.h.bf16 %v10530_v23  ;;  %v10532_v40 = vunpack.i.h.bf16 %v7952_v55  ;;  %v10534_v9 = vld [vmem:[#allocation73_spill] sm:$0xff] }
 0x4d7   :  { %3923 = vmatpush.msra.mxu2 %v10525_v49  ;;  %v5297_v31 = vunpack.i.h.bf16 %v9338_v1  ;;  %v10533_v49 = vunpack.i.l.bf16 %v9002_v29  ;;  %v10536_v10 = vunpack.i.l.bf16 %v10530_v23 }
 0x4d8   :  { %4036 = vmatpush.msra.mxu3 %v2997_v20  ;;  %v9340_v8 = vpop.permute.xlu0 %5279  ;;  %3984 = vmatpush.msra.mxu1 %v10526_v6  ;;  %v2764_v20 = vsel %vm127_vm6, %v10532_v40, %v10531_v60  ;;  %v10537_v60 = vunpack.i.l.bf16 %v7952_v55  ;;  %v10540_v55 = vld [vmem:[#allocation83_spill] sm:$0xff] }
 0x4d9   :  { %3924 = vmatpush.msra.mxu2 %v10528_v46  ;;  %v3404_v6 = vsel %vm294_vm3, %v10533_v49, %v5297_v31  ;;  %v9362_v46 = vpop.permute.xlu2 %5309  ;;  %v10539_v49 = vld [vmem:[#allocation68_spill] sm:$0xff] }
 0x4da   :  { %4037 = vmatpush.msra.mxu3 %v10527_v15  ;;  %3985 = vmatpush.msra.mxu1 %v10529_v63  ;;  %v9959_v15 = vunpack.i.l.bf16 %v9298_v19  ;;  %v10535_v63 = vld [vmem:[#allocation45_spill] sm:$0xff]  ;;  %v2763_v40 = vsel %vm127_vm6, %v10537_v60, %v10536_v10 }
 0x4db   :  { %3925 = vmatpush.msra.mxu2 %v2764_v20  ;;  %3997 = vmatpush.msra.mxu0 %v3404_v6  ;;  %v10542_v6 = vld [vmem:[#allocation59_spill] sm:$0xff] }
 0x4dc   :  { %4038 = vmatpush.msra.mxu3 %v10534_v9  ;;  %3986 = vmatpush.msra.mxu1 %v10535_v63  ;;  %v10538_v9 = vunpack.i.h.bf16 %v9002_v29 }
 0x4dd   :  { %3926 = vmatpush.msra.mxu2 %v2763_v40  ;;  %v10544_v40 = vld [vmem:[#allocation27_spill] sm:$0xff] }
 0x4de   :  { %4039 = vmatpush.msra.mxu3 %v8945_v44  ;;  %v3403_v20 = vsel %vm294_vm3, %v10538_v9, %v5257_v58  ;;  %3987 = vmatpush.msra.mxu1 %v10539_v49  ;;  %v9382_v10 = vpop.permute.xlu1 %5299  ;;  %v10541_v44 = vunpack.i.l.bf16 %v9119_v35  ;;  %v10545_v9 = vunpack.i.h.bf16 %v9119_v35  ;;  %v10546_v49 = vld [vmem:[#allocation42_spill] sm:$0xff] }
 0x4df   :  { %3998 = vmatpush.msra.mxu0 %v3403_v20  ;;  %3927 = vmatpush.msra.mxu2 %v10540_v55  ;;  %v5302_v63 = vunpack.i.h.bf16 %v9382_v10  ;;  %v10547_v55 = vld [vmem:[#allocation84_spill] sm:$0xff]  ;;  %v5301_v38 = vunpack.i.l.bf16 %v9382_v10 }
 0x4e0   :  { %4040 = vmatpush.msra.mxu3 %v8951_v4  ;;  %v9384_v23 = vpop.permute.xlu0 %5289  ;;  %v3286_v29 = vsel %vm263_vm1, %v10541_v44, %v9959_v15  ;;  %3988 = vmatpush.msra.mxu1 %v10542_v6  ;;  %v10543_v4 = vld [vmem:[#allocation75_spill] sm:$0xff]  ;;  %v3285_v20 = vsel %vm263_vm1, %v10545_v9, %v9958_v52  ;;  %v10548_v44 = vunpack.i.h.bf16 %v10547_v55  ;;  %v10549_v6 = vunpack.i.h.bf16 %v7934_v59  ;;  %v10551_v9 = vld [vmem:[#allocation76_spill] sm:$0xff]  ;;  %v10552_v52 = vld [vmem:[#allocation53_spill] sm:$0xff] }
 0x4e1   :  { %v5291_v60 = vunpack.i.l.bf16 %v9384_v23  ;;  %3999 = vmatpush.msra.mxu0 %v3286_v29  ;;  %3928 = vmatpush.msra.mxu2 %v10544_v40  ;;  %v5277_v40 = vunpack.i.h.bf16 %v9305_v0  ;;  %v10553_v15 = vunpack.i.l.bf16 %v10547_v55 }
 0x4e2   :  { %4041 = vmatpush.msra.mxu3 %v10543_v4  ;;  %3989 = vmatpush.msra.mxu1 %v10546_v49  ;;  %v2644_v29 = vsel %vm96_vm7, %v10549_v6, %v10548_v44  ;;  %v10550_v4 = vunpack.i.l.bf16 %v9075_v56  ;;  %v5292_v49 = vunpack.i.h.bf16 %v9384_v23  ;;  %v10555_v6 = vunpack.i.h.bf16 %v9083_v42  ;;  %v9432_v23 = vpop.permute.xlu2 %5314 }
 0x4e3   :  { %4000 = vmatpush.msra.mxu0 %v3285_v20  ;;  %3929 = vmatpush.msra.mxu2 %v2644_v29  ;;  %v10554_v20 = vunpack.i.l.bf16 %v7934_v59  ;;  %v5287_v59 = vunpack.i.h.bf16 %v9296_v39  ;;  %v3283_v42 = vsel %vm263_vm1, %v5242_v48, %v5277_v40 }
 0x4e4   :  { %v3284_v35 = vsel %vm263_vm1, %v10550_v4, %v5302_v63  ;;  %4042 = vmatpush.msra.mxu3 %v10551_v9  ;;  %3990 = vmatpush.msra.mxu1 %v10552_v52  ;;  %v3526_v4 = vsel %vm325_vm2, %v10555_v6, %v5291_v60  ;;  %v5286_v9 = vunpack.i.l.bf16 %v9296_v39  ;;  %v10593_v39 = vld [vmem:[#allocation16_spill] sm:$0xff] }
 0x4e5   :  { %v2643_v44 = vsel %vm96_vm7, %v10554_v20, %v10553_v15  ;;  %4001 = vmatpush.msra.mxu0 %v3284_v35  ;;  %3991 = vmatmul.f32.vlgmr.msra.gmra.mxu1 %v8783_v16  ;;  %v10556_v15 = vunpack.i.h.bf16 %v9117_v17  ;;  %v10557_v20 = vld [vmem:[#allocation78_spill] sm:$0xff]  ;;  %v10558_v17 = vunpack.i.h.bf16 %v9039_v36 }
 0x4e6   :  { %4043 = vmatpush.msra.mxu3 %v8870_v41  ;;  %3930 = vmatpush.msra.mxu2 %v2643_v44  ;;  %v9444_v41 = vpop.permute.xlu1 %5304  ;;  %v3166_v56 = vsel %vm232_vm0, %v5251_v43, %v5286_v9  ;;  %v3165_v43 = vsel %vm232_vm0, %v5252_v25, %v5287_v59 }
 0x4e7   :  { %3931 = vmatmul.f32.vlgmr.msra.gmra.mxu2 %v8783_v16  ;;  %4002 = vmatpush.msra.mxu0 %v3283_v42  ;;  %v3525_v55 = vsel %vm325_vm2, %v10556_v15, %v5292_v49  ;;  %v5307_v6 = vunpack.i.h.bf16 %v9444_v41  ;;  %v5296_v15 = vunpack.i.l.bf16 %v9338_v1 }
 0x4e8   :  { %4027 = vmatpush.msrb.mxu2 %v3526_v4  ;;  %4044 = vmatpush.msra.mxu3 %v8876_v30  ;;  %v5320_v52 = vpop.permute.xlu0 %5319  ;;  %v5317_v30 = vunpack.i.h.bf16 %v9432_v23  ;;  %v10559_v4 = vld [vmem:[#allocation44_spill] sm:$0xff] }
 0x4e9   :  { %v5322_v29 = vunpack.i.h.bf16 %v5320_v52  ;;  %v5321_v35 = vunpack.i.l.bf16 %v5320_v52  ;;  %4003 = vmatpush.msra.mxu0 %v3166_v56  ;;  %v3163_v25 = vsel %vm232_vm0, %v5267_v21, %v5307_v6  ;;  %v10560_v52 = vld [vmem:[#allocation62_spill] sm:$0xff]  ;;  %v10563_v21 = vld [vmem:[#allocation77_spill] sm:$0xff] }
 0x4ea   :  { %4028 = vmatpush.msrb.mxu2 %v3525_v55  ;;  %4045 = vmatpush.msra.mxu3 %v10557_v20  ;;  %v3164_v36 = vsel %vm232_vm0, %v5266_v37, %v5317_v30  ;;  %v5330_v42 = vpop.permute.xlu2 %5329  ;;  %v10561_v37 = vld [vmem:[#allocation48_spill] sm:$0xff]  ;;  %v10564_v56 = vld [vmem:[#allocation33_spill] sm:$0xff] }
 0x4eb   :  { %v3524_v48 = vsel %vm325_vm2, %v10558_v17, %v5321_v35  ;;  %v3522_v44 = vsel %vm325_vm2, %v5291_v60, %v5322_v29  ;;  %4004 = vmatpush.msra.mxu0 %v3165_v43  ;;  %v5331_v20 = vunpack.i.l.bf16 %v5330_v42  ;;  %v10565_v17 = vunpack.i.l.bf16 %v9018_v47  ;;  %v10567_v43 = vld [vmem:[#allocation63_spill] sm:$0xff] }
 0x4ec   :  { %4046 = vmatpush.msra.mxu3 %v10559_v4  ;;  %4029 = vmatpush.msrb.mxu2 %v3524_v48  ;;  %v5332_v4 = vunpack.i.h.bf16 %v5330_v42  ;;  %v3402_v47 = vsel %vm294_vm3, %v5246_v26, %v5296_v15  ;;  %v10572_v42 = vunpack.i.h.bf16 %v8994_v34 }
 0x4ed   :  { %4087 = vmatpush.msrb.mxu1 %v3522_v44  ;;  %4005 = vmatpush.msra.mxu0 %v3164_v36  ;;  %v3542_v48 = vsel %vm325_vm2, %v5322_v29, %v10565_v17  ;;  %v10568_v29 = vld [vmem:[#allocation36_spill] sm:$0xff]  ;;  %v3540_v36 = vsel %vm325_vm2, %v5331_v20, %v5201_v53 }
 0x4ee   :  { %4047 = vmatpush.msra.mxu3 %v8807_v54  ;;  %v5325_v33 = vpop.permute.xlu1 %5324 }
 0x4ef   :  { %4006 = vmatpush.msra.mxu0 %v3163_v25  ;;  %v5327_v54 = vunpack.i.h.bf16 %v5325_v33  ;;  %v5326_v60 = vunpack.i.l.bf16 %v5325_v33  ;;  %v5262_v25 = vunpack.i.h.bf16 %v9251_v24  ;;  %v5261_v33 = vunpack.i.l.bf16 %v9251_v24 }
 0x4f0   :  { %4048 = vmatpush.msra.mxu3 %v8815_v27  ;;  %v10562_v27 = vunpack.i.h.bf16 %v9179_v50  ;;  %v10566_v50 = vunpack.i.l.bf16 %v8930_v57  ;;  %v3520_v57 = vsel %vm325_vm2, %v5321_v35, %v5331_v20  ;;  %v10569_v35 = vunpack.i.l.bf16 %v8003_v14 }
 0x4f1   :  { %4007 = vmatpush.msra.mxu0 %v10561_v37  ;;  %v3521_v61 = vsel %vm325_vm2, %v5292_v49, %v5327_v54  ;;  %v5256_v49 = vunpack.i.l.bf16 %v9253_v7  ;;  %v3519_v53 = vsel %vm325_vm2, %v5326_v60, %v5332_v4  ;;  %v10570_v24 = vunpack.i.l.bf16 %v9085_v62 }
 0x4f2   :  { %4049 = vmatpush.msra.mxu3 %v10560_v52  ;;  %v3523_v55 = vsel %vm325_vm2, %v10562_v27, %v5326_v60  ;;  %v3541_v44 = vsel %vm325_vm2, %v5327_v54, %v10566_v50  ;;  %4088 = vmatpush.msrb.mxu1 %v3521_v61  ;;  %v3422_v5 = vsel %vm294_vm3, %v5296_v15, %v10569_v35  ;;  %v10573_v62 = vunpack.i.l.bf16 %v8248_v13  ;;  %v10576_v13 = vld [vmem:[#allocation31_spill] sm:$0xff]  ;;  %v10585_v50 = vld [vmem:[#allocation74_spill] sm:$0xff] }
 0x4f3   :  { %4030 = vmatpush.msrb.mxu2 %v3523_v55  ;;  %4008 = vmatpush.msra.mxu0 %v10564_v56  ;;  %v3401_v26 = vsel %vm294_vm3, %v5247_v45, %v5256_v49  ;;  %v3539_v54 = vsel %vm325_vm2, %v5332_v4, %v10570_v24  ;;  %v3400_v14 = vsel %vm294_vm3, %v5297_v31, %v5261_v33  ;;  %v10571_v45 = vunpack.i.h.bf16 %v8531_v22  ;;  %v10587_v4 = vld [vmem:[#allocation29_spill] sm:$0xff]  ;;  %v10598_v24 = vld [vmem:[#allocation79_spill] sm:$0xff] }
 0x4f4   :  { %4050 = vmatpush.msra.mxu3 %v10563_v21  ;;  %4230 = vmatmul.msk.f32.vlgmr.msrb.gmra.mxu2 %vm1952_vm9, %v9216_v28  ;;  %v3421_v52 = vsel %vm294_vm3, %v5256_v49, %v10573_v62  ;;  %v3399_v1 = vsel %vm294_vm3, %v5257_v58, %v5262_v25  ;;  %v10574_v31 = vunpack.i.l.bf16 %v8531_v22  ;;  %v10575_v15 = vunpack.i.l.bf16 %v8994_v34  ;;  %v10606_v62 = vld [vmem:[#allocation61_spill] sm:$0xff] }
 0x4f5   :  { %4051 = vmatmul.f32.vlgmr.msra.gmra.mxu3 %v8783_v16  ;;  %4009 = vmatpush.msra.mxu0 %v10567_v43  ;;  %v2994_v60 = vsel %vm189_vm4, %v10572_v42, %v10571_v45  ;;  %v10577_v27 = vunpack.i.l.bf16 %v10576_v13  ;;  %v5276_v55 = vunpack.i.l.bf16 %v9305_v0  ;;  %v10578_v22 = vunpack.i.l.bf16 %v9298_v19  ;;  %v10588_v0 = vld [vmem:[#allocation52_spill] sm:$0xff]  ;;  %v10604_v42 = vld [vmem:[#allocation49_spill] sm:$0xff] }
 0x4f6   :  { %4147 = vmatpush.msrb.mxu3 %v3542_v48  ;;  %4055 = vmatpush.msra.mxu2 %v3402_v47  ;;  %v2993_v37 = vsel %vm189_vm4, %v10575_v15, %v10574_v31  ;;  %v10579_v58 = vunpack.i.l.bf16 %v7922_v12  ;;  %v5282_v21 = vunpack.i.h.bf16 %v9340_v8  ;;  %v5281_v20 = vunpack.i.l.bf16 %v9340_v8  ;;  %v10603_v45 = vld [vmem:[#allocation32_spill] sm:$0xff]  ;;  %v10609_v31 = vld [vmem:[#allocation47_spill] sm:$0xff]  ;;  %v10611_v15 = vld [vmem:[#allocation30_spill] sm:$0xff] }
 0x4f7   :  { %4010 = vmatpush.msra.mxu0 %v10568_v29  ;;  %4089 = vmatpush.msrb.mxu1 %v3520_v57  ;;  %v3420_v7 = vsel %vm294_vm3, %v5261_v33, %v10577_v27  ;;  %v3282_v34 = vsel %vm263_vm1, %v10578_v22, %v5301_v38  ;;  %v10580_v56 = vunpack.i.h.bf16 %v9298_v19  ;;  %v10582_v19 = vld [vmem:[#allocation71_spill] sm:$0xff]  ;;  %v10589_v43 = vunpack.i.l.bf16 %v10588_v0 }
 0x4f8   :  { %4148 = vmatpush.msrb.mxu3 %v3541_v44  ;;  %4011 = vmatmul.f32.vlgmr.msra.gmra.mxu0 %v8864_v18  ;;  %v3419_v61 = vsel %vm294_vm3, %v5262_v25, %v10579_v58  ;;  %v10583_v8 = vunpack.i.l.bf16 %v10582_v19  ;;  %v3279_v10 = vsel %vm263_vm1, %v5277_v40, %v5282_v21  ;;  %v5311_v47 = vunpack.i.l.bf16 %v9362_v46  ;;  %v10590_v29 = vld [vmem:[#allocation39_spill] sm:$0xff] }
 0x4f9   :  { %4056 = vmatpush.msra.mxu2 %v3401_v26  ;;  %4115 = vmatpush.msrb.mxu0 %v3422_v5  ;;  %v3281_v17 = vsel %vm263_vm1, %v10580_v56, %v5276_v55  ;;  %v3299_v40 = vsel %vm263_vm1, %v5282_v21, %v10589_v43  ;;  %v5312_v33 = vunpack.i.h.bf16 %v9362_v46  ;;  %v10595_v5 = vld [vmem:[#allocation21_spill] sm:$0xff] }
 0x4fa   :  { %4149 = vmatpush.msrb.mxu3 %v3540_v36  ;;  %4090 = vmatpush.msrb.mxu1 %v3519_v53  ;;  %v3301_v48 = vsel %vm263_vm1, %v5276_v55, %v10583_v8  ;;  %v3160_v26 = vsel %vm232_vm0, %v5317_v30, %v5311_v47 }
 0x4fb   :  { %4057 = vmatpush.msra.mxu2 %v3400_v14  ;;  %4116 = vmatpush.msrb.mxu0 %v3421_v52  ;;  %v3159_v46 = vsel %vm232_vm0, %v5307_v6, %v5312_v33  ;;  %v10601_v6 = vld [vmem:[#allocation80_spill] sm:$0xff]  ;;  %v10602_v14 = vld [vmem:[#allocation58_spill] sm:$0xff] }
 0x4fc   :  { %4150 = vmatpush.msrb.mxu3 %v3539_v54  ;;  %4095 = vmatpush.msra.mxu1 %v2994_v60  ;;  %v10599_v54 = vld [vmem:[#allocation41_spill] sm:$0xff]  ;;  %v10605_v60 = vld [vmem:[#allocation14_spill] sm:$0xff] }
 0x4fd   :  { %4231 = vmatmul.msk.f32.vlgmr.msrb.gmra.mxu1 %vm1952_vm9, %v9216_v28  ;;  %4058 = vmatpush.msra.mxu2 %v3399_v1  ;;  %v10607_v52 = vld [vmem:[#allocation54_spill] sm:$0xff]  ;;  %v10608_v1 = vld [vmem:[#allocation15_spill] sm:$0xff] }
 0x4fe   :  { %4096 = vmatpush.msra.mxu1 %v2993_v37  ;;  %4117 = vmatpush.msrb.mxu0 %v3420_v7  ;;  %v10612_v37 = vld [vmem:[#allocation35_spill] sm:$0xff]  ;;  %v3790_v7 = vpop.permute.xlu0 %3789 }
 0x4ff   :  { %4232 = vmatmul.msk.f32.vlgmr.msrb.gmra.mxu3 %vm1952_vm9, %v9216_v28  ;;  %4059 = vmatpush.msra.mxu2 %v3282_v34  ;;  %v3280_v28 = vsel %vm263_vm1, %v5302_v63, %v5281_v20  ;;  %v10584_v63 = vld [vmem:[#allocation60_spill] sm:$0xff] }
 0x500   :  { %4097 = vmatpush.msra.mxu1 %v9031_v11  ;;  %4118 = vmatpush.msrb.mxu0 %v3419_v61  ;;  %v10581_v11 = vunpack.i.l.bf16 %v8639_v2  ;;  %v5306_v2 = vunpack.i.l.bf16 %v9444_v41 }
 0x501   :  { %4060 = vmatpush.msra.mxu2 %v3281_v17 }
 0x502   :  { %4098 = vmatpush.msra.mxu1 %v9037_v3  ;;  %v3302_v12 = vsel %vm263_vm1, %v5301_v38, %v10581_v11  ;;  %v5316_v3 = vunpack.i.l.bf16 %v9432_v23  ;;  %v3161_v57 = vsel %vm232_vm0, %v5287_v59, %v5306_v2  ;;  %v10596_v23 = vld [vmem:[#allocation46_spill] sm:$0xff] }
 0x503   :  { %4119 = vmatpush.msrb.mxu0 %v3302_v12  ;;  %4061 = vmatpush.msra.mxu2 %v3280_v28  ;;  %v10597_v53 = vunpack.i.h.bf16 %v10596_v23  ;;  %v10600_v38 = vunpack.i.l.bf16 %v10596_v23 }
 0x504   :  { %4099 = vmatpush.msra.mxu1 %v8957_v51  ;;  %v10586_v51 = vunpack.i.l.bf16 %v10585_v50  ;;  %v3162_v49 = vsel %vm232_vm0, %v5286_v9, %v5316_v3  ;;  %v10591_v9 = vld [vmem:[#allocation64_spill] sm:$0xff] }
 0x505   :  { %4120 = vmatpush.msrb.mxu0 %v3301_v48  ;;  %4062 = vmatpush.msra.mxu2 %v3279_v10  ;;  %v10592_v36 = vunpack.i.h.bf16 %v10591_v9  ;;  %v10594_v59 = vunpack.i.l.bf16 %v10591_v9  ;;  %v3180_v30 = vsel %vm232_vm0, %v5311_v47, %v10597_v53  ;;  %v3179_v41 = vsel %vm232_vm0, %v5312_v33, %v10600_v38 }
 0x506   :  { %4100 = vmatpush.msra.mxu1 %v10584_v63  ;;  %v3300_v44 = vsel %vm263_vm1, %v5281_v20, %v10586_v51 }
 0x507   :  { %4121 = vmatpush.msrb.mxu0 %v3300_v44  ;;  %4063 = vmatpush.msra.mxu2 %v3162_v49  ;;  %v3182_v25 = vsel %vm232_vm0, %v5316_v3, %v10592_v36  ;;  %v3181_v35 = vsel %vm232_vm0, %v5306_v2, %v10594_v59  ;;  %v3872_v27 = vpop.f32.mrf.mxu3 }
 0x508   :  { %4101 = vmatpush.msra.mxu1 %v10587_v4  ;;  %v3873_v55 = vadd.f32 %v3872_v27, %v3790_v7  ;;  %v3832_v20 = vpop.f32.mrf.mxu1 }
 0x509   :  { %4122 = vmatpush.msrb.mxu0 %v3299_v40  ;;  %4064 = vmatpush.msra.mxu2 %v3161_v57 }
 0x50a   :  { %4102 = vmatpush.msra.mxu1 %v10590_v29 }
 0x50b   :  { %4123 = vmatpush.msrb.mxu0 %v3182_v25  ;;  %4065 = vmatpush.msra.mxu2 %v3160_v26 }
 0x50c   :  { %4103 = vmatpush.msra.mxu1 %v10593_v39 }
 0x50d   :  { %4124 = vmatpush.msrb.mxu0 %v3181_v35  ;;  %4066 = vmatpush.msra.mxu2 %v3159_v46 }
 0x50e   :  { %4104 = vmatpush.msra.mxu1 %v10595_v5 }
 0x50f   :  { %4125 = vmatpush.msrb.mxu0 %v3180_v30  ;;  %4067 = vmatpush.msra.mxu2 %v10598_v24 }
 0x510   :  { %4105 = vmatpush.msra.mxu1 %v10599_v54 }
 0x511   :  { %4126 = vmatpush.msrb.mxu0 %v3179_v41  ;;  %4068 = vmatpush.msra.mxu2 %v10601_v6 }
 0x512   :  { %4106 = vmatpush.msra.mxu1 %v10602_v14 }
 0x513   :  { %4127 = vmatpush.msrb.mxu0 %v10603_v45  ;;  %4069 = vmatpush.msra.mxu2 %v10604_v42 }
 0x514   :  { %4107 = vmatpush.msra.mxu1 %v10605_v60 }
 0x515   :  { %4128 = vmatpush.msrb.mxu0 %v10606_v62  ;;  %4070 = vmatpush.msra.mxu2 %v10607_v52 }
 0x516   :  { %4108 = vmatpush.msra.mxu1 %v10608_v1  ;;  %4071 = vmatmul.f32.vlgmr.msra.gmra.mxu2 %v8864_v18 }
 0x517   :  { %4129 = vmatpush.msrb.mxu0 %v10609_v31 }
 0x518   :  { %4109 = vmatpush.msra.mxu1 %v10610_v32 }
 0x519   :  { %4130 = vmatpush.msrb.mxu0 %v10611_v15 }
 0x51a   :  { %4110 = vmatpush.msra.mxu1 %v10612_v37  ;;  %4131 = vmatmul.f32.vlgmr.msrb.gmra.mxu0 %v8864_v18 }
 0x51b   :  { %4111 = vmatmul.f32.vlgmr.msra.gmra.mxu1 %v8783_v16 }
 0x524   :  { %v3892_v13 = vpop.f32.mrf.mxu0 }
 0x525   :  { %v3893_v22 = vadd.f32 %v3892_v13, %v3873_v55 }
 0x541   :  { %v3812_v34 = vpop.f32.mrf.mxu2  ;;  %v3912_v58 = vpop.f32.mrf.mxu0 }
 0x542   :  { %v3913_v61 = vadd.f32 %v3912_v58, %v3893_v22  ;;  %v3813_v21 = vadd.f32 %v3812_v34, %v3790_v7 }
 0x544   :  { %4156 = vst [vmem:[#allocation10 + $0x8] sm:$0xff] %v3913_v61  ;;  %v3833_v56 = vadd.f32 %v3832_v20, %v3813_v21 }
 0x546   :  { %v3972_v12 = vpop.f32.mrf.mxu1 }
 0x549   :  { %v3852_v17 = vpop.f32.mrf.mxu2 }
 0x54a   :  { %v3853_v11 = vadd.f32 %v3852_v17, %v3833_v56 }
 0x54c   :  { %4155 = vst [vmem:[#allocation10] sm:$0xff] %v3853_v11 }
 0x558   :  { %v3952_v18 = vpop.f32.mrf.mxu3 }
 0x562   :  { %v3992_v48 = vpop.f32.mrf.mxu1 }
 0x563   :  { %v3993_v3 = vadd.f32 %v3992_v48, %v3790_v7 }
 0x56a   :  { %v3932_v28 = vpop.f32.mrf.mxu2 }
 0x56b   :  { %v3933_v19 = vadd.f32 %v3932_v28, %v3790_v7 }
 0x56d   :  { %v3953_v16 = vadd.f32 %v3952_v18, %v3933_v19 }
 0x56f   :  { %v3973_v8 = vadd.f32 %v3972_v12, %v3953_v16 }
 0x571   :  { %4157 = vst [vmem:[#allocation10 + $0x10] sm:$0xff] %v3973_v8 }
 0x575   :  { %v4012_v2 = vpop.f32.mrf.mxu0 }
 0x576   :  { %v4013_v10 = vadd.f32 %v4012_v2, %v3993_v3 }
 0x577   :  { %v4032_v63 = vpop.f32.mrf.mxu2 }
 0x578   :  { %v4033_v50 = vadd.f32 %v4032_v63, %v4013_v10  ;;  %v4052_v44 = vpop.f32.mrf.mxu3 }
 0x579   :  { %v4053_v0 = vadd.f32 %v4052_v44, %v3790_v7 }
 0x57a   :  { %4158 = vst [vmem:[#allocation10 + $0x18] sm:$0xff] %v4033_v50  ;;  %v4092_v51 = vpop.f32.mrf.mxu1 }
 0x582   :  { %v4152_v47 = vpop.f32.mrf.mxu3 }
 0x597   :  { %v4132_v4 = vpop.f32.mrf.mxu0 }
 0x598   :  { %v4112_v49 = vpop.f32.mrf.mxu1 }
 0x599   :  { %v4113_v43 = vadd.f32 %v4112_v49, %v3790_v7  ;;  %v4072_v40 = vpop.f32.mrf.mxu2 }
 0x59a   :  { %v4073_v57 = vadd.f32 %v4072_v40, %v4053_v0 }
 0x59b   :  { %v4133_v29 = vadd.f32 %v4132_v4, %v4113_v43 }
 0x59c   :  { %v4093_v9 = vadd.f32 %v4092_v51, %v4073_v57 }
 0x59d   :  { %v4153_v36 = vadd.f32 %v4152_v47, %v4133_v29 }
 0x59e   :  { %4159 = vst [vmem:[#allocation10 + $0x20] sm:$0xff] %v4093_v9 }
 0x59f   :  { %4160 = vst [vmem:[#allocation10 + $0x28] sm:$0xff] %v4153_v36 }
 0x5a0   :  { %4171 = dma.vmem_to_hbm [thread:$0]  %s4167_s13, 768, %s4169_s16, [#allocation6]  }
 0x5a1   :  { %5437 = dma.done.wait [#allocation6], 768  }
 0x5a2   :  { %5438 = vsyncadd [#allocation6], 4294966528 }
 0x5a3   :  { %4176 = vsyncpa [#allocation5], 1 }
 0x5a4   :  { %4177 = vsyncpa [#allocation8], 1 }
 0x5a5   :  { %4178 = vsyncpa [#allocation6], 1 }

</bundles_post_ra>
